<compile_context>
chip_gen: v7x
topology: tpu7x:2x2x1
jax: 0.10.0
libtpu: 0.0.40
codegen_flags: <defaults>
</compile_context>

<pallas_src>
import functools

import jax
import jax.numpy as jnp
from jax.experimental import pallas as pl
from jax.experimental.pallas import tpu as pltpu


def _round_up(x, m):
    return (x + m - 1) // m * m


# ------------------------------ Pallas kernels ------------------------------

def _conv_relu_pool_kernel(p_ref, w_ref, b_ref, o_ref, *, rows):
    """conv (single merged matmul over pool phases) + 2x2 maxpool + bias + ReLU.

    p_ref: (4, rows, K*K*C) pool-phase-major im2col patches (bf16); rows%16==0.
    w_ref: (K*K*C, OC) packed conv weight (bf16).
    b_ref: (1, OC) bias (f32).
    o_ref: (rows, OC) pooled activations (bf16), rows ordered (hp, wp, b).
    """
    p = p_ref[...]
    # Leading-axis collapse (rows % 16 == 0 keeps bf16 sublane tiles aligned,
    # so this is a free re-view): one MXU push stream instead of 4 matmuls.
    z = jnp.dot(p.reshape(4 * rows, p.shape[-1]), w_ref[...],
                preferred_element_type=jnp.float32)          # (4*rows, OC) f32
    pooled = jnp.maximum(
        jnp.maximum(z[0 * rows:1 * rows], z[1 * rows:2 * rows]),
        jnp.maximum(z[2 * rows:3 * rows], z[3 * rows:4 * rows]))
    # bias + ReLU once, after the max: exact because +bias and ReLU are monotone.
    o_ref[...] = jnp.maximum(pooled + b_ref[...], 0.0).astype(o_ref.dtype)


def _conv_pool_fc_kernel(p_ref, wc_ref, bc_ref, w1_ref, b1_ref, w2_ref, b2_ref,
                         wm_ref, bm_ref, o_ref, y_ref, x_ref, *, batch, rows):
    """conv2 + maxpool + ReLU + fc1 + ReLU + fc2 + ReLU + mlp, all in VMEM.

    p_ref : (4, rows, 150) pool-phase-major conv2 patches (bf16); rows%16==0,
            valid rows are the first 25*batch, ordered (r = hp*5+wp, b).
    wc_ref: (150, 16) bf16;  bc_ref: (1, 16) f32
    w1_ref: (400, 120) bf16, feature f = r*16 + c (NHWC flatten); b1_ref (1,120)
    w2_ref: (120, 100) bf16; b2_ref: (1, 100)
    wm_ref: (100, 4) bf16;   bm_ref: (1, 4)
    o_ref : (batch, 4) f32 logits
    y_ref : (rows, 16) bf16 scratch  -- pooled conv2 activations
    x_ref : (batch, 400) bf16 scratch -- flattened fc1 input
    """
    p = p_ref[...]
    z = jnp.dot(p.reshape(4 * rows, p.shape[-1]), wc_ref[...],
                preferred_element_type=jnp.float32)          # (4*rows, 16)
    pooled = jnp.maximum(
        jnp.maximum(z[0 * rows:1 * rows], z[1 * rows:2 * rows]),
        jnp.maximum(z[2 * rows:3 * rows], z[3 * rows:4 * rows]))
    y_ref[...] = jnp.maximum(pooled + bc_ref[...], 0.0).astype(y_ref.dtype)

    # Gather the 25 pooled (batch,16) row groups into one (batch,400) block so
    # fc1 is a single K=400 matmul (instead of 25 K=16 accumulating matmuls).
    for r in range(25):
        x_ref[:, r * 16:(r + 1) * 16] = y_ref[r * batch:(r + 1) * batch, :]

    h = jnp.dot(x_ref[...], w1_ref[...], preferred_element_type=jnp.float32)
    h = jnp.maximum(h + b1_ref[...], 0.0).astype(jnp.bfloat16)   # fc1+ReLU (B,120)
    h = jnp.dot(h, w2_ref[...], preferred_element_type=jnp.float32)
    h = jnp.maximum(h + b2_ref[...], 0.0).astype(jnp.bfloat16)   # fc2+ReLU (B,100)
    o_ref[...] = (jnp.dot(h, wm_ref[...], preferred_element_type=jnp.float32)
                  + bm_ref[...])                                 # mlp head (B,4)


# ------------------------------- XLA-side glue ------------------------------

def _pooled_conv_patches(t, k):
    """Valid KxK conv patches for a conv followed by a 2x2/2 maxpool.

    t: (H, W, B, C) spatial-major activations.
    Returns (4, PH*PW*B, K*K*C): axis 0 is the pool phase d = di*2 + dj,
    rows are (hp, wp, b), columns are (kh, kw, c).
    """
    H, W, B, C = t.shape
    oh, ow = H - k + 1, W - k + 1
    ph, pw = oh // 2, ow // 2
    cols = [t[kh:kh + oh, kw:kw + ow] for kh in range(k) for kw in range(k)]
    p = jnp.stack(cols, axis=0)                  # (k*k, oh, ow, B, C)
    p = p.reshape(k * k, ph, 2, pw, 2, B, C)     # (kk, hp, di, wp, dj, b, c)
    p = p.transpose(2, 4, 1, 3, 5, 0, 6)         # (di, dj, hp, wp, b, kk, c)
    return p.reshape(4, ph * pw * B, k * k * C)


def _pad_rows(p, rows_to):
    rows = p.shape[1]
    if rows_to == rows:
        return p
    return jnp.pad(p, ((0, 0), (0, rows_to - rows), (0, 0)))


def init_params(key):
    """PyTorch-style U(-1/sqrt(fan_in), +) init, pre-packed for the kernels."""
    ks = jax.random.split(key, 10)

    def u(k, shape, fan_in):
        bound = 1.0 / jnp.sqrt(jnp.float32(fan_in))
        return jax.random.uniform(k, shape, jnp.float32, -bound, bound)

    w_c1 = u(ks[0], (6, 3, 5, 5), 75)
    b_c1 = u(ks[1], (6,), 75)
    w_c2 = u(ks[2], (16, 6, 5, 5), 150)
    b_c2 = u(ks[3], (16,), 150)
    w_f1 = u(ks[4], (120, 400), 400)
    b_f1 = u(ks[5], (120,), 400)
    w_f2 = u(ks[6], (100, 120), 120)
    b_f2 = u(ks[7], (100,), 120)
    w_m = u(ks[8], (4, 100), 100)
    b_m = u(ks[9], (4,), 100)

    return {
        # conv weights packed rows (kh*K+kw)*C + c -> cols OC; bf16 (MXU native)
        "conv1_w": jnp.transpose(w_c1, (2, 3, 1, 0)).reshape(75, 6)
                      .astype(jnp.bfloat16),
        "conv1_b": b_c1.reshape(1, 6),
        "conv2_w": jnp.transpose(w_c2, (2, 3, 1, 0)).reshape(150, 16)
                      .astype(jnp.bfloat16),
        "conv2_b": b_c2.reshape(1, 16),
        # TODO(synk): feature order f = (hp*5+wp)*16 + c (NHWC flatten) is the
        # stand-in's own convention; porting trained torch weights (NCHW
        # flatten) would require repacking w_f1 channel-major.
        "fc1_w": w_f1.T.astype(jnp.bfloat16),    # (400, 120)
        "fc1_b": b_f1.reshape(1, 120),
        "fc2_w": w_f2.T.astype(jnp.bfloat16),    # (120, 100)
        "fc2_b": b_f2.reshape(1, 100),
        "mlp_w": w_m.T.astype(jnp.bfloat16),     # (100, 4)
        "mlp_b": b_m.reshape(1, 4),
    }


def four_class_classifier_forward(params, x):
    """x: (B, 3, 32, 32) NCHW float32 -> (B, 4) logits."""
    B = x.shape[0]

    # ---- conv1 + ReLU + pool1 (one pallas_call, row-tiled "parallel" grid) ----
    t = jnp.transpose(x, (2, 3, 0, 1))                      # (32, 32, B, 3)
    p1 = _pooled_conv_patches(t, 5).astype(jnp.bfloat16)    # (4, 14*14*B, 75)
    r1 = 14 * 14 * B
    r1p = _round_up(r1, 16)          # bf16 sublane-tile alignment for the merge
    p1 = _pad_rows(p1, r1p)
    tr = min(512, r1p)               # row tile (always a multiple of 16)
    grid1 = pl.cdiv(r1p, tr)
    y1 = pl.pallas_call(
        functools.partial(_conv_relu_pool_kernel, rows=tr),
        out_shape=jax.ShapeDtypeStruct((r1p, 6), jnp.bfloat16),
        grid=(grid1,),
        in_specs=[
            pl.BlockSpec((4, tr, 75), lambda i: (0, i, 0)),
            pl.BlockSpec((75, 6), lambda i: (0, 0)),
            pl.BlockSpec((1, 6), lambda i: (0, 0)),
        ],
        out_specs=pl.BlockSpec((tr, 6), lambda i: (i, 0)),
        compiler_params=pltpu.CompilerParams(
            dimension_semantics=("parallel",),
            allow_input_fusion=[True, False, False],
            vmem_limit_bytes=32 * 1024 * 1024),
    )(p1, params["conv1_w"], params["conv1_b"])             # (r1p, 6) bf16

    # ---- conv2 + pool2 + fc1 + fc2 + mlp (one pallas_call, all in VMEM) ----
    y1 = y1[:r1].reshape(14, 14, B, 6)                      # (H', W', B, C) bf16
    p2 = _pooled_conv_patches(y1, 5)                        # (4, 25*B, 150) bf16
    r2 = 25 * B
    r2p = _round_up(r2, 16)
    p2 = _pad_rows(p2, r2p)
    out = pl.pallas_call(
        functools.partial(_conv_pool_fc_kernel, batch=B, rows=r2p),
        out_shape=jax.ShapeDtypeStruct((B, 4), jnp.float32),
        in_specs=[
            pl.BlockSpec((4, r2p, 150), lambda: (0, 0, 0)),
            pl.BlockSpec((150, 16), lambda: (0, 0)),
            pl.BlockSpec((1, 16), lambda: (0, 0)),
            pl.BlockSpec((400, 120), lambda: (0, 0)),
            pl.BlockSpec((1, 120), lambda: (0, 0)),
            pl.BlockSpec((120, 100), lambda: (0, 0)),
            pl.BlockSpec((1, 100), lambda: (0, 0)),
            pl.BlockSpec((100, 4), lambda: (0, 0)),
            pl.BlockSpec((1, 4), lambda: (0, 0)),
        ],
        out_specs=pl.BlockSpec((B, 4), lambda: (0, 0)),
        scratch_shapes=[pltpu.VMEM((r2p, 16), jnp.bfloat16),
                        pltpu.VMEM((B, 400), jnp.bfloat16)],
        compiler_params=pltpu.CompilerParams(
            allow_input_fusion=[True] + [False] * 8,
            vmem_limit_bytes=32 * 1024 * 1024),
    )(p2, params["conv2_w"], params["conv2_b"],
      params["fc1_w"], params["fc1_b"],
      params["fc2_w"], params["fc2_b"],
      params["mlp_w"], params["mlp_b"])
    return out


if __name__ == "__main__":
    key = jax.random.PRNGKey(0)
    pkey, xkey = jax.random.split(key)
    params = init_params(pkey)
    # 32x32 input is forced by the stand-in backbone's fc1 expecting 16*5*5.
    x = jax.random.normal(xkey, (2, 3, 32, 32), dtype=jnp.float32)

    out = jax.jit(four_class_classifier_forward)(params, x)
    out = jax.block_until_ready(out)
    assert out.shape == (2, 4) and out.dtype == jnp.float32
    print("KERNEL_OK")
</pallas_src>

<mosaic_0001>
module attributes {stable_mosaic.version = 11 : i64} {
  func.func @_conv_relu_pool_kernel(%arg0: i32, %arg1: memref<4x400x75xbf16, #tpu.memory_space<vmem>>, %arg2: memref<75x6xbf16, #tpu.memory_space<vmem>>, %arg3: memref<1x6xf32, #tpu.memory_space<vmem>>, %arg4: memref<400x6xbf16, #tpu.memory_space<vmem>>) attributes {dimension_semantics = [#tpu.dimension_semantics<parallel>], iteration_bounds = array<i64: 1>, scalar_prefetch = 0 : i64, scratch_operands = 0 : i64, tpu.core_type = #tpu.core_type<tc>, window_params = [{transform_indices = @transform_0, window_bounds = array<i64: 4, 400, 75>}, {pipeline_mode = #tpu.pipeline_mode<synchronous>, transform_indices = @transform_1, window_bounds = array<i64: 75, 6>}, {pipeline_mode = #tpu.pipeline_mode<synchronous>, transform_indices = @transform_2, window_bounds = array<i64: 1, 6>}, {transform_indices = @transform_3, window_bounds = array<i64: 400, 6>}]} {
    %c0 = arith.constant 0 : index
    %c0_0 = arith.constant 0 : index
    %c0_1 = arith.constant 0 : index
    %0 = vector.load %arg1[%c0, %c0_0, %c0_1] : memref<4x400x75xbf16, #tpu.memory_space<vmem>>, vector<4x400x75xbf16>
    %1 = vector.shape_cast %0 : vector<4x400x75xbf16> to vector<1600x75xbf16>
    %c0_2 = arith.constant 0 : index
    %c0_3 = arith.constant 0 : index
    %2 = vector.load %arg2[%c0_2, %c0_3] : memref<75x6xbf16, #tpu.memory_space<vmem>>, vector<75x6xbf16>
    %cst = arith.constant dense<0.000000e+00> : vector<1600x6xf32>
    %3 = tpu.matmul %1, %2, %cst {dimension_numbers = #tpu.dot_dimension_numbers<[1], [0], [0], [1], [0, 0, 1, 1], [], []>} : vector<1600x75xbf16>, vector<75x6xbf16>, vector<1600x6xf32> -> vector<1600x6xf32>
    %4 = vector.extract_strided_slice %3 {offsets = [0, 0], sizes = [400, 6], strides = [1, 1]} : vector<1600x6xf32> to vector<400x6xf32>
    %5 = vector.extract_strided_slice %3 {offsets = [400, 0], sizes = [400, 6], strides = [1, 1]} : vector<1600x6xf32> to vector<400x6xf32>
    %6 = arith.maximumf %4, %5 : vector<400x6xf32>
    %7 = vector.extract_strided_slice %3 {offsets = [800, 0], sizes = [400, 6], strides = [1, 1]} : vector<1600x6xf32> to vector<400x6xf32>
    %8 = vector.extract_strided_slice %3 {offsets = [1200, 0], sizes = [400, 6], strides = [1, 1]} : vector<1600x6xf32> to vector<400x6xf32>
    %9 = arith.maximumf %7, %8 : vector<400x6xf32>
    %10 = arith.maximumf %6, %9 : vector<400x6xf32>
    %c0_4 = arith.constant 0 : index
    %c0_5 = arith.constant 0 : index
    %11 = vector.load %arg3[%c0_4, %c0_5] : memref<1x6xf32, #tpu.memory_space<vmem>>, vector<1x6xf32>
    %12 = vector.broadcast %11 : vector<1x6xf32> to vector<400x6xf32>
    %13 = arith.addf %10, %12 : vector<400x6xf32>
    %cst_6 = arith.constant 0.000000e+00 : f32
    %14 = vector.broadcast %cst_6 : f32 to vector<400x6xf32>
    %15 = arith.maximumf %13, %14 : vector<400x6xf32>
    %16 = arith.truncf %15 : vector<400x6xf32> to vector<400x6xbf16>
    %c0_7 = arith.constant 0 : index
    %c0_8 = arith.constant 0 : index
    %17 = vector.load %arg4[%c0_7, %c0_8] : memref<400x6xbf16, #tpu.memory_space<vmem>>, vector<400x6xbf16>
    tpu.vector_store %arg4[%c0_7, %c0_8], %16 {strides = array<i32>} : memref<400x6xbf16, #tpu.memory_space<vmem>>, vector<400x6xbf16>,
    return
  }
  func.func @transform_0(%arg0: i32) -> (i32, i32, i32) {
    %c0_i32 = arith.constant 0 : i32
    %c0_i32_0 = arith.constant 0 : i32
    %c0_i32_1 = arith.constant 0 : i32
    return %c0_i32, %arg0, %c0_i32_0 : i32, i32, i32
  }
  func.func @transform_1(%arg0: i32) -> (i32, i32) {
    %c0_i32 = arith.constant 0 : i32
    %c0_i32_0 = arith.constant 0 : i32
    %c0_i32_1 = arith.constant 0 : i32
    return %c0_i32, %c0_i32_0 : i32, i32
  }
  func.func @transform_2(%arg0: i32) -> (i32, i32) {
    %c0_i32 = arith.constant 0 : i32
    %c0_i32_0 = arith.constant 0 : i32
    %c0_i32_1 = arith.constant 0 : i32
    return %c0_i32, %c0_i32_0 : i32, i32
  }
  func.func @transform_3(%arg0: i32) -> (i32, i32) {
    %c0_i32 = arith.constant 0 : i32
    %c0_i32_0 = arith.constant 0 : i32
    return %arg0, %c0_i32 : i32, i32
  }
}

module attributes {stable_mosaic.version = 11 : i64} {
  func.func @_conv_pool_fc_kernel(%arg0: memref<4x64x150xbf16, #tpu.memory_space<vmem>>, %arg1: memref<150x16xbf16, #tpu.memory_space<vmem>>, %arg2: memref<1x16xf32, #tpu.memory_space<vmem>>, %arg3: memref<400x120xbf16, #tpu.memory_space<vmem>>, %arg4: memref<1x120xf32, #tpu.memory_space<vmem>>, %arg5: memref<120x100xbf16, #tpu.memory_space<vmem>>, %arg6: memref<1x100xf32, #tpu.memory_space<vmem>>, %arg7: memref<100x4xbf16, #tpu.memory_space<vmem>>, %arg8: memref<1x4xf32, #tpu.memory_space<vmem>>, %arg9: memref<2x4xf32, #tpu.memory_space<vmem>>, %arg10: memref<64x16xbf16, #tpu.memory_space<vmem>>, %arg11: memref<2x400xbf16, #tpu.memory_space<vmem>>) attributes {dimension_semantics = [], scalar_prefetch = 0 : i64, scratch_operands = 2 : i64, tpu.core_type = #tpu.core_type<tc>} {
    %c0 = arith.constant 0 : index
    %c0_0 = arith.constant 0 : index
    %c0_1 = arith.constant 0 : index
    %0 = vector.load %arg0[%c0, %c0_0, %c0_1] : memref<4x64x150xbf16, #tpu.memory_space<vmem>>, vector<4x64x150xbf16>
    %1 = vector.shape_cast %0 : vector<4x64x150xbf16> to vector<256x150xbf16>
    %c0_2 = arith.constant 0 : index
    %c0_3 = arith.constant 0 : index
    %2 = vector.load %arg1[%c0_2, %c0_3] : memref<150x16xbf16, #tpu.memory_space<vmem>>, vector<150x16xbf16>
    %cst = arith.constant dense<0.000000e+00> : vector<256x16xf32>
    %3 = tpu.matmul %1, %2, %cst {dimension_numbers = #tpu.dot_dimension_numbers<[1], [0], [0], [1], [0, 0, 1, 1], [], []>} : vector<256x150xbf16>, vector<150x16xbf16>, vector<256x16xf32> -> vector<256x16xf32>
    %4 = vector.extract_strided_slice %3 {offsets = [0, 0], sizes = [64, 16], strides = [1, 1]} : vector<256x16xf32> to vector<64x16xf32>
    %5 = vector.extract_strided_slice %3 {offsets = [64, 0], sizes = [64, 16], strides = [1, 1]} : vector<256x16xf32> to vector<64x16xf32>
    %6 = arith.maximumf %4, %5 : vector<64x16xf32>
    %7 = vector.extract_strided_slice %3 {offsets = [128, 0], sizes = [64, 16], strides = [1, 1]} : vector<256x16xf32> to vector<64x16xf32>
    %8 = vector.extract_strided_slice %3 {offsets = [192, 0], sizes = [64, 16], strides = [1, 1]} : vector<256x16xf32> to vector<64x16xf32>
    %9 = arith.maximumf %7, %8 : vector<64x16xf32>
    %10 = arith.maximumf %6, %9 : vector<64x16xf32>
    %c0_4 = arith.constant 0 : index
    %c0_5 = arith.constant 0 : index
    %11 = vector.load %arg2[%c0_4, %c0_5] : memref<1x16xf32, #tpu.memory_space<vmem>>, vector<1x16xf32>
    %12 = vector.broadcast %11 : vector<1x16xf32> to vector<64x16xf32>
    %13 = arith.addf %10, %12 : vector<64x16xf32>
    %cst_6 = arith.constant 0.000000e+00 : f32
    %14 = vector.broadcast %cst_6 : f32 to vector<64x16xf32>
    %15 = arith.maximumf %13, %14 : vector<64x16xf32>
    %16 = arith.truncf %15 : vector<64x16xf32> to vector<64x16xbf16>
    %c0_7 = arith.constant 0 : index
    %c0_8 = arith.constant 0 : index
    %17 = vector.load %arg10[%c0_7, %c0_8] : memref<64x16xbf16, #tpu.memory_space<vmem>>, vector<64x16xbf16>
    tpu.vector_store %arg10[%c0_7, %c0_8], %16 {strides = array<i32>} : memref<64x16xbf16, #tpu.memory_space<vmem>>, vector<64x16xbf16>,
    %c0_9 = arith.constant 0 : index
    %c0_10 = arith.constant 0 : index
    %18 = vector.load %arg10[%c0_9, %c0_10] : memref<64x16xbf16, #tpu.memory_space<vmem>>, vector<2x16xbf16>
    %c0_11 = arith.constant 0 : index
    %c0_12 = arith.constant 0 : index
    %19 = vector.load %arg11[%c0_11, %c0_12] : memref<2x400xbf16, #tpu.memory_space<vmem>>, vector<2x16xbf16>
    tpu.vector_store %arg11[%c0_11, %c0_12], %18 {strides = array<i32>} : memref<2x400xbf16, #tpu.memory_space<vmem>>, vector<2x16xbf16>,
    %c2 = arith.constant 2 : index
    %c0_13 = arith.constant 0 : index
    %20 = vector.load %arg10[%c2, %c0_13] : memref<64x16xbf16, #tpu.memory_space<vmem>>, vector<2x16xbf16>
    %c0_14 = arith.constant 0 : index
    %c16 = arith.constant 16 : index
    %21 = vector.load %arg11[%c0_14, %c16] : memref<2x400xbf16, #tpu.memory_space<vmem>>, vector<2x16xbf16>
    tpu.vector_store %arg11[%c0_14, %c16], %20 {strides = array<i32>} : memref<2x400xbf16, #tpu.memory_space<vmem>>, vector<2x16xbf16>,
    %c4 = arith.constant 4 : index
    %c0_15 = arith.constant 0 : index
    %22 = vector.load %arg10[%c4, %c0_15] : memref<64x16xbf16, #tpu.memory_space<vmem>>, vector<2x16xbf16>
    %c0_16 = arith.constant 0 : index
    %c32 = arith.constant 32 : index
    %23 = vector.load %arg11[%c0_16, %c32] : memref<2x400xbf16, #tpu.memory_space<vmem>>, vector<2x16xbf16>
    tpu.vector_store %arg11[%c0_16, %c32], %22 {strides = array<i32>} : memref<2x400xbf16, #tpu.memory_space<vmem>>, vector<2x16xbf16>,
    %c6 = arith.constant 6 : index
    %c0_17 = arith.constant 0 : index
    %24 = vector.load %arg10[%c6, %c0_17] : memref<64x16xbf16, #tpu.memory_space<vmem>>, vector<2x16xbf16>
    %c0_18 = arith.constant 0 : index
    %c48 = arith.constant 48 : index
    %25 = vector.load %arg11[%c0_18, %c48] : memref<2x400xbf16, #tpu.memory_space<vmem>>, vector<2x16xbf16>
    tpu.vector_store %arg11[%c0_18, %c48], %24 {strides = array<i32>} : memref<2x400xbf16, #tpu.memory_space<vmem>>, vector<2x16xbf16>,
    %c8 = arith.constant 8 : index
    %c0_19 = arith.constant 0 : index
    %26 = vector.load %arg10[%c8, %c0_19] : memref<64x16xbf16, #tpu.memory_space<vmem>>, vector<2x16xbf16>
    %c0_20 = arith.constant 0 : index
    %c64 = arith.constant 64 : index
    %27 = vector.load %arg11[%c0_20, %c64] : memref<2x400xbf16, #tpu.memory_space<vmem>>, vector<2x16xbf16>
    tpu.vector_store %arg11[%c0_20, %c64], %26 {strides = array<i32>} : memref<2x400xbf16, #tpu.memory_space<vmem>>, vector<2x16xbf16>,
    %c10 = arith.constant 10 : index
    %c0_21 = arith.constant 0 : index
    %28 = vector.load %arg10[%c10, %c0_21] : memref<64x16xbf16, #tpu.memory_space<vmem>>, vector<2x16xbf16>
    %c0_22 = arith.constant 0 : index
    %c80 = arith.constant 80 : index
    %29 = vector.load %arg11[%c0_22, %c80] : memref<2x400xbf16, #tpu.memory_space<vmem>>, vector<2x16xbf16>
    tpu.vector_store %arg11[%c0_22, %c80], %28 {strides = array<i32>} : memref<2x400xbf16, #tpu.memory_space<vmem>>, vector<2x16xbf16>,
    %c12 = arith.constant 12 : index
    %c0_23 = arith.constant 0 : index
    %30 = vector.load %arg10[%c12, %c0_23] : memref<64x16xbf16, #tpu.memory_space<vmem>>, vector<2x16xbf16>
    %c0_24 = arith.constant 0 : index
    %c96 = arith.constant 96 : index
    %31 = vector.load %arg11[%c0_24, %c96] : memref<2x400xbf16, #tpu.memory_space<vmem>>, vector<2x16xbf16>
    tpu.vector_store %arg11[%c0_24, %c96], %30 {strides = array<i32>} : memref<2x400xbf16, #tpu.memory_space<vmem>>, vector<2x16xbf16>,
    %c14 = arith.constant 14 : index
    %c0_25 = arith.constant 0 : index
    %32 = vector.load %arg10[%c14, %c0_25] : memref<64x16xbf16, #tpu.memory_space<vmem>>, vector<2x16xbf16>
    %c0_26 = arith.constant 0 : index
    %c112 = arith.constant 112 : index
    %33 = vector.load %arg11[%c0_26, %c112] : memref<2x400xbf16, #tpu.memory_space<vmem>>, vector<2x16xbf16>
    tpu.vector_store %arg11[%c0_26, %c112], %32 {strides = array<i32>} : memref<2x400xbf16, #tpu.memory_space<vmem>>, vector<2x16xbf16>,
    %c16_27 = arith.constant 16 : index
    %c0_28 = arith.constant 0 : index
    %34 = vector.load %arg10[%c16_27, %c0_28] : memref<64x16xbf16, #tpu.memory_space<vmem>>, vector<2x16xbf16>
    %c0_29 = arith.constant 0 : index
    %c128 = arith.constant 128 : index
    %35 = vector.load %arg11[%c0_29, %c128] : memref<2x400xbf16, #tpu.memory_space<vmem>>, vector<2x16xbf16>
    tpu.vector_store %arg11[%c0_29, %c128], %34 {strides = array<i32>} : memref<2x400xbf16, #tpu.memory_space<vmem>>, vector<2x16xbf16>,
    %c18 = arith.constant 18 : index
    %c0_30 = arith.constant 0 : index
    %36 = vector.load %arg10[%c18, %c0_30] : memref<64x16xbf16, #tpu.memory_space<vmem>>, vector<2x16xbf16>
    %c0_31 = arith.constant 0 : index
    %c144 = arith.constant 144 : index
    %37 = vector.load %arg11[%c0_31, %c144] : memref<2x400xbf16, #tpu.memory_space<vmem>>, vector<2x16xbf16>
    tpu.vector_store %arg11[%c0_31, %c144], %36 {strides = array<i32>} : memref<2x400xbf16, #tpu.memory_space<vmem>>, vector<2x16xbf16>,
    %c20 = arith.constant 20 : index
    %c0_32 = arith.constant 0 : index
    %38 = vector.load %arg10[%c20, %c0_32] : memref<64x16xbf16, #tpu.memory_space<vmem>>, vector<2x16xbf16>
    %c0_33 = arith.constant 0 : index
    %c160 = arith.constant 160 : index
    %39 = vector.load %arg11[%c0_33, %c160] : memref<2x400xbf16, #tpu.memory_space<vmem>>, vector<2x16xbf16>
    tpu.vector_store %arg11[%c0_33, %c160], %38 {strides = array<i32>} : memref<2x400xbf16, #tpu.memory_space<vmem>>, vector<2x16xbf16>,
    %c22 = arith.constant 22 : index
    %c0_34 = arith.constant 0 : index
    %40 = vector.load %arg10[%c22, %c0_34] : memref<64x16xbf16, #tpu.memory_space<vmem>>, vector<2x16xbf16>
    %c0_35 = arith.constant 0 : index
    %c176 = arith.constant 176 : index
    %41 = vector.load %arg11[%c0_35, %c176] : memref<2x400xbf16, #tpu.memory_space<vmem>>, vector<2x16xbf16>
    tpu.vector_store %arg11[%c0_35, %c176], %40 {strides = array<i32>} : memref<2x400xbf16, #tpu.memory_space<vmem>>, vector<2x16xbf16>,
    %c24 = arith.constant 24 : index
    %c0_36 = arith.constant 0 : index
    %42 = vector.load %arg10[%c24, %c0_36] : memref<64x16xbf16, #tpu.memory_space<vmem>>, vector<2x16xbf16>
    %c0_37 = arith.constant 0 : index
    %c192 = arith.constant 192 : index
    %43 = vector.load %arg11[%c0_37, %c192] : memref<2x400xbf16, #tpu.memory_space<vmem>>, vector<2x16xbf16>
    tpu.vector_store %arg11[%c0_37, %c192], %42 {strides = array<i32>} : memref<2x400xbf16, #tpu.memory_space<vmem>>, vector<2x16xbf16>,
    %c26 = arith.constant 26 : index
    %c0_38 = arith.constant 0 : index
    %44 = vector.load %arg10[%c26, %c0_38] : memref<64x16xbf16, #tpu.memory_space<vmem>>, vector<2x16xbf16>
    %c0_39 = arith.constant 0 : index
    %c208 = arith.constant 208 : index
    %45 = vector.load %arg11[%c0_39, %c208] : memref<2x400xbf16, #tpu.memory_space<vmem>>, vector<2x16xbf16>
    tpu.vector_store %arg11[%c0_39, %c208], %44 {strides = array<i32>} : memref<2x400xbf16, #tpu.memory_space<vmem>>, vector<2x16xbf16>,
    %c28 = arith.constant 28 : index
    %c0_40 = arith.constant 0 : index
    %46 = vector.load %arg10[%c28, %c0_40] : memref<64x16xbf16, #tpu.memory_space<vmem>>, vector<2x16xbf16>
    %c0_41 = arith.constant 0 : index
    %c224 = arith.constant 224 : index
    %47 = vector.load %arg11[%c0_41, %c224] : memref<2x400xbf16, #tpu.memory_space<vmem>>, vector<2x16xbf16>
    tpu.vector_store %arg11[%c0_41, %c224], %46 {strides = array<i32>} : memref<2x400xbf16, #tpu.memory_space<vmem>>, vector<2x16xbf16>,
    %c30 = arith.constant 30 : index
    %c0_42 = arith.constant 0 : index
    %48 = vector.load %arg10[%c30, %c0_42] : memref<64x16xbf16, #tpu.memory_space<vmem>>, vector<2x16xbf16>
    %c0_43 = arith.constant 0 : index
    %c240 = arith.constant 240 : index
    %49 = vector.load %arg11[%c0_43, %c240] : memref<2x400xbf16, #tpu.memory_space<vmem>>, vector<2x16xbf16>
    tpu.vector_store %arg11[%c0_43, %c240], %48 {strides = array<i32>} : memref<2x400xbf16, #tpu.memory_space<vmem>>, vector<2x16xbf16>,
    %c32_44 = arith.constant 32 : index
    %c0_45 = arith.constant 0 : index
    %50 = vector.load %arg10[%c32_44, %c0_45] : memref<64x16xbf16, #tpu.memory_space<vmem>>, vector<2x16xbf16>
    %c0_46 = arith.constant 0 : index
    %c256 = arith.constant 256 : index
    %51 = vector.load %arg11[%c0_46, %c256] : memref<2x400xbf16, #tpu.memory_space<vmem>>, vector<2x16xbf16>
    tpu.vector_store %arg11[%c0_46, %c256], %50 {strides = array<i32>} : memref<2x400xbf16, #tpu.memory_space<vmem>>, vector<2x16xbf16>,
    %c34 = arith.constant 34 : index
    %c0_47 = arith.constant 0 : index
    %52 = vector.load %arg10[%c34, %c0_47] : memref<64x16xbf16, #tpu.memory_space<vmem>>, vector<2x16xbf16>
    %c0_48 = arith.constant 0 : index
    %c272 = arith.constant 272 : index
    %53 = vector.load %arg11[%c0_48, %c272] : memref<2x400xbf16, #tpu.memory_space<vmem>>, vector<2x16xbf16>
    tpu.vector_store %arg11[%c0_48, %c272], %52 {strides = array<i32>} : memref<2x400xbf16, #tpu.memory_space<vmem>>, vector<2x16xbf16>,
    %c36 = arith.constant 36 : index
    %c0_49 = arith.constant 0 : index
    %54 = vector.load %arg10[%c36, %c0_49] : memref<64x16xbf16, #tpu.memory_space<vmem>>, vector<2x16xbf16>
    %c0_50 = arith.constant 0 : index
    %c288 = arith.constant 288 : index
    %55 = vector.load %arg11[%c0_50, %c288] : memref<2x400xbf16, #tpu.memory_space<vmem>>, vector<2x16xbf16>
    tpu.vector_store %arg11[%c0_50, %c288], %54 {strides = array<i32>} : memref<2x400xbf16, #tpu.memory_space<vmem>>, vector<2x16xbf16>,
    %c38 = arith.constant 38 : index
    %c0_51 = arith.constant 0 : index
    %56 = vector.load %arg10[%c38, %c0_51] : memref<64x16xbf16, #tpu.memory_space<vmem>>, vector<2x16xbf16>
    %c0_52 = arith.constant 0 : index
    %c304 = arith.constant 304 : index
    %57 = vector.load %arg11[%c0_52, %c304] : memref<2x400xbf16, #tpu.memory_space<vmem>>, vector<2x16xbf16>
    tpu.vector_store %arg11[%c0_52, %c304], %56 {strides = array<i32>} : memref<2x400xbf16, #tpu.memory_space<vmem>>, vector<2x16xbf16>,
    %c40 = arith.constant 40 : index
    %c0_53 = arith.constant 0 : index
    %58 = vector.load %arg10[%c40, %c0_53] : memref<64x16xbf16, #tpu.memory_space<vmem>>, vector<2x16xbf16>
    %c0_54 = arith.constant 0 : index
    %c320 = arith.constant 320 : index
    %59 = vector.load %arg11[%c0_54, %c320] : memref<2x400xbf16, #tpu.memory_space<vmem>>, vector<2x16xbf16>
    tpu.vector_store %arg11[%c0_54, %c320], %58 {strides = array<i32>} : memref<2x400xbf16, #tpu.memory_space<vmem>>, vector<2x16xbf16>,
    %c42 = arith.constant 42 : index
    %c0_55 = arith.constant 0 : index
    %60 = vector.load %arg10[%c42, %c0_55] : memref<64x16xbf16, #tpu.memory_space<vmem>>, vector<2x16xbf16>
    %c0_56 = arith.constant 0 : index
    %c336 = arith.constant 336 : index
    %61 = vector.load %arg11[%c0_56, %c336] : memref<2x400xbf16, #tpu.memory_space<vmem>>, vector<2x16xbf16>
    tpu.vector_store %arg11[%c0_56, %c336], %60 {strides = array<i32>} : memref<2x400xbf16, #tpu.memory_space<vmem>>, vector<2x16xbf16>,
    %c44 = arith.constant 44 : index
    %c0_57 = arith.constant 0 : index
    %62 = vector.load %arg10[%c44, %c0_57] : memref<64x16xbf16, #tpu.memory_space<vmem>>, vector<2x16xbf16>
    %c0_58 = arith.constant 0 : index
    %c352 = arith.constant 352 : index
    %63 = vector.load %arg11[%c0_58, %c352] : memref<2x400xbf16, #tpu.memory_space<vmem>>, vector<2x16xbf16>
    tpu.vector_store %arg11[%c0_58, %c352], %62 {strides = array<i32>} : memref<2x400xbf16, #tpu.memory_space<vmem>>, vector<2x16xbf16>,
    %c46 = arith.constant 46 : index
    %c0_59 = arith.constant 0 : index
    %64 = vector.load %arg10[%c46, %c0_59] : memref<64x16xbf16, #tpu.memory_space<vmem>>, vector<2x16xbf16>
    %c0_60 = arith.constant 0 : index
    %c368 = arith.constant 368 : index
    %65 = vector.load %arg11[%c0_60, %c368] : memref<2x400xbf16, #tpu.memory_space<vmem>>, vector<2x16xbf16>
    tpu.vector_store %arg11[%c0_60, %c368], %64 {strides = array<i32>} : memref<2x400xbf16, #tpu.memory_space<vmem>>, vector<2x16xbf16>,
    %c48_61 = arith.constant 48 : index
    %c0_62 = arith.constant 0 : index
    %66 = vector.load %arg10[%c48_61, %c0_62] : memref<64x16xbf16, #tpu.memory_space<vmem>>, vector<2x16xbf16>
    %c0_63 = arith.constant 0 : index
    %c384 = arith.constant 384 : index
    %67 = vector.load %arg11[%c0_63, %c384] : memref<2x400xbf16, #tpu.memory_space<vmem>>, vector<2x16xbf16>
    tpu.vector_store %arg11[%c0_63, %c384], %66 {strides = array<i32>} : memref<2x400xbf16, #tpu.memory_space<vmem>>, vector<2x16xbf16>,
    %c0_64 = arith.constant 0 : index
    %c0_65 = arith.constant 0 : index
    %68 = vector.load %arg11[%c0_64, %c0_65] : memref<2x400xbf16, #tpu.memory_space<vmem>>, vector<2x400xbf16>
    %c0_66 = arith.constant 0 : index
    %c0_67 = arith.constant 0 : index
    %69 = vector.load %arg3[%c0_66, %c0_67] : memref<400x120xbf16, #tpu.memory_space<vmem>>, vector<400x120xbf16>
    %cst_68 = arith.constant dense<0.000000e+00> : vector<2x120xf32>
    %70 = tpu.matmul %68, %69, %cst_68 {dimension_numbers = #tpu.dot_dimension_numbers<[1], [0], [0], [1], [0, 0, 1, 1], [], []>} : vector<2x400xbf16>, vector<400x120xbf16>, vector<2x120xf32> -> vector<2x120xf32>
    %c0_69 = arith.constant 0 : index
    %c0_70 = arith.constant 0 : index
    %71 = vector.load %arg4[%c0_69, %c0_70] : memref<1x120xf32, #tpu.memory_space<vmem>>, vector<1x120xf32>
    %72 = vector.broadcast %71 : vector<1x120xf32> to vector<2x120xf32>
    %73 = arith.addf %70, %72 : vector<2x120xf32>
    %cst_71 = arith.constant 0.000000e+00 : f32
    %74 = vector.broadcast %cst_71 : f32 to vector<2x120xf32>
    %75 = arith.maximumf %73, %74 : vector<2x120xf32>
    %76 = arith.truncf %75 : vector<2x120xf32> to vector<2x120xbf16>
    %c0_72 = arith.constant 0 : index
    %c0_73 = arith.constant 0 : index
    %77 = vector.load %arg5[%c0_72, %c0_73] : memref<120x100xbf16, #tpu.memory_space<vmem>>, vector<120x100xbf16>
    %cst_74 = arith.constant dense<0.000000e+00> : vector<2x100xf32>
    %78 = tpu.matmul %76, %77, %cst_74 {dimension_numbers = #tpu.dot_dimension_numbers<[1], [0], [0], [1], [0, 0, 1, 1], [], []>} : vector<2x120xbf16>, vector<120x100xbf16>, vector<2x100xf32> -> vector<2x100xf32>
    %c0_75 = arith.constant 0 : index
    %c0_76 = arith.constant 0 : index
    %79 = vector.load %arg6[%c0_75, %c0_76] : memref<1x100xf32, #tpu.memory_space<vmem>>, vector<1x100xf32>
    %80 = vector.broadcast %79 : vector<1x100xf32> to vector<2x100xf32>
    %81 = arith.addf %78, %80 : vector<2x100xf32>
    %cst_77 = arith.constant 0.000000e+00 : f32
    %82 = vector.broadcast %cst_77 : f32 to vector<2x100xf32>
    %83 = arith.maximumf %81, %82 : vector<2x100xf32>
    %84 = arith.truncf %83 : vector<2x100xf32> to vector<2x100xbf16>
    %c0_78 = arith.constant 0 : index
    %c0_79 = arith.constant 0 : index
    %85 = vector.load %arg7[%c0_78, %c0_79] : memref<100x4xbf16, #tpu.memory_space<vmem>>, vector<100x4xbf16>
    %cst_80 = arith.constant dense<0.000000e+00> : vector<2x4xf32>
    %86 = tpu.matmul %84, %85, %cst_80 {dimension_numbers = #tpu.dot_dimension_numbers<[1], [0], [0], [1], [0, 0, 1, 1], [], []>} : vector<2x100xbf16>, vector<100x4xbf16>, vector<2x4xf32> -> vector<2x4xf32>
    %c0_81 = arith.constant 0 : index
    %c0_82 = arith.constant 0 : index
    %87 = vector.load %arg8[%c0_81, %c0_82] : memref<1x4xf32, #tpu.memory_space<vmem>>, vector<1x4xf32>
    %88 = vector.broadcast %87 : vector<1x4xf32> to vector<2x4xf32>
    %89 = arith.addf %86, %88 : vector<2x4xf32>
    %c0_83 = arith.constant 0 : index
    %c0_84 = arith.constant 0 : index
    %90 = vector.load %arg9[%c0_83, %c0_84] : memref<2x4xf32, #tpu.memory_space<vmem>>, vector<2x4xf32>
    tpu.vector_store %arg9[%c0_83, %c0_84], %89 {strides = array<i32>} : memref<2x4xf32, #tpu.memory_space<vmem>>, vector<2x4xf32>,
    return
  }
}

</mosaic_0001>

<bundles_post_ra>
// kernel: four_class_classifier_forward.4
= control target key start
LH: loop header
LB: loop body
LE: loop exit
PB: predicated region body
PF: predicated region fallthrough
CT: control target
= control target key end

     0   :  { %s7845_s0 = inlined_call_operand.vmem [shape: bf16[75,6], index: 0, kind: input, shape index: {}]   ;;  %s7846_s1 = inlined_call_operand.vmem [shape: f32[1,6], index: 1, kind: input, shape index: {}]   ;;  %s7847_s2 = inlined_call_operand.vmem [shape: bf16[4,392,75], index: 2, kind: input, shape index: {}]   ;;  %s7848_s3 = inlined_call_operand.<no memory space> [shape: bf16[], index: 3, kind: input, shape index: {}]   ;;  %s7849_s4 = inlined_call_operand.vmem [shape: bf16[400,6], index: 4, kind: output, shape index: {}]  }
   0x1   :  { %v9_v0 = vstv %s7848_s3 }
   0x2   :  { %v5994_v1 = vunpack.i.l.bf16 %v9_v0 }
   0x3   :  { %v5859_v2 = vld [vmem:[%s7845_s0] sm:$0xff]   ;;  %vm3659_vm0 = vcmask 1044480   ;;  %v5860_v3 = vld [vmem:[%s7845_s0 + $0x8] sm:$0xff]   ;;  %v23_v4 = vlaneseq  ;;  %vm3660_vm1 = vcmask 1045504   ;;  %v5861_v5 = vld [vmem:[%s7845_s0 + $0x10] sm:$0xff]   ;;  %v5964_v6 = vmov 65535  }
   0x4   :  { %5637 = vmatprep.subr.bf16.mxu0 %v5859_v2  ;;  %5847 = vmatprep.subr.bf16.mxu1 %v5859_v2  ;;  %v3661_v7 = vsel %vm3659_vm0, 4294967295, %v5964_v6  ;;  %v5863_v8 = vld [vmem:[%s7845_s0 + $0x20] sm:$0x3f]   ;;  %v5108_v12 = vld [vmem:[%s7847_s2 + $0x188] sm:$0xff]   ;;  %v5110_v18 = vld [vmem:[%s7847_s2 + $0x190] sm:$0xff]   ;;  %v5965_v27 = vmov 0.0  }
   0x5   :  { %5638 = vmatpush3.bf16.msra.mxu0 %v5859_v2  ;;  %5852 = vmatpush3.bf16.msra.mxu1 %v5859_v2  ;;  %v3662_v9 = vsel %vm3660_vm1, %v3661_v7, 0  ;;  %v20_v10 = vld [vmem:[%s7847_s2] sm:$0xff]   ;;  %v6011_v11 = vand.u32 127, %v23_v4  ;;  %v1320_v16 = vunpack.c.l.bf16 %v5108_v12  ;;  %v5012_v17 = vld [vmem:[%s7847_s2 + $0x8] sm:$0xff]   ;;  %v1333_v19 = vunpack.c.h.bf16 %v5108_v12  ;;  %v5862_v22 = vld [vmem:[%s7845_s0 + $0x18] sm:$0xff]  }
   0x6   :  { %5639 = vmatprep.subr.bf16.mxu0 %v5860_v3  ;;  %5848 = vmatprep.subr.bf16.mxu1 %v5860_v3  ;;  %v6016_v13 = vand.u32 %v5863_v8, %v3662_v9  ;;  %v21_v14 = vunpack.c.l.bf16 %v20_v10  ;;  %v33_v15 = vunpack.c.h.bf16 %v20_v10  ;;  %v46_v20 = vunpack.c.l.bf16 %v5012_v17  ;;  %v5014_v32 = vld [vmem:[%s7847_s2 + $0x10] sm:$0xff]   ;;  %v5112_v33 = vld [vmem:[%s7847_s2 + $0x198] sm:$0xff]   ;;  %v5114_v39 = vld [vmem:[%s7847_s2 + $0x1a0] sm:$0xff]  }
   0x7   :  { %vm26_vm2 = vcmp.lt.s32.totalorder %v6011_v11, 75  ;;  %v59_v21 = vunpack.c.h.bf16 %v5012_v17  ;;  %v1346_v26 = vunpack.c.l.bf16 %v5110_v18  ;;  %vm3358_vm3 = vcmask 613376   ;;  %v5016_v38 = vld [vmem:[%s7847_s2 + $0x18] sm:$0xff]   ;;  %v5018_v52 = vld [vmem:[%s7847_s2 + $0x20] sm:$0xff]   ;;  %v5116_v2 = vld [vmem:[%s7847_s2 + $0x1a8] sm:$0xff]  }
   0x8   :  { %v27_v23 = vsel %vm26_vm2, %v21_v14, %v5994_v1  ;;  %v39_v24 = vsel %vm26_vm2, %v33_v15, %v5994_v1  ;;  %v1326_v25 = vsel %vm26_vm2, %v1320_v16, %v5994_v1  ;;  %v1339_v31 = vsel %vm26_vm2, %v1333_v19, %v5994_v1  ;;  %v5020_v7 = vld [vmem:[%s7847_s2 + $0x28] sm:$0xff]   ;;  %v5118_v8 = vld [vmem:[%s7847_s2 + $0x1b0] sm:$0xff]  }
   0x9   :  { %5640 = vmatpush3.bf16.msra.mxu0 %v5860_v3  ;;  %5853 = vmatpush3.bf16.msra.mxu1 %v5860_v3  ;;  %v28_v28 = vpack.c.bf16 %v5965_v27, %v27_v23  ;;  %v41_v29 = vpack.c.bf16 %v5965_v27, %v39_v24  ;;  %v1328_v30 = vpack.c.bf16 %v5965_v27, %v1326_v25  ;;  %v1359_v43 = vunpack.c.h.bf16 %v5110_v18 }
   0xa   :  { %5641 = vmatprep.subr.bf16.mxu0 %v5861_v5  ;;  %5849 = vmatprep.subr.bf16.mxu1 %v5861_v5  ;;  %v1341_v34 = vpack.c.bf16 %v5965_v27, %v1339_v31  ;;  %v52_v35 = vsel %vm26_vm2, %v46_v20, %v5994_v1  ;;  %v65_v36 = vsel %vm26_vm2, %v59_v21, %v5994_v1  ;;  %v72_v44 = vunpack.c.l.bf16 %v5014_v32 }
   0xb   :  { %v1352_v37 = vsel %vm26_vm2, %v1346_v26, %v5994_v1  ;;  %30 = vst [vmem:[#allocation7] sm:$0xf] %v28_v28  ;;  %43 = vst [vmem:[#allocation7 + $0x4] sm:$0xf] %v41_v29  ;;  %v54_v40 = vpack.c.bf16 %v5965_v27, %v52_v35  ;;  %v67_v41 = vpack.c.bf16 %v5965_v27, %v65_v36  ;;  %v85_v45 = vunpack.c.h.bf16 %v5014_v32  ;;  %v5120_v35 = vld [vmem:[%s7847_s2 + $0x1b8] sm:$0xff]  }
   0xc   :  { %1330 = vst [vmem:[#allocation7 + $0x190] sm:$0xf] %v1328_v30  ;;  %v1354_v42 = vpack.c.bf16 %v5965_v27, %v1352_v37  ;;  %1343 = vst [vmem:[#allocation7 + $0x194] sm:$0xf] %v1341_v34  ;;  %v1372_v46 = vunpack.c.l.bf16 %v5112_v33  ;;  %v1385_v47 = vunpack.c.h.bf16 %v5112_v33  ;;  %v1365_v48 = vsel %vm26_vm2, %v1359_v43, %v5994_v1  ;;  %v5022_v30 = vld [vmem:[%s7847_s2 + $0x30] sm:$0xff]   ;;  %v5024_v36 = vld [vmem:[%s7847_s2 + $0x38] sm:$0xff]  }
   0xd   :  { %5642 = vmatpush3.bf16.msra.mxu0 %v5861_v5  ;;  %5854 = vmatpush3.bf16.msra.mxu1 %v5861_v5  ;;  %56 = vst [vmem:[#allocation7 + $0x8] sm:$0xf] %v54_v40  ;;  %69 = vst [vmem:[#allocation7 + $0xc] sm:$0xf] %v67_v41  ;;  %v98_v49 = vunpack.c.l.bf16 %v5016_v38  ;;  %v111_v50 = vunpack.c.h.bf16 %v5016_v38  ;;  %v1398_v51 = vunpack.c.l.bf16 %v5114_v39  ;;  %v1367_v53 = vpack.c.bf16 %v5965_v27, %v1365_v48 }
   0xe   :  { %5643 = vmatprep.subr.bf16.mxu0 %v5862_v22  ;;  %5850 = vmatprep.subr.bf16.mxu1 %v5862_v22  ;;  %1356 = vst [vmem:[#allocation7 + $0x198] sm:$0xf] %v1354_v42  ;;  %v78_v54 = vsel %vm26_vm2, %v72_v44, %v5994_v1  ;;  %v91_v55 = vsel %vm26_vm2, %v85_v45, %v5994_v1  ;;  %v1411_v60 = vunpack.c.h.bf16 %v5114_v39  ;;  %v124_v0 = vunpack.c.l.bf16 %v5018_v52  ;;  %v5122_v42 = vld [vmem:[%s7847_s2 + $0x1c0] sm:$0xff]  }
   0xf   :  { %v1378_v56 = vsel %vm26_vm2, %v1372_v46, %v5994_v1  ;;  %v80_v57 = vpack.c.bf16 %v5965_v27, %v78_v54  ;;  %v93_v58 = vpack.c.bf16 %v5965_v27, %v91_v55  ;;  %1369 = vst [vmem:[#allocation7 + $0x19c] sm:$0xf] %v1367_v53  ;;  %v1391_v61 = vsel %vm26_vm2, %v1385_v47, %v5994_v1 }
  0x10   :  { %v1380_v59 = vpack.c.bf16 %v5965_v27, %v1378_v56  ;;  %v104_v62 = vsel %vm26_vm2, %v98_v49, %v5994_v1  ;;  %v117_v63 = vsel %vm26_vm2, %v111_v50, %v5994_v1  ;;  %v1393_v3 = vpack.c.bf16 %v5965_v27, %v1391_v61 }
  0x11   :  { %5644 = vmatpush3.bf16.msra.mxu0 %v5862_v22  ;;  %5855 = vmatpush3.bf16.msra.mxu1 %v5862_v22  ;;  %82 = vst [vmem:[#allocation7 + $0x10] sm:$0xf] %v80_v57  ;;  %95 = vst [vmem:[#allocation7 + $0x14] sm:$0xf] %v93_v58  ;;  %v106_v4 = vpack.c.bf16 %v5965_v27, %v104_v62  ;;  %v119_v5 = vpack.c.bf16 %v5965_v27, %v117_v63  ;;  %v137_v15 = vunpack.c.h.bf16 %v5018_v52  ;;  %v5026_v52 = vld [vmem:[%s7847_s2 + $0x40] sm:$0xff]   ;;  %v5124_v58 = vld [vmem:[%s7847_s2 + $0x1c8] sm:$0xff]  }
  0x12   :  { %5645 = vmatprep.subr.bf16.mxu0 %v6016_v13  ;;  %5851 = vmatprep.subr.bf16.mxu1 %v6016_v13  ;;  %1382 = vst [vmem:[#allocation7 + $0x1a0] sm:$0xf] %v1380_v59  ;;  %v1404_v6 = vsel %vm26_vm2, %v1398_v51, %v5994_v1  ;;  %v5864_v9 = vld [vmem:[#allocation7] sm:$0xff]   ;;  %v1417_v12 = vsel %vm26_vm2, %v1411_v60, %v5994_v1  ;;  %1395 = vst [vmem:[#allocation7 + $0x1a4] sm:$0xf] %v1393_v3  ;;  %v1424_v19 = vunpack.c.l.bf16 %v5116_v2  ;;  %vm4956_vm4 = vcmask 44032  }
  0x13   :  { %v1406_v10 = vpack.c.bf16 %v5965_v27, %v1404_v6  ;;  %v130_v14 = vsel %vm26_vm2, %v124_v0, %v5994_v1  ;;  %v5865_v16 = vld [vmem:[#allocation7 + $0x190] sm:$0xff]   ;;  %108 = vst [vmem:[#allocation7 + $0x18] sm:$0xf] %v106_v4  ;;  %121 = vst [vmem:[#allocation7 + $0x1c] sm:$0xf] %v119_v5  ;;  %v1419_v17 = vpack.c.bf16 %v5965_v27, %v1417_v12  ;;  %v1437_v20 = vunpack.c.h.bf16 %v5116_v2  ;;  %v5028_v5 = vld [vmem:[%s7847_s2 + $0x48] sm:$0xff]  }
  0x14   :  { %v132_v18 = vpack.c.bf16 %v5965_v27, %v130_v14  ;;  %5647 = vmatprep.mubr.msk.bf16.mxu0 %vm3358_vm3, %v5864_v9  ;;  %v5866_v21 = vld [vmem:[#allocation7 + $0x8] sm:$0xff]   ;;  %v143_v22 = vsel %vm26_vm2, %v137_v15, %v5994_v1  ;;  %v150_v23 = vunpack.c.l.bf16 %v5020_v7  ;;  %v1450_v24 = vunpack.c.l.bf16 %v5118_v8  ;;  %5747 = vmatprep.mubr.msk.bf16.mxu1 %vm3358_vm3, %v5865_v16  ;;  %v5126_v12 = vld [vmem:[%s7847_s2 + $0x1d0] sm:$0xff]  }
  0x15   :  { %5646 = vmatpush3.bf16.msra.mxu0 %v6016_v13  ;;  %5856 = vmatpush3.bf16.msra.mxu1 %v6016_v13  ;;  %1408 = vst [vmem:[#allocation7 + $0x1a8] sm:$0xf] %v1406_v10  ;;  %v163_v13 = vunpack.c.h.bf16 %v5020_v7  ;;  %1421 = vst [vmem:[#allocation7 + $0x1ac] sm:$0xf] %v1419_v17  ;;  %v145_v25 = vpack.c.bf16 %v5965_v27, %v143_v22  ;;  %v1430_v26 = vsel %vm26_vm2, %v1424_v19, %v5994_v1 }
  0x16   :  { %134 = vst [vmem:[#allocation7 + $0x20] sm:$0xf] %v132_v18  ;;  %v1443_v28 = vsel %vm26_vm2, %v1437_v20, %v5994_v1  ;;  %v1463_v29 = vunpack.c.h.bf16 %v5118_v8  ;;  %v1432_v31 = vpack.c.bf16 %v5965_v27, %v1430_v26  ;;  %v156_v33 = vsel %vm26_vm2, %v150_v23, %v5994_v1  ;;  %v5867_v37 = vld [vmem:[#allocation7 + $0x198] sm:$0xff]  }
  0x17   :  { %v1445_v32 = vpack.c.bf16 %v5965_v27, %v1443_v28  ;;  %v169_v34 = vsel %vm26_vm2, %v163_v13, %v5994_v1  ;;  %147 = vst [vmem:[#allocation7 + $0x24] sm:$0xf] %v145_v25  ;;  %v158_v38 = vpack.c.bf16 %v5965_v27, %v156_v33  ;;  %v1456_v40 = vsel %vm26_vm2, %v1450_v24, %v5994_v1 }
  0x18   :  { %5648 = vmatmul.mubr.msk.bf16.vlgmr.msra.gmra.mrb[0].mxu0 %vm3358_vm3, %v5866_v21  ;;  %v171_v39 = vpack.c.bf16 %v5965_v27, %v169_v34  ;;  %v1469_v41 = vsel %vm26_vm2, %v1463_v29, %v5994_v1  ;;  %v5868_v43 = vld [vmem:[#allocation7 + $0x10] sm:$0xff]   ;;  %1434 = vst [vmem:[#allocation7 + $0x1b0] sm:$0xf] %v1432_v31  ;;  %v1458_v44 = vpack.c.bf16 %v5965_v27, %v1456_v40  ;;  %v176_v46 = vunpack.c.l.bf16 %v5022_v30 }
  0x19   :  { %1447 = vst [vmem:[#allocation7 + $0x1b4] sm:$0xf] %v1445_v32  ;;  %v1471_v45 = vpack.c.bf16 %v5965_v27, %v1469_v41  ;;  %v189_v47 = vunpack.c.h.bf16 %v5022_v30  ;;  %5748 = vmatmul.mubr.msk.bf16.vlgmr.msra.gmra.mrb[0].mxu1 %vm3358_vm3, %v5867_v37  ;;  %160 = vst [vmem:[#allocation7 + $0x28] sm:$0xf] %v158_v38  ;;  %v1476_v48 = vunpack.c.l.bf16 %v5120_v35  ;;  %v1489_v49 = vunpack.c.h.bf16 %v5120_v35  ;;  %5651 = vmatprep.mubr.msk.bf16.mxu0 %vm3358_vm3, %v5868_v43  ;;  %v5869_v53 = vld [vmem:[#allocation7 + $0x1a0] sm:$0xff]   ;;  %v5030_v32 = vld [vmem:[%s7847_s2 + $0x50] sm:$0xff]  }
  0x1a   :  { %173 = vst [vmem:[#allocation7 + $0x2c] sm:$0xf] %v171_v39  ;;  %v202_v50 = vunpack.c.l.bf16 %v5024_v36  ;;  %v215_v51 = vunpack.c.h.bf16 %v5024_v36  ;;  %1460 = vst [vmem:[#allocation7 + $0x1b8] sm:$0xf] %v1458_v44  ;;  %v182_v54 = vsel %vm26_vm2, %v176_v46, %v5994_v1  ;;  %v1502_v56 = vunpack.c.l.bf16 %v5122_v42  ;;  %v5870_v59 = vld [vmem:[#allocation7 + $0x18] sm:$0xff]   ;;  %5751 = vmatprep.mubr.msk.bf16.mxu1 %vm3358_vm3, %v5869_v53  ;;  %v5130_v44 = vld [vmem:[%s7847_s2 + $0x1e0] sm:$0xff]  }
  0x1b   :  { %1473 = vst [vmem:[#allocation7 + $0x1bc] sm:$0xf] %v1471_v45  ;;  %v195_v55 = vsel %vm26_vm2, %v189_v47, %v5994_v1  ;;  %v1515_v57 = vunpack.c.h.bf16 %v5122_v42  ;;  %v184_v60 = vpack.c.bf16 %v5965_v27, %v182_v54  ;;  %v1482_v62 = vsel %vm26_vm2, %v1476_v48, %v5994_v1  ;;  %v5128_v38 = vld [vmem:[%s7847_s2 + $0x1d8] sm:$0xff]  }
  0x1c   :  { %v197_v61 = vpack.c.bf16 %v5965_v27, %v195_v55  ;;  %v1495_v63 = vsel %vm26_vm2, %v1489_v49, %v5994_v1  ;;  %v1484_v0 = vpack.c.bf16 %v5965_v27, %v1482_v62  ;;  %v208_v3 = vsel %vm26_vm2, %v202_v50, %v5994_v1  ;;  %v5871_v6 = vld [vmem:[#allocation7 + $0x1a8] sm:$0xff]   ;;  %v5032_v39 = vld [vmem:[%s7847_s2 + $0x58] sm:$0xff]  }
  0x1d   :  { %v1497_v2 = vpack.c.bf16 %v5965_v27, %v1495_v63  ;;  %v221_v4 = vsel %vm26_vm2, %v215_v51, %v5994_v1  ;;  %186 = vst [vmem:[#allocation7 + $0x30] sm:$0xf] %v184_v60  ;;  %v210_v7 = vpack.c.bf16 %v5965_v27, %v208_v3  ;;  %v1508_v9 = vsel %vm26_vm2, %v1502_v56, %v5994_v1 }
  0x1e   :  { %199 = vst [vmem:[#allocation7 + $0x34] sm:$0xf] %v197_v61  ;;  %v223_v8 = vpack.c.bf16 %v5965_v27, %v221_v4  ;;  %v1521_v10 = vsel %vm26_vm2, %v1515_v57, %v5994_v1  ;;  %v5872_v14 = vld [vmem:[#allocation7 + $0x20] sm:$0xff]   ;;  %1486 = vst [vmem:[#allocation7 + $0x1c0] sm:$0xf] %v1484_v0  ;;  %v1510_v15 = vpack.c.bf16 %v5965_v27, %v1508_v9  ;;  %v228_v17 = vunpack.c.l.bf16 %v5026_v52 }
  0x1f   :  { %1499 = vst [vmem:[#allocation7 + $0x1c4] sm:$0xf] %v1497_v2  ;;  %v1523_v16 = vpack.c.bf16 %v5965_v27, %v1521_v10  ;;  %v241_v18 = vunpack.c.h.bf16 %v5026_v52  ;;  %212 = vst [vmem:[#allocation7 + $0x38] sm:$0xf] %v210_v7  ;;  %v1528_v20 = vunpack.c.l.bf16 %v5124_v58  ;;  %v1541_v21 = vunpack.c.h.bf16 %v5124_v58  ;;  %v5034_v0 = vld [vmem:[%s7847_s2 + $0x60] sm:$0xff]   ;;  %v5036_v7 = vld [vmem:[%s7847_s2 + $0x68] sm:$0xff]  }
  0x20   :  { %5652 = vmatmul.mubr.msk.bf16.gmra.mrb[4].mxu0 %vm3358_vm3, %v5870_v59  ;;  %v5873_v19 = vld [vmem:[#allocation7 + $0x1b0] sm:$0xff]   ;;  %225 = vst [vmem:[#allocation7 + $0x3c] sm:$0xf] %v223_v8  ;;  %v254_v22 = vunpack.c.l.bf16 %v5028_v5  ;;  %v267_v23 = vunpack.c.h.bf16 %v5028_v5  ;;  %1512 = vst [vmem:[#allocation7 + $0x1c8] sm:$0xf] %v1510_v15  ;;  %v234_v13 = vsel %vm26_vm2, %v228_v17, %v5994_v1  ;;  %v1554_v25 = vunpack.c.l.bf16 %v5126_v12 }
  0x21   :  { %5655 = vmatprep.mubr.msk.bf16.mxu0 %vm3358_vm3, %v5872_v14  ;;  %1525 = vst [vmem:[#allocation7 + $0x1cc] sm:$0xf] %v1523_v16  ;;  %v247_v24 = vsel %vm26_vm2, %v241_v18, %v5994_v1  ;;  %v1567_v26 = vunpack.c.h.bf16 %v5126_v12  ;;  %5752 = vmatmul.mubr.msk.bf16.gmra.mrb[4].mxu1 %vm3358_vm3, %v5871_v6  ;;  %v236_v28 = vpack.c.bf16 %v5965_v27, %v234_v13  ;;  %v5874_v33 = vld [vmem:[#allocation7 + $0x28] sm:$0xff]   ;;  %v280_v48 = vunpack.c.l.bf16 %v5030_v32  ;;  %v5134_v14 = vld [vmem:[%s7847_s2 + $0x1f0] sm:$0xff]  }
  0x22   :  { %v249_v29 = vpack.c.bf16 %v5965_v27, %v247_v24  ;;  %v1534_v30 = vsel %vm26_vm2, %v1528_v20, %v5994_v1  ;;  %v1547_v31 = vsel %vm26_vm2, %v1541_v21, %v5994_v1  ;;  %5755 = vmatprep.mubr.msk.bf16.mxu1 %vm3358_vm3, %v5873_v19  ;;  %v260_v36 = vsel %vm26_vm2, %v254_v22, %v5994_v1  ;;  %v5875_v50 = vld [vmem:[#allocation7 + $0x1b8] sm:$0xff]   ;;  %v5132_v6 = vld [vmem:[%s7847_s2 + $0x1e8] sm:$0xff]  }
  0x23   :  { %v1536_v34 = vpack.c.bf16 %v5965_v27, %v1534_v30  ;;  %v1549_v35 = vpack.c.bf16 %v5965_v27, %v1547_v31  ;;  %v273_v37 = vsel %vm26_vm2, %v267_v23, %v5994_v1  ;;  %238 = vst [vmem:[#allocation7 + $0x40] sm:$0xf] %v236_v28  ;;  %v262_v40 = vpack.c.bf16 %v5965_v27, %v260_v36 }
  0x24   :  { %251 = vst [vmem:[#allocation7 + $0x44] sm:$0xf] %v249_v29  ;;  %v275_v41 = vpack.c.bf16 %v5965_v27, %v273_v37  ;;  %v1560_v42 = vsel %vm26_vm2, %v1554_v25, %v5994_v1  ;;  %v1573_v43 = vsel %vm26_vm2, %v1567_v26, %v5994_v1  ;;  %v293_v49 = vunpack.c.h.bf16 %v5030_v32  ;;  %v5038_v29 = vld [vmem:[%s7847_s2 + $0x70] sm:$0xff]  }
  0x25   :  { %v5876_v45 = vld [vmem:[#allocation7 + $0x30] sm:$0xff]   ;;  %1538 = vst [vmem:[#allocation7 + $0x1d0] sm:$0xf] %v1536_v34  ;;  %1551 = vst [vmem:[#allocation7 + $0x1d4] sm:$0xf] %v1549_v35  ;;  %v1562_v46 = vpack.c.bf16 %v5965_v27, %v1560_v42  ;;  %v1575_v47 = vpack.c.bf16 %v5965_v27, %v1573_v43  ;;  %v1580_v51 = vunpack.c.l.bf16 %v5128_v38  ;;  %v1593_v52 = vunpack.c.h.bf16 %v5128_v38 }
  0x26   :  { %264 = vst [vmem:[#allocation7 + $0x48] sm:$0xf] %v262_v40  ;;  %277 = vst [vmem:[#allocation7 + $0x4c] sm:$0xf] %v275_v41  ;;  %v306_v53 = vunpack.c.l.bf16 %v5032_v39  ;;  %v319_v54 = vunpack.c.h.bf16 %v5032_v39  ;;  %v5877_v55 = vld [vmem:[#allocation7 + $0x1c0] sm:$0xff]   ;;  %v286_v56 = vsel %vm26_vm2, %v280_v48, %v5994_v1  ;;  %v299_v57 = vsel %vm26_vm2, %v293_v49, %v5994_v1  ;;  %v5136_v40 = vld [vmem:[%s7847_s2 + $0x1f8] sm:$0xff]  }
  0x27   :  { %1564 = vst [vmem:[#allocation7 + $0x1d8] sm:$0xf] %v1562_v46  ;;  %1577 = vst [vmem:[#allocation7 + $0x1dc] sm:$0xf] %v1575_v47  ;;  %v1606_v58 = vunpack.c.l.bf16 %v5130_v44  ;;  %v1619_v59 = vunpack.c.h.bf16 %v5130_v44  ;;  %v288_v60 = vpack.c.bf16 %v5965_v27, %v286_v56  ;;  %v301_v61 = vpack.c.bf16 %v5965_v27, %v299_v57  ;;  %v5878_v15 = vld [vmem:[#allocation7 + $0x38] sm:$0xff]   ;;  %v5138_v46 = vld [vmem:[%s7847_s2 + $0x200] sm:$0xff]  }
  0x28   :  { %5656 = vmatmul.mubr.msk.bf16.gmra.mrb[8].mxu0 %vm3358_vm3, %v5874_v33  ;;  %v1586_v62 = vsel %vm26_vm2, %v1580_v51, %v5994_v1  ;;  %v1599_v63 = vsel %vm26_vm2, %v1593_v52, %v5994_v1  ;;  %v312_v4 = vsel %vm26_vm2, %v306_v53, %v5994_v1  ;;  %v325_v5 = vsel %vm26_vm2, %v319_v54, %v5994_v1  ;;  %v5879_v30 = vld [vmem:[#allocation7 + $0x1c8] sm:$0xff]   ;;  %v5040_v41 = vld [vmem:[%s7847_s2 + $0x78] sm:$0xff]  }
  0x29   :  { %5659 = vmatprep.mubr.msk.bf16.mxu0 %vm3358_vm3, %v5876_v45  ;;  %v1588_v2 = vpack.c.bf16 %v5965_v27, %v1586_v62  ;;  %v1601_v3 = vpack.c.bf16 %v5965_v27, %v1599_v63  ;;  %5756 = vmatmul.mubr.msk.bf16.gmra.mrb[8].mxu1 %vm3358_vm3, %v5875_v50  ;;  %290 = vst [vmem:[#allocation7 + $0x50] sm:$0xf] %v288_v60  ;;  %303 = vst [vmem:[#allocation7 + $0x54] sm:$0xf] %v301_v61  ;;  %v332_v18 = vunpack.c.l.bf16 %v5034_v0 }
  0x2a   :  { %v314_v8 = vpack.c.bf16 %v5965_v27, %v312_v4  ;;  %v327_v9 = vpack.c.bf16 %v5965_v27, %v325_v5  ;;  %v1612_v10 = vsel %vm26_vm2, %v1606_v58, %v5994_v1  ;;  %v1625_v12 = vsel %vm26_vm2, %v1619_v59, %v5994_v1  ;;  %5759 = vmatprep.mubr.msk.bf16.mxu1 %vm3358_vm3, %v5877_v55  ;;  %v5042_v55 = vld [vmem:[%s7847_s2 + $0x80] sm:$0xff]  }
  0x2b   :  { %1590 = vst [vmem:[#allocation7 + $0x1e0] sm:$0xf] %v1588_v2  ;;  %1603 = vst [vmem:[#allocation7 + $0x1e4] sm:$0xf] %v1601_v3  ;;  %v1614_v16 = vpack.c.bf16 %v5965_v27, %v1612_v10  ;;  %v1627_v17 = vpack.c.bf16 %v5965_v27, %v1625_v12  ;;  %v345_v19 = vunpack.c.h.bf16 %v5034_v0  ;;  %v5880_v20 = vld [vmem:[#allocation7 + $0x40] sm:$0xff]   ;;  %v1632_v21 = vunpack.c.l.bf16 %v5132_v6 }
  0x2c   :  { %316 = vst [vmem:[#allocation7 + $0x58] sm:$0xf] %v314_v8  ;;  %329 = vst [vmem:[#allocation7 + $0x5c] sm:$0xf] %v327_v9  ;;  %v1645_v22 = vunpack.c.h.bf16 %v5132_v6  ;;  %v358_v23 = vunpack.c.l.bf16 %v5036_v7  ;;  %v371_v13 = vunpack.c.h.bf16 %v5036_v7  ;;  %v338_v24 = vsel %vm26_vm2, %v332_v18, %v5994_v1  ;;  %v5881_v35 = vld [vmem:[#allocation7 + $0x1d0] sm:$0xff]   ;;  %v5140_v7 = vld [vmem:[%s7847_s2 + $0x208] sm:$0xff]  }
  0x2d   :  { %1616 = vst [vmem:[#allocation7 + $0x1e8] sm:$0xf] %v1614_v16  ;;  %1629 = vst [vmem:[#allocation7 + $0x1ec] sm:$0xf] %v1627_v17  ;;  %v351_v25 = vsel %vm26_vm2, %v345_v19, %v5994_v1  ;;  %v1658_v26 = vunpack.c.l.bf16 %v5134_v14  ;;  %v1671_v28 = vunpack.c.h.bf16 %v5134_v14  ;;  %v340_v31 = vpack.c.bf16 %v5965_v27, %v338_v24  ;;  %v5882_v56 = vld [vmem:[#allocation7 + $0x48] sm:$0xff]   ;;  %v5142_v16 = vld [vmem:[%s7847_s2 + $0x210] sm:$0xff]  }
  0x2e   :  { %v353_v32 = vpack.c.bf16 %v5965_v27, %v351_v25  ;;  %v1638_v33 = vsel %vm26_vm2, %v1632_v21, %v5994_v1  ;;  %v1651_v34 = vsel %vm26_vm2, %v1645_v22, %v5994_v1  ;;  %v364_v38 = vsel %vm26_vm2, %v358_v23, %v5994_v1  ;;  %v5044_v8 = vld [vmem:[%s7847_s2 + $0x88] sm:$0xff]   ;;  %v5883_v9 = vld [vmem:[#allocation7 + $0x1d8] sm:$0xff]  }
  0x2f   :  { %v1640_v36 = vpack.c.bf16 %v5965_v27, %v1638_v33  ;;  %v1653_v37 = vpack.c.bf16 %v5965_v27, %v1651_v34  ;;  %v377_v39 = vsel %vm26_vm2, %v371_v13, %v5994_v1  ;;  %342 = vst [vmem:[#allocation7 + $0x60] sm:$0xf] %v340_v31  ;;  %v366_v42 = vpack.c.bf16 %v5965_v27, %v364_v38  ;;  %v5046_v34 = vld [vmem:[%s7847_s2 + $0x90] sm:$0xff]  }
  0x30   :  { %5660 = vmatmul.mubr.msk.bf16.gmra.mrb[12].mxu0 %vm3358_vm3, %v5878_v15  ;;  %355 = vst [vmem:[#allocation7 + $0x64] sm:$0xf] %v353_v32  ;;  %v379_v43 = vpack.c.bf16 %v5965_v27, %v377_v39  ;;  %v1664_v44 = vsel %vm26_vm2, %v1658_v26, %v5994_v1  ;;  %v1677_v45 = vsel %vm26_vm2, %v1671_v28, %v5994_v1  ;;  %v384_v49 = vunpack.c.l.bf16 %v5038_v29  ;;  %v5884_v61 = vld [vmem:[#allocation7 + $0x50] sm:$0xff]  }
  0x31   :  { %5663 = vmatprep.mubr.msk.bf16.mxu0 %vm3358_vm3, %v5880_v20  ;;  %1642 = vst [vmem:[#allocation7 + $0x1f0] sm:$0xf] %v1640_v36  ;;  %1655 = vst [vmem:[#allocation7 + $0x1f4] sm:$0xf] %v1653_v37  ;;  %v1666_v47 = vpack.c.bf16 %v5965_v27, %v1664_v44  ;;  %v1679_v48 = vpack.c.bf16 %v5965_v27, %v1677_v45  ;;  %v397_v50 = vunpack.c.h.bf16 %v5038_v29  ;;  %5760 = vmatmul.mubr.msk.bf16.gmra.mrb[12].mxu1 %vm3358_vm3, %v5879_v30 }
  0x32   :  { %368 = vst [vmem:[#allocation7 + $0x68] sm:$0xf] %v366_v42  ;;  %381 = vst [vmem:[#allocation7 + $0x6c] sm:$0xf] %v379_v43  ;;  %v1684_v51 = vunpack.c.l.bf16 %v5136_v40  ;;  %v1697_v52 = vunpack.c.h.bf16 %v5136_v40  ;;  %v410_v53 = vunpack.c.l.bf16 %v5040_v41  ;;  %v423_v54 = vunpack.c.h.bf16 %v5040_v41  ;;  %5763 = vmatprep.mubr.msk.bf16.mxu1 %vm3358_vm3, %v5881_v35  ;;  %v5885_v17 = vld [vmem:[#allocation7 + $0x1e0] sm:$0xff]   ;;  %v5144_v40 = vld [vmem:[%s7847_s2 + $0x218] sm:$0xff]  }
  0x33   :  { %1668 = vst [vmem:[#allocation7 + $0x1f8] sm:$0xf] %v1666_v47  ;;  %1681 = vst [vmem:[#allocation7 + $0x1fc] sm:$0xf] %v1679_v48  ;;  %v390_v57 = vsel %vm26_vm2, %v384_v49, %v5994_v1  ;;  %v403_v58 = vsel %vm26_vm2, %v397_v50, %v5994_v1  ;;  %v1710_v59 = vunpack.c.l.bf16 %v5138_v46  ;;  %v1723_v60 = vunpack.c.h.bf16 %v5138_v46  ;;  %v5886_v35 = vld [vmem:[#allocation7 + $0x58] sm:$0xff]   ;;  %v5146_v47 = vld [vmem:[%s7847_s2 + $0x220] sm:$0xff]  }
  0x34   :  { %v392_v62 = vpack.c.bf16 %v5965_v27, %v390_v57  ;;  %v405_v63 = vpack.c.bf16 %v5965_v27, %v403_v58  ;;  %v1690_v0 = vsel %vm26_vm2, %v1684_v51, %v5994_v1  ;;  %v1703_v2 = vsel %vm26_vm2, %v1697_v52, %v5994_v1  ;;  %v5048_v41 = vld [vmem:[%s7847_s2 + $0x98] sm:$0xff]   ;;  %v5887_v52 = vld [vmem:[#allocation7 + $0x1e8] sm:$0xff]  }
  0x35   :  { %v1692_v3 = vpack.c.bf16 %v5965_v27, %v1690_v0  ;;  %v1705_v4 = vpack.c.bf16 %v5965_v27, %v1703_v2  ;;  %v416_v5 = vsel %vm26_vm2, %v410_v53, %v5994_v1  ;;  %v429_v6 = vsel %vm26_vm2, %v423_v54, %v5994_v1 }
  0x36   :  { %394 = vst [vmem:[#allocation7 + $0x70] sm:$0xf] %v392_v62  ;;  %407 = vst [vmem:[#allocation7 + $0x74] sm:$0xf] %v405_v63  ;;  %v418_v10 = vpack.c.bf16 %v5965_v27, %v416_v5  ;;  %v431_v12 = vpack.c.bf16 %v5965_v27, %v429_v6  ;;  %v1716_v14 = vsel %vm26_vm2, %v1710_v59, %v5994_v1  ;;  %v436_v20 = vunpack.c.l.bf16 %v5042_v55 }
  0x37   :  { %v1729_v15 = vsel %vm26_vm2, %v1723_v60, %v5994_v1  ;;  %1694 = vst [vmem:[#allocation7 + $0x200] sm:$0xf] %v1692_v3  ;;  %1707 = vst [vmem:[#allocation7 + $0x204] sm:$0xf] %v1705_v4  ;;  %v1718_v18 = vpack.c.bf16 %v5965_v27, %v1716_v14  ;;  %v449_v21 = vunpack.c.h.bf16 %v5042_v55  ;;  %v1736_v22 = vunpack.c.l.bf16 %v5140_v7  ;;  %v5888_v42 = vld [vmem:[#allocation7 + $0x60] sm:$0xff]  }
  0x38   :  { %5664 = vmatmul.mubr.msk.bf16.gmra.mrb[16].mxu0 %vm3358_vm3, %v5882_v56  ;;  %v1731_v19 = vpack.c.bf16 %v5965_v27, %v1729_v15  ;;  %420 = vst [vmem:[#allocation7 + $0x78] sm:$0xf] %v418_v10  ;;  %433 = vst [vmem:[#allocation7 + $0x7c] sm:$0xf] %v431_v12  ;;  %v1749_v23 = vunpack.c.h.bf16 %v5140_v7  ;;  %v462_v13 = vunpack.c.l.bf16 %v5044_v8  ;;  %v475_v24 = vunpack.c.h.bf16 %v5044_v8  ;;  %v5889_v57 = vld [vmem:[#allocation7 + $0x1f0] sm:$0xff]   ;;  %v5050_v3 = vld [vmem:[%s7847_s2 + $0xa0] sm:$0xff]  }
  0x39   :  { %5667 = vmatprep.mubr.msk.bf16.mxu0 %vm3358_vm3, %v5884_v61  ;;  %1720 = vst [vmem:[#allocation7 + $0x208] sm:$0xf] %v1718_v18  ;;  %v442_v25 = vsel %vm26_vm2, %v436_v20, %v5994_v1  ;;  %v455_v26 = vsel %vm26_vm2, %v449_v21, %v5994_v1  ;;  %v1762_v28 = vunpack.c.l.bf16 %v5142_v16  ;;  %v1775_v29 = vunpack.c.h.bf16 %v5142_v16  ;;  %5764 = vmatmul.mubr.msk.bf16.gmra.mrb[16].mxu1 %vm3358_vm3, %v5883_v9  ;;  %v5148_v8 = vld [vmem:[%s7847_s2 + $0x228] sm:$0xff]   ;;  %v5150_v16 = vld [vmem:[%s7847_s2 + $0x230] sm:$0xff]  }
  0x3a   :  { %1733 = vst [vmem:[#allocation7 + $0x20c] sm:$0xf] %v1731_v19  ;;  %v444_v30 = vpack.c.bf16 %v5965_v27, %v442_v25  ;;  %v457_v31 = vpack.c.bf16 %v5965_v27, %v455_v26  ;;  %v1742_v32 = vsel %vm26_vm2, %v1736_v22, %v5994_v1  ;;  %v1755_v33 = vsel %vm26_vm2, %v1749_v23, %v5994_v1  ;;  %v5052_v9 = vld [vmem:[%s7847_s2 + $0xa8] sm:$0xff]  }
  0x3b   :  { %5767 = vmatprep.mubr.msk.bf16.mxu1 %vm3358_vm3, %v5885_v17  ;;  %v1744_v36 = vpack.c.bf16 %v5965_v27, %v1742_v32  ;;  %v1757_v37 = vpack.c.bf16 %v5965_v27, %v1755_v33  ;;  %v468_v38 = vsel %vm26_vm2, %v462_v13, %v5994_v1  ;;  %v481_v39 = vsel %vm26_vm2, %v475_v24, %v5994_v1  ;;  %v5890_v17 = vld [vmem:[#allocation7 + $0x68] sm:$0xff]   ;;  %v5891_v32 = vld [vmem:[#allocation7 + $0x1f8] sm:$0xff]  }
  0x3c   :  { %446 = vst [vmem:[#allocation7 + $0x80] sm:$0xf] %v444_v30  ;;  %459 = vst [vmem:[#allocation7 + $0x84] sm:$0xf] %v457_v31  ;;  %v470_v43 = vpack.c.bf16 %v5965_v27, %v468_v38  ;;  %v483_v44 = vpack.c.bf16 %v5965_v27, %v481_v39  ;;  %v1768_v45 = vsel %vm26_vm2, %v1762_v28, %v5994_v1  ;;  %v488_v50 = vunpack.c.l.bf16 %v5046_v34  ;;  %v5054_v31 = vld [vmem:[%s7847_s2 + $0xb0] sm:$0xff]  }
  0x3d   :  { %v1781_v46 = vsel %vm26_vm2, %v1775_v29, %v5994_v1  ;;  %1746 = vst [vmem:[#allocation7 + $0x210] sm:$0xf] %v1744_v36  ;;  %1759 = vst [vmem:[#allocation7 + $0x214] sm:$0xf] %v1757_v37  ;;  %v1770_v48 = vpack.c.bf16 %v5965_v27, %v1768_v45  ;;  %v501_v51 = vunpack.c.h.bf16 %v5046_v34  ;;  %v1788_v53 = vunpack.c.l.bf16 %v5144_v40  ;;  %v5892_v22 = vld [vmem:[#allocation7 + $0x70] sm:$0xff]  }
  0x3e   :  { %v1783_v49 = vpack.c.bf16 %v5965_v27, %v1781_v46  ;;  %472 = vst [vmem:[#allocation7 + $0x88] sm:$0xf] %v470_v43  ;;  %485 = vst [vmem:[#allocation7 + $0x8c] sm:$0xf] %v483_v44  ;;  %v1801_v54 = vunpack.c.h.bf16 %v5144_v40  ;;  %v514_v55 = vunpack.c.l.bf16 %v5048_v41  ;;  %v527_v56 = vunpack.c.h.bf16 %v5048_v41  ;;  %v5893_v37 = vld [vmem:[#allocation7 + $0x200] sm:$0xff]   ;;  %v5056_v43 = vld [vmem:[%s7847_s2 + $0xb8] sm:$0xff]  }
  0x3f   :  { %1772 = vst [vmem:[#allocation7 + $0x218] sm:$0xf] %v1770_v48  ;;  %v494_v58 = vsel %vm26_vm2, %v488_v50, %v5994_v1  ;;  %v507_v59 = vsel %vm26_vm2, %v501_v51, %v5994_v1  ;;  %v1814_v60 = vunpack.c.l.bf16 %v5146_v47  ;;  %v1827_v61 = vunpack.c.h.bf16 %v5146_v47  ;;  %v5154_v48 = vld [vmem:[%s7847_s2 + $0x240] sm:$0xff]  }
  0x40   :  { %5668 = vmatmul.mubr.msk.bf16.gmra.mrb[20].mxu0 %vm3358_vm3, %v5886_v35  ;;  %1785 = vst [vmem:[#allocation7 + $0x21c] sm:$0xf] %v1783_v49  ;;  %v496_v62 = vpack.c.bf16 %v5965_v27, %v494_v58  ;;  %v509_v63 = vpack.c.bf16 %v5965_v27, %v507_v59  ;;  %v1794_v0 = vsel %vm26_vm2, %v1788_v53, %v5994_v1  ;;  %v540_v20 = vunpack.c.l.bf16 %v5050_v3  ;;  %v5156_v58 = vld [vmem:[%s7847_s2 + $0x248] sm:$0xff]   ;;  %v5894_v59 = vld [vmem:[#allocation7 + $0x78] sm:$0xff]  }
  0x41   :  { %5671 = vmatprep.mubr.msk.bf16.mxu0 %vm3358_vm3, %v5888_v42  ;;  %v1807_v2 = vsel %vm26_vm2, %v1801_v54, %v5994_v1  ;;  %v1796_v4 = vpack.c.bf16 %v5965_v27, %v1794_v0  ;;  %v520_v6 = vsel %vm26_vm2, %v514_v55, %v5994_v1  ;;  %v533_v7 = vsel %vm26_vm2, %v527_v56, %v5994_v1  ;;  %v5152_v42 = vld [vmem:[%s7847_s2 + $0x238] sm:$0xff]  }
  0x42   :  { %v1809_v5 = vpack.c.bf16 %v5965_v27, %v1807_v2  ;;  %5768 = vmatmul.mubr.msk.bf16.gmra.mrb[20].mxu1 %vm3358_vm3, %v5887_v52  ;;  %498 = vst [vmem:[#allocation7 + $0x90] sm:$0xf] %v496_v62  ;;  %511 = vst [vmem:[#allocation7 + $0x94] sm:$0xf] %v509_v63  ;;  %v522_v10 = vpack.c.bf16 %v5965_v27, %v520_v6  ;;  %v535_v12 = vpack.c.bf16 %v5965_v27, %v533_v7 }
  0x43   :  { %v1820_v14 = vsel %vm26_vm2, %v1814_v60, %v5994_v1  ;;  %v1833_v15 = vsel %vm26_vm2, %v1827_v61, %v5994_v1  ;;  %5771 = vmatprep.mubr.msk.bf16.mxu1 %vm3358_vm3, %v5889_v57  ;;  %1798 = vst [vmem:[#allocation7 + $0x220] sm:$0xf] %v1796_v4  ;;  %v553_v21 = vunpack.c.h.bf16 %v5050_v3  ;;  %v1840_v23 = vunpack.c.l.bf16 %v5148_v8  ;;  %v5058_v57 = vld [vmem:[%s7847_s2 + $0xc0] sm:$0xff]  }
  0x44   :  { %1811 = vst [vmem:[#allocation7 + $0x224] sm:$0xf] %v1809_v5  ;;  %v1822_v18 = vpack.c.bf16 %v5965_v27, %v1820_v14  ;;  %v1835_v19 = vpack.c.bf16 %v5965_v27, %v1833_v15  ;;  %524 = vst [vmem:[#allocation7 + $0x98] sm:$0xf] %v522_v10  ;;  %v1853_v13 = vunpack.c.h.bf16 %v5148_v8  ;;  %v566_v24 = vunpack.c.l.bf16 %v5052_v9  ;;  %v5896_v0 = vld [vmem:[#allocation7 + $0x80] sm:$0xff]   ;;  %v5060_v10 = vld [vmem:[%s7847_s2 + $0xc8] sm:$0xff]  }
  0x45   :  { %537 = vst [vmem:[#allocation7 + $0x9c] sm:$0xf] %v535_v12  ;;  %v579_v25 = vunpack.c.h.bf16 %v5052_v9  ;;  %v546_v26 = vsel %vm26_vm2, %v540_v20, %v5994_v1  ;;  %v559_v28 = vsel %vm26_vm2, %v553_v21, %v5994_v1  ;;  %v1866_v29 = vunpack.c.l.bf16 %v5150_v16  ;;  %v6580_v12 = vld [vmem:[%s7847_s2 + $0x250] sm:$0xff]   ;;  %v5895_v14 = vld [vmem:[#allocation7 + $0x208] sm:$0xff]  }
  0x46   :  { %1824 = vst [vmem:[#allocation7 + $0x228] sm:$0xf] %v1822_v18  ;;  %1837 = vst [vmem:[#allocation7 + $0x22c] sm:$0xf] %v1835_v19  ;;  %v1879_v30 = vunpack.c.h.bf16 %v5150_v16  ;;  %v548_v33 = vpack.c.bf16 %v5965_v27, %v546_v26  ;;  %v561_v34 = vpack.c.bf16 %v5965_v27, %v559_v28  ;;  %v1846_v35 = vsel %vm26_vm2, %v1840_v23, %v5994_v1  ;;  %v6593_v19 = vld [vmem:[%s7847_s2 + $0xd0] sm:$0xff]  }
  0x47   :  { %v1859_v36 = vsel %vm26_vm2, %v1853_v13, %v5994_v1  ;;  %v1848_v38 = vpack.c.bf16 %v5965_v27, %v1846_v35  ;;  %v572_v40 = vsel %vm26_vm2, %v566_v24, %v5994_v1  ;;  %v585_v41 = vsel %vm26_vm2, %v579_v25, %v5994_v1  ;;  %v5897_v20 = vld [vmem:[#allocation7 + $0x210] sm:$0xff]  }
  0x48   :  { %5672 = vmatmul.mubr.msk.bf16.gmra.mrb[24].mxu0 %vm3358_vm3, %v5890_v17  ;;  %v1861_v39 = vpack.c.bf16 %v5965_v27, %v1859_v36  ;;  %550 = vst [vmem:[#allocation7 + $0xa0] sm:$0xf] %v548_v33  ;;  %563 = vst [vmem:[#allocation7 + $0xa4] sm:$0xf] %v561_v34  ;;  %v574_v44 = vpack.c.bf16 %v5965_v27, %v572_v40  ;;  %v587_v45 = vpack.c.bf16 %v5965_v27, %v585_v41 }
  0x49   :  { %5675 = vmatprep.mubr.msk.bf16.mxu0 %vm3358_vm3, %v5892_v22  ;;  %v1872_v46 = vsel %vm26_vm2, %v1866_v29, %v5994_v1  ;;  %v1885_v47 = vsel %vm26_vm2, %v1879_v30, %v5994_v1  ;;  %1850 = vst [vmem:[#allocation7 + $0x230] sm:$0xf] %v1848_v38  ;;  %v592_v51 = vunpack.c.l.bf16 %v5054_v31  ;;  %v605_v52 = vunpack.c.h.bf16 %v5054_v31  ;;  %v5898_v38 = vld [vmem:[#allocation7 + $0x88] sm:$0xff]  }
  0x4a   :  { %1863 = vst [vmem:[#allocation7 + $0x234] sm:$0xf] %v1861_v39  ;;  %v1874_v49 = vpack.c.bf16 %v5965_v27, %v1872_v46  ;;  %v1887_v50 = vpack.c.bf16 %v5965_v27, %v1885_v47  ;;  %5772 = vmatmul.mubr.msk.bf16.gmra.mrb[24].mxu1 %vm3358_vm3, %v5891_v32  ;;  %576 = vst [vmem:[#allocation7 + $0xa8] sm:$0xf] %v574_v44  ;;  %v1892_v53 = vunpack.c.l.bf16 %v5152_v42  ;;  %v1905_v54 = vunpack.c.h.bf16 %v5152_v42  ;;  %v6634_v44 = vld [vmem:[%s7847_s2 + $0x260] sm:$0xff]  }
  0x4b   :  { %589 = vst [vmem:[#allocation7 + $0xac] sm:$0xf] %v587_v45  ;;  %v618_v55 = vunpack.c.l.bf16 %v5056_v43  ;;  %v631_v56 = vunpack.c.h.bf16 %v5056_v43  ;;  %5775 = vmatprep.mubr.msk.bf16.mxu1 %vm3358_vm3, %v5893_v37  ;;  %v598_v60 = vsel %vm26_vm2, %v592_v51, %v5994_v1  ;;  %v611_v61 = vsel %vm26_vm2, %v605_v52, %v5994_v1  ;;  %v5160_v37 = vld [vmem:[%s7847_s2 + $0x258] sm:$0xff]   ;;  %v5900_v45 = vld [vmem:[#allocation7 + $0x90] sm:$0xff]  }
  0x4c   :  { %1876 = vst [vmem:[#allocation7 + $0x238] sm:$0xf] %v1874_v49  ;;  %1889 = vst [vmem:[#allocation7 + $0x23c] sm:$0xf] %v1887_v50  ;;  %v1918_v62 = vunpack.c.l.bf16 %v5154_v48  ;;  %v1931_v63 = vunpack.c.h.bf16 %v5154_v48  ;;  %v600_v2 = vpack.c.bf16 %v5965_v27, %v598_v60  ;;  %v613_v3 = vpack.c.bf16 %v5965_v27, %v611_v61  ;;  %v5064_v43 = vld [vmem:[%s7847_s2 + $0xd8] sm:$0xff]   ;;  %v6647_v50 = vld [vmem:[%s7847_s2 + $0xe0] sm:$0xff]  }
  0x4d   :  { %v1898_v4 = vsel %vm26_vm2, %v1892_v53, %v5994_v1  ;;  %v1911_v5 = vsel %vm26_vm2, %v1905_v54, %v5994_v1  ;;  %v624_v8 = vsel %vm26_vm2, %v618_v55, %v5994_v1  ;;  %v637_v9 = vsel %vm26_vm2, %v631_v56, %v5994_v1  ;;  %v5899_v55 = vld [vmem:[#allocation7 + $0x218] sm:$0xff]   ;;  %v5901_v60 = vld [vmem:[#allocation7 + $0x220] sm:$0xff]  }
  0x4e   :  { %v1900_v6 = vpack.c.bf16 %v5965_v27, %v1898_v4  ;;  %v1913_v7 = vpack.c.bf16 %v5965_v27, %v1911_v5  ;;  %602 = vst [vmem:[#allocation7 + $0xb0] sm:$0xf] %v600_v2  ;;  %615 = vst [vmem:[#allocation7 + $0xb4] sm:$0xf] %v613_v3  ;;  %v626_v15 = vpack.c.bf16 %v5965_v27, %v624_v8  ;;  %v653_v23 = vunpack.c.l.bf16 %v5058_v57 }
  0x4f   :  { %v639_v16 = vpack.c.bf16 %v5965_v27, %v637_v9  ;;  %v1924_v17 = vsel %vm26_vm2, %v1918_v62, %v5994_v1  ;;  %v1937_v18 = vsel %vm26_vm2, %v1931_v63, %v5994_v1  ;;  %v1953_v13 = vunpack.c.l.bf16 %v5156_v58 }
  0x50   :  { %5676 = vmatmul.mubr.msk.bf16.gmra.mrb[28].mxu0 %vm3358_vm3, %v5894_v59  ;;  %1902 = vst [vmem:[#allocation7 + $0x240] sm:$0xf] %v1900_v6  ;;  %1915 = vst [vmem:[#allocation7 + $0x244] sm:$0xf] %v1913_v7  ;;  %v1926_v21 = vpack.c.bf16 %v5965_v27, %v1924_v17  ;;  %v1939_v22 = vpack.c.bf16 %v5965_v27, %v1937_v18  ;;  %v670_v24 = vunpack.c.h.bf16 %v5058_v57  ;;  %v683_v25 = vunpack.c.l.bf16 %v5060_v10  ;;  %v5164_v6 = vld [vmem:[%s7847_s2 + $0x268] sm:$0xff]  }
  0x51   :  { %5679 = vmatprep.mubr.msk.bf16.mxu0 %vm3358_vm3, %v5896_v0  ;;  %628 = vst [vmem:[#allocation7 + $0xb8] sm:$0xf] %v626_v15  ;;  %641 = vst [vmem:[#allocation7 + $0xbc] sm:$0xf] %v639_v16  ;;  %v1970_v26 = vunpack.c.h.bf16 %v5156_v58  ;;  %v1983_v28 = vunpack.c.l.bf16 %v6580_v12  ;;  %v659_v29 = vsel %vm26_vm2, %v653_v23, %v5994_v1  ;;  %v1959_v30 = vsel %vm26_vm2, %v1953_v13, %v5994_v1 }
  0x52   :  { %1928 = vst [vmem:[#allocation7 + $0x248] sm:$0xf] %v1926_v21  ;;  %1941 = vst [vmem:[#allocation7 + $0x24c] sm:$0xf] %v1939_v22  ;;  %v696_v31 = vunpack.c.h.bf16 %v5060_v10  ;;  %v709_v32 = vunpack.c.l.bf16 %v6593_v19  ;;  %5776 = vmatmul.mubr.msk.bf16.gmra.mrb[28].mxu1 %vm3358_vm3, %v5895_v14  ;;  %v5515_v33 = vpack.c.bf16 %v5994_v1, %v659_v29  ;;  %v5525_v34 = vpack.c.bf16 %v5994_v1, %v1959_v30  ;;  %v6688_v14 = vld [vmem:[%s7847_s2 + $0x270] sm:$0xff]   ;;  %v5168_v30 = vld [vmem:[%s7847_s2 + $0x278] sm:$0xff]  }
  0x53   :  { %v676_v35 = vsel %vm26_vm2, %v670_v24, %v5994_v1  ;;  %v689_v36 = vsel %vm26_vm2, %v683_v25, %v5994_v1  ;;  %5779 = vmatprep.mubr.msk.bf16.mxu1 %vm3358_vm3, %v5897_v20  ;;  %v1976_v41 = vsel %vm26_vm2, %v1970_v26, %v5994_v1  ;;  %v1989_v42 = vsel %vm26_vm2, %v1983_v28, %v5994_v1  ;;  %v5902_v20 = vld [vmem:[#allocation7 + $0x98] sm:$0xff]   ;;  %v5904_v24 = vld [vmem:[#allocation7 + $0xa0] sm:$0xff]  }
  0x54   :  { %v678_v39 = vpack.c.bf16 %v5965_v27, %v676_v35  ;;  %v691_v40 = vpack.c.bf16 %v5965_v27, %v689_v36  ;;  %5516 = vst [vmem:[#allocation7 + $0xc0] sm:$0xff] %v5515_v33   ;;  %5526 = vst [vmem:[#allocation7 + $0x250] sm:$0xff] %v5525_v34   ;;  %v1978_v46 = vpack.c.bf16 %v5965_v27, %v1976_v41  ;;  %v1996_v53 = vunpack.c.h.bf16 %v6580_v12  ;;  %v5068_v12 = vld [vmem:[%s7847_s2 + $0xe8] sm:$0xff]   ;;  %v5072_v35 = vld [vmem:[%s7847_s2 + $0xf8] sm:$0xff]  }
  0x55   :  { %v1991_v47 = vpack.c.bf16 %v5965_v27, %v1989_v42  ;;  %v702_v48 = vsel %vm26_vm2, %v696_v31, %v5994_v1  ;;  %v715_v49 = vsel %vm26_vm2, %v709_v32, %v5994_v1  ;;  %v2009_v54 = vunpack.c.l.bf16 %v5160_v37  ;;  %v6726_v36 = vld [vmem:[%s7847_s2 + $0x280] sm:$0xff]   ;;  %v5905_v42 = vld [vmem:[#allocation7 + $0x230] sm:$0xff]  }
  0x56   :  { %680 = vst [vmem:[#allocation7 + $0xc8] sm:$0xf] %v678_v39  ;;  %693 = vst [vmem:[#allocation7 + $0xcc] sm:$0xf] %v691_v40  ;;  %v704_v51 = vpack.c.bf16 %v5965_v27, %v702_v48  ;;  %v717_v52 = vpack.c.bf16 %v5965_v27, %v715_v49  ;;  %v722_v56 = vunpack.c.h.bf16 %v6593_v19  ;;  %v735_v57 = vunpack.c.l.bf16 %v5064_v43  ;;  %v6702_v19 = vld [vmem:[%s7847_s2 + $0xf0] sm:$0xff]  }
  0x57   :  { %1980 = vst [vmem:[#allocation7 + $0x258] sm:$0xf] %v1978_v46  ;;  %1993 = vst [vmem:[#allocation7 + $0x25c] sm:$0xf] %v1991_v47  ;;  %v2022_v58 = vunpack.c.h.bf16 %v5160_v37  ;;  %v2035_v59 = vunpack.c.l.bf16 %v6634_v44  ;;  %v2002_v61 = vsel %vm26_vm2, %v1996_v53, %v5994_v1  ;;  %v2015_v62 = vsel %vm26_vm2, %v2009_v54, %v5994_v1  ;;  %v5903_v37 = vld [vmem:[#allocation7 + $0x228] sm:$0xff]  }
  0x58   :  { %5680 = vmatmul.mubr.msk.bf16.gmra.mrb[32].mxu0 %vm3358_vm3, %v5898_v38  ;;  %706 = vst [vmem:[#allocation7 + $0xd0] sm:$0xf] %v704_v51  ;;  %719 = vst [vmem:[#allocation7 + $0xd4] sm:$0xf] %v717_v52  ;;  %v748_v63 = vunpack.c.h.bf16 %v5064_v43  ;;  %v761_v0 = vunpack.c.l.bf16 %v6647_v50  ;;  %v2004_v2 = vpack.c.bf16 %v5965_v27, %v2002_v61  ;;  %v2017_v3 = vpack.c.bf16 %v5965_v27, %v2015_v62  ;;  %v6757_v51 = vld [vmem:[%s7847_s2 + $0x100] sm:$0xff]   ;;  %v5906_v61 = vld [vmem:[#allocation7 + $0xa8] sm:$0xff]  }
  0x59   :  { %5683 = vmatprep.mubr.msk.bf16.mxu0 %vm3358_vm3, %v5900_v45  ;;  %v728_v4 = vsel %vm26_vm2, %v722_v56, %v5994_v1  ;;  %v741_v5 = vsel %vm26_vm2, %v735_v57, %v5994_v1  ;;  %v2028_v9 = vsel %vm26_vm2, %v2022_v58, %v5994_v1  ;;  %v2041_v10 = vsel %vm26_vm2, %v2035_v59, %v5994_v1 }
  0x5a   :  { %v730_v7 = vpack.c.bf16 %v5965_v27, %v728_v4  ;;  %v743_v8 = vpack.c.bf16 %v5965_v27, %v741_v5  ;;  %5780 = vmatmul.mubr.msk.bf16.gmra.mrb[32].mxu1 %vm3358_vm3, %v5899_v55  ;;  %2006 = vst [vmem:[#allocation7 + $0x260] sm:$0xf] %v2004_v2  ;;  %2019 = vst [vmem:[#allocation7 + $0x264] sm:$0xf] %v2017_v3  ;;  %v2030_v15 = vpack.c.bf16 %v5965_v27, %v2028_v9  ;;  %v5908_v3 = vld [vmem:[#allocation7 + $0xb0] sm:$0xff]  }
  0x5b   :  { %v2043_v16 = vpack.c.bf16 %v5965_v27, %v2041_v10  ;;  %v754_v17 = vsel %vm26_vm2, %v748_v63, %v5994_v1  ;;  %v767_v18 = vsel %vm26_vm2, %v761_v0, %v5994_v1  ;;  %5783 = vmatprep.mubr.msk.bf16.mxu1 %vm3358_vm3, %v5901_v60  ;;  %v2048_v23 = vunpack.c.h.bf16 %v6634_v44  ;;  %v5172_v60 = vld [vmem:[%s7847_s2 + $0x288] sm:$0xff]  }
  0x5c   :  { %732 = vst [vmem:[#allocation7 + $0xd8] sm:$0xf] %v730_v7  ;;  %745 = vst [vmem:[#allocation7 + $0xdc] sm:$0xf] %v743_v8  ;;  %v756_v21 = vpack.c.bf16 %v5965_v27, %v754_v17  ;;  %v769_v22 = vpack.c.bf16 %v5965_v27, %v767_v18  ;;  %v2061_v13 = vunpack.c.l.bf16 %v5164_v6  ;;  %v774_v25 = vunpack.c.h.bf16 %v6647_v50 }
  0x5d   :  { %2032 = vst [vmem:[#allocation7 + $0x268] sm:$0xf] %v2030_v15  ;;  %2045 = vst [vmem:[#allocation7 + $0x26c] sm:$0xf] %v2043_v16  ;;  %v787_v26 = vunpack.c.l.bf16 %v5068_v12  ;;  %v2074_v28 = vunpack.c.h.bf16 %v5164_v6  ;;  %v2087_v29 = vunpack.c.l.bf16 %v6688_v14  ;;  %v2054_v31 = vsel %vm26_vm2, %v2048_v23, %v5994_v1  ;;  %v6798_v15 = vld [vmem:[%s7847_s2 + $0x290] sm:$0xff]   ;;  %v5907_v16 = vld [vmem:[#allocation7 + $0x238] sm:$0xff]  }
  0x5e   :  { %758 = vst [vmem:[#allocation7 + $0xe0] sm:$0xf] %v756_v21  ;;  %771 = vst [vmem:[#allocation7 + $0xe4] sm:$0xf] %v769_v22  ;;  %v2067_v32 = vsel %vm26_vm2, %v2061_v13, %v5994_v1  ;;  %v800_v33 = vunpack.c.h.bf16 %v5068_v12  ;;  %v813_v34 = vunpack.c.l.bf16 %v6702_v19  ;;  %v2056_v38 = vpack.c.bf16 %v5965_v27, %v2054_v31  ;;  %v6811_v21 = vld [vmem:[%s7847_s2 + $0x110] sm:$0xff]   ;;  %v5909_v22 = vld [vmem:[#allocation7 + $0x240] sm:$0xff]  }
  0x5f   :  { %v2069_v39 = vpack.c.bf16 %v5965_v27, %v2067_v32  ;;  %v780_v40 = vsel %vm26_vm2, %v774_v25, %v5994_v1  ;;  %v793_v41 = vsel %vm26_vm2, %v787_v26, %v5994_v1  ;;  %v2080_v45 = vsel %vm26_vm2, %v2074_v28, %v5994_v1 }
  0x60   :  { %5684 = vmatmul.mubr.msk.bf16.gmra.mrb[36].mxu0 %vm3358_vm3, %v5902_v20  ;;  %v782_v43 = vpack.c.bf16 %v5965_v27, %v780_v40  ;;  %v795_v44 = vpack.c.bf16 %v5965_v27, %v793_v41  ;;  %v2093_v46 = vsel %vm26_vm2, %v2087_v29, %v5994_v1  ;;  %2058 = vst [vmem:[#allocation7 + $0x270] sm:$0xf] %v2056_v38  ;;  %v2100_v54 = vunpack.c.h.bf16 %v6688_v14  ;;  %v5076_v14 = vld [vmem:[%s7847_s2 + $0x108] sm:$0xff]   ;;  %v5910_v40 = vld [vmem:[#allocation7 + $0xb8] sm:$0xff]  }
  0x61   :  { %5687 = vmatprep.mubr.msk.bf16.mxu0 %vm3358_vm3, %v5904_v24  ;;  %2071 = vst [vmem:[#allocation7 + $0x274] sm:$0xf] %v2069_v39  ;;  %v2082_v47 = vpack.c.bf16 %v5965_v27, %v2080_v45  ;;  %v2095_v48 = vpack.c.bf16 %v5965_v27, %v2093_v46  ;;  %v806_v49 = vsel %vm26_vm2, %v800_v33, %v5994_v1  ;;  %v2113_v55 = vunpack.c.l.bf16 %v5168_v30  ;;  %v5176_v39 = vld [vmem:[%s7847_s2 + $0x298] sm:$0xff]   ;;  %v6854_v46 = vld [vmem:[%s7847_s2 + $0x2a0] sm:$0xff]  }
  0x62   :  { %v819_v50 = vsel %vm26_vm2, %v813_v34, %v5994_v1  ;;  %784 = vst [vmem:[#allocation7 + $0xe8] sm:$0xf] %v782_v43  ;;  %797 = vst [vmem:[#allocation7 + $0xec] sm:$0xf] %v795_v44  ;;  %v808_v52 = vpack.c.bf16 %v5965_v27, %v806_v49  ;;  %5784 = vmatmul.mubr.msk.bf16.gmra.mrb[36].mxu1 %vm3358_vm3, %v5903_v37  ;;  %v826_v56 = vunpack.c.h.bf16 %v6702_v19  ;;  %v839_v57 = vunpack.c.l.bf16 %v5072_v35  ;;  %v5080_v45 = vld [vmem:[%s7847_s2 + $0x118] sm:$0xff]  }
  0x63   :  { %v821_v53 = vpack.c.bf16 %v5965_v27, %v819_v50  ;;  %2084 = vst [vmem:[#allocation7 + $0x278] sm:$0xf] %v2082_v47  ;;  %2097 = vst [vmem:[#allocation7 + $0x27c] sm:$0xf] %v2095_v48  ;;  %v2126_v58 = vunpack.c.h.bf16 %v5168_v30  ;;  %v2139_v59 = vunpack.c.l.bf16 %v6726_v36  ;;  %5787 = vmatprep.mubr.msk.bf16.mxu1 %vm3358_vm3, %v5905_v42  ;;  %v2106_v62 = vsel %vm26_vm2, %v2100_v54, %v5994_v1  ;;  %v5912_v47 = vld [vmem:[#allocation7 + $0xc0] sm:$0xff]  }
  0x64   :  { %810 = vst [vmem:[#allocation7 + $0xf0] sm:$0xf] %v808_v52  ;;  %v2119_v63 = vsel %vm26_vm2, %v2113_v55, %v5994_v1  ;;  %v852_v0 = vunpack.c.h.bf16 %v5072_v35  ;;  %v865_v2 = vunpack.c.l.bf16 %v6757_v51  ;;  %v2108_v4 = vpack.c.bf16 %v5965_v27, %v2106_v62  ;;  %v6867_v52 = vld [vmem:[%s7847_s2 + $0x120] sm:$0xff]   ;;  %v5913_v62 = vld [vmem:[#allocation7 + $0x250] sm:$0xff]  }
  0x65   :  { %823 = vst [vmem:[#allocation7 + $0xf4] sm:$0xf] %v821_v53  ;;  %v2121_v5 = vpack.c.bf16 %v5965_v27, %v2119_v63  ;;  %v832_v6 = vsel %vm26_vm2, %v826_v56, %v5994_v1  ;;  %v845_v7 = vsel %vm26_vm2, %v839_v57, %v5994_v1  ;;  %v2132_v10 = vsel %vm26_vm2, %v2126_v58, %v5994_v1  ;;  %v5911_v57 = vld [vmem:[#allocation7 + $0x248] sm:$0xff]  }
  0x66   :  { %v834_v8 = vpack.c.bf16 %v5965_v27, %v832_v6  ;;  %v847_v9 = vpack.c.bf16 %v5965_v27, %v845_v7  ;;  %v2145_v12 = vsel %vm26_vm2, %v2139_v59, %v5994_v1  ;;  %2110 = vst [vmem:[#allocation7 + $0x280] sm:$0xf] %v2108_v4  ;;  %v2134_v17 = vpack.c.bf16 %v5965_v27, %v2132_v10 }
  0x67   :  { %2123 = vst [vmem:[#allocation7 + $0x284] sm:$0xf] %v2121_v5  ;;  %v2147_v18 = vpack.c.bf16 %v5965_v27, %v2145_v12  ;;  %v858_v19 = vsel %vm26_vm2, %v852_v0, %v5994_v1  ;;  %v871_v20 = vsel %vm26_vm2, %v865_v2, %v5994_v1  ;;  %v2152_v24 = vunpack.c.h.bf16 %v6726_v36 }
  0x68   :  { %5688 = vmatmul.mubr.msk.bf16.gmra.mrb[40].mxu0 %vm3358_vm3, %v5906_v61  ;;  %836 = vst [vmem:[#allocation7 + $0xf8] sm:$0xf] %v834_v8  ;;  %849 = vst [vmem:[#allocation7 + $0xfc] sm:$0xf] %v847_v9  ;;  %v860_v23 = vpack.c.bf16 %v5965_v27, %v858_v19  ;;  %v873_v13 = vpack.c.bf16 %v5965_v27, %v871_v20  ;;  %v2165_v25 = vunpack.c.l.bf16 %v5172_v60  ;;  %v878_v26 = vunpack.c.h.bf16 %v6757_v51  ;;  %v5180_v8 = vld [vmem:[%s7847_s2 + $0x2a8] sm:$0xff]  }
  0x69   :  { %5691 = vmatprep.mubr.msk.bf16.mxu0 %vm3358_vm3, %v5908_v3  ;;  %2136 = vst [vmem:[#allocation7 + $0x288] sm:$0xf] %v2134_v17  ;;  %2149 = vst [vmem:[#allocation7 + $0x28c] sm:$0xf] %v2147_v18  ;;  %v891_v28 = vunpack.c.l.bf16 %v5076_v14  ;;  %v2178_v29 = vunpack.c.h.bf16 %v5172_v60  ;;  %v2191_v30 = vunpack.c.l.bf16 %v6798_v15  ;;  %v2158_v31 = vsel %vm26_vm2, %v2152_v24, %v5994_v1 }
  0x6a   :  { %862 = vst [vmem:[#allocation7 + $0x100] sm:$0xf] %v860_v23  ;;  %875 = vst [vmem:[#allocation7 + $0x104] sm:$0xf] %v873_v13  ;;  %v2171_v32 = vsel %vm26_vm2, %v2165_v25, %v5994_v1  ;;  %v904_v33 = vunpack.c.h.bf16 %v5076_v14  ;;  %v917_v34 = vunpack.c.l.bf16 %v6811_v21  ;;  %5788 = vmatmul.mubr.msk.bf16.gmra.mrb[40].mxu1 %vm3358_vm3, %v5907_v16  ;;  %v2160_v35 = vpack.c.bf16 %v5965_v27, %v2158_v31  ;;  %v6908_v16 = vld [vmem:[%s7847_s2 + $0x2b0] sm:$0xff]  }
  0x6b   :  { %v2173_v36 = vpack.c.bf16 %v5965_v27, %v2171_v32  ;;  %v884_v37 = vsel %vm26_vm2, %v878_v26, %v5994_v1  ;;  %v897_v38 = vsel %vm26_vm2, %v891_v28, %v5994_v1  ;;  %5791 = vmatprep.mubr.msk.bf16.mxu1 %vm3358_vm3, %v5909_v22  ;;  %v2184_v43 = vsel %vm26_vm2, %v2178_v29, %v5994_v1  ;;  %v5914_v22 = vld [vmem:[#allocation7 + $0xc8] sm:$0xff]   ;;  %v5916_v26 = vld [vmem:[#allocation7 + $0xd0] sm:$0xff]  }
  0x6c   :  { %v886_v41 = vpack.c.bf16 %v5965_v27, %v884_v37  ;;  %v899_v42 = vpack.c.bf16 %v5965_v27, %v897_v38  ;;  %v2197_v44 = vsel %vm26_vm2, %v2191_v30, %v5994_v1  ;;  %2162 = vst [vmem:[#allocation7 + $0x290] sm:$0xf] %v2160_v35  ;;  %v2186_v48 = vpack.c.bf16 %v5965_v27, %v2184_v43  ;;  %v5915_v37 = vld [vmem:[#allocation7 + $0x258] sm:$0xff]  }
  0x6d   :  { %2175 = vst [vmem:[#allocation7 + $0x294] sm:$0xf] %v2173_v36  ;;  %v2199_v49 = vpack.c.bf16 %v5965_v27, %v2197_v44  ;;  %v910_v50 = vsel %vm26_vm2, %v904_v33, %v5994_v1  ;;  %v923_v51 = vsel %vm26_vm2, %v917_v34, %v5994_v1  ;;  %v2204_v55 = vunpack.c.h.bf16 %v6798_v15  ;;  %v5084_v15 = vld [vmem:[%s7847_s2 + $0x128] sm:$0xff]   ;;  %v5184_v36 = vld [vmem:[%s7847_s2 + $0x2b8] sm:$0xff]  }
  0x6e   :  { %888 = vst [vmem:[#allocation7 + $0x108] sm:$0xf] %v886_v41  ;;  %901 = vst [vmem:[#allocation7 + $0x10c] sm:$0xf] %v899_v42  ;;  %v912_v53 = vpack.c.bf16 %v5965_v27, %v910_v50  ;;  %v925_v54 = vpack.c.bf16 %v5965_v27, %v923_v51  ;;  %v2217_v56 = vunpack.c.l.bf16 %v5176_v39  ;;  %v930_v58 = vunpack.c.h.bf16 %v6811_v21  ;;  %v6922_v21 = vld [vmem:[%s7847_s2 + $0x130] sm:$0xff]   ;;  %v5917_v42 = vld [vmem:[#allocation7 + $0x260] sm:$0xff]  }
  0x6f   :  { %2188 = vst [vmem:[#allocation7 + $0x298] sm:$0xf] %v2186_v48  ;;  %2201 = vst [vmem:[#allocation7 + $0x29c] sm:$0xf] %v2199_v49  ;;  %v943_v59 = vunpack.c.l.bf16 %v5080_v45  ;;  %v2230_v60 = vunpack.c.h.bf16 %v5176_v39  ;;  %v2243_v61 = vunpack.c.l.bf16 %v6854_v46  ;;  %v2210_v63 = vsel %vm26_vm2, %v2204_v55, %v5994_v1  ;;  %v6963_v48 = vld [vmem:[%s7847_s2 + $0x2c0] sm:$0xff]  }
  0x70   :  { %5692 = vmatmul.mubr.msk.bf16.gmra.mrb[44].mxu0 %vm3358_vm3, %v5910_v40  ;;  %914 = vst [vmem:[#allocation7 + $0x110] sm:$0xf] %v912_v53  ;;  %927 = vst [vmem:[#allocation7 + $0x114] sm:$0xf] %v925_v54  ;;  %v2223_v0 = vsel %vm26_vm2, %v2217_v56, %v5994_v1  ;;  %v956_v2 = vunpack.c.h.bf16 %v5080_v45  ;;  %v969_v3 = vunpack.c.l.bf16 %v6867_v52  ;;  %v2212_v4 = vpack.c.bf16 %v5965_v27, %v2210_v63  ;;  %v6977_v53 = vld [vmem:[%s7847_s2 + $0x140] sm:$0xff]   ;;  %v5918_v63 = vld [vmem:[#allocation7 + $0xd8] sm:$0xff]  }
  0x71   :  { %5695 = vmatprep.mubr.msk.bf16.mxu0 %vm3358_vm3, %v5912_v47  ;;  %v2225_v5 = vpack.c.bf16 %v5965_v27, %v2223_v0  ;;  %v936_v6 = vsel %vm26_vm2, %v930_v58, %v5994_v1  ;;  %v949_v7 = vsel %vm26_vm2, %v943_v59, %v5994_v1  ;;  %v2236_v12 = vsel %vm26_vm2, %v2230_v60, %v5994_v1  ;;  %v5088_v47 = vld [vmem:[%s7847_s2 + $0x138] sm:$0xff]  }
  0x72   :  { %v938_v9 = vpack.c.bf16 %v5965_v27, %v936_v6  ;;  %v951_v10 = vpack.c.bf16 %v5965_v27, %v949_v7  ;;  %v2249_v14 = vsel %vm26_vm2, %v2243_v61, %v5994_v1  ;;  %5792 = vmatmul.mubr.msk.bf16.gmra.mrb[44].mxu1 %vm3358_vm3, %v5911_v57  ;;  %2214 = vst [vmem:[#allocation7 + $0x2a0] sm:$0xf] %v2212_v4  ;;  %v2256_v24 = vunpack.c.h.bf16 %v6854_v46 }
  0x73   :  { %2227 = vst [vmem:[#allocation7 + $0x2a4] sm:$0xf] %v2225_v5  ;;  %v2238_v17 = vpack.c.bf16 %v5965_v27, %v2236_v12  ;;  %v2251_v18 = vpack.c.bf16 %v5965_v27, %v2249_v14  ;;  %v962_v19 = vsel %vm26_vm2, %v956_v2, %v5994_v1  ;;  %v975_v20 = vsel %vm26_vm2, %v969_v3, %v5994_v1  ;;  %v5920_v5 = vld [vmem:[#allocation7 + $0xe0] sm:$0xff]  }
  0x74   :  { %5795 = vmatprep.mubr.msk.bf16.mxu1 %vm3358_vm3, %v5913_v62  ;;  %940 = vst [vmem:[#allocation7 + $0x118] sm:$0xf] %v938_v9  ;;  %953 = vst [vmem:[#allocation7 + $0x11c] sm:$0xf] %v951_v10  ;;  %v964_v23 = vpack.c.bf16 %v5965_v27, %v962_v19  ;;  %v977_v13 = vpack.c.bf16 %v5965_v27, %v975_v20  ;;  %v2269_v25 = vunpack.c.l.bf16 %v5180_v8  ;;  %v982_v28 = vunpack.c.h.bf16 %v6867_v52  ;;  %v5188_v62 = vld [vmem:[%s7847_s2 + $0x2c8] sm:$0xff]  }
  0x75   :  { %2240 = vst [vmem:[#allocation7 + $0x2a8] sm:$0xf] %v2238_v17  ;;  %2253 = vst [vmem:[#allocation7 + $0x2ac] sm:$0xf] %v2251_v18  ;;  %v995_v29 = vunpack.c.l.bf16 %v5084_v15  ;;  %v2282_v30 = vunpack.c.h.bf16 %v5180_v8  ;;  %v2295_v31 = vunpack.c.l.bf16 %v6908_v16  ;;  %v2262_v32 = vsel %vm26_vm2, %v2256_v24, %v5994_v1  ;;  %v7018_v17 = vld [vmem:[%s7847_s2 + $0x2d0] sm:$0xff]   ;;  %v5919_v18 = vld [vmem:[#allocation7 + $0x268] sm:$0xff]  }
  0x76   :  { %966 = vst [vmem:[#allocation7 + $0x120] sm:$0xf] %v964_v23  ;;  %979 = vst [vmem:[#allocation7 + $0x124] sm:$0xf] %v977_v13  ;;  %v2275_v33 = vsel %vm26_vm2, %v2269_v25, %v5994_v1  ;;  %v1008_v34 = vunpack.c.h.bf16 %v5084_v15  ;;  %v1021_v35 = vunpack.c.l.bf16 %v6922_v21  ;;  %v2264_v38 = vpack.c.bf16 %v5965_v27, %v2262_v32  ;;  %v7031_v23 = vld [vmem:[%s7847_s2 + $0x150] sm:$0xff]  }
  0x77   :  { %v2277_v39 = vpack.c.bf16 %v5965_v27, %v2275_v33  ;;  %v988_v40 = vsel %vm26_vm2, %v982_v28, %v5994_v1  ;;  %v1001_v41 = vsel %vm26_vm2, %v995_v29, %v5994_v1  ;;  %v2288_v45 = vsel %vm26_vm2, %v2282_v30, %v5994_v1  ;;  %v5921_v13 = vld [vmem:[#allocation7 + $0x270] sm:$0xff]  }
  0x78   :  { %5696 = vmatmul.mubr.msk.bf16.gmra.mrb[48].mxu0 %vm3358_vm3, %v5914_v22  ;;  %v990_v43 = vpack.c.bf16 %v5965_v27, %v988_v40  ;;  %v1003_v44 = vpack.c.bf16 %v5965_v27, %v1001_v41  ;;  %v2301_v46 = vsel %vm26_vm2, %v2295_v31, %v5994_v1  ;;  %2266 = vst [vmem:[#allocation7 + $0x2b0] sm:$0xf] %v2264_v38  ;;  %v2308_v56 = vunpack.c.h.bf16 %v6908_v16  ;;  %v5092_v16 = vld [vmem:[%s7847_s2 + $0x148] sm:$0xff]   ;;  %v5192_v41 = vld [vmem:[%s7847_s2 + $0x2d8] sm:$0xff]  }
  0x79   :  { %5699 = vmatprep.mubr.msk.bf16.mxu0 %vm3358_vm3, %v5916_v26  ;;  %2279 = vst [vmem:[#allocation7 + $0x2b4] sm:$0xf] %v2277_v39  ;;  %v2290_v49 = vpack.c.bf16 %v5965_v27, %v2288_v45  ;;  %v2303_v50 = vpack.c.bf16 %v5965_v27, %v2301_v46  ;;  %v1014_v51 = vsel %vm26_vm2, %v1008_v34, %v5994_v1  ;;  %v2321_v57 = vunpack.c.l.bf16 %v5184_v36 }
  0x7a   :  { %v1027_v52 = vsel %vm26_vm2, %v1021_v35, %v5994_v1  ;;  %992 = vst [vmem:[#allocation7 + $0x128] sm:$0xf] %v990_v43  ;;  %1005 = vst [vmem:[#allocation7 + $0x12c] sm:$0xf] %v1003_v44  ;;  %v1016_v54 = vpack.c.bf16 %v5965_v27, %v1014_v51  ;;  %5796 = vmatmul.mubr.msk.bf16.gmra.mrb[48].mxu1 %vm3358_vm3, %v5915_v37  ;;  %v1034_v58 = vunpack.c.h.bf16 %v6922_v21  ;;  %v1047_v59 = vunpack.c.l.bf16 %v5088_v47 }
  0x7b   :  { %v1029_v55 = vpack.c.bf16 %v5965_v27, %v1027_v52  ;;  %2292 = vst [vmem:[#allocation7 + $0x2b8] sm:$0xf] %v2290_v49  ;;  %2305 = vst [vmem:[#allocation7 + $0x2bc] sm:$0xf] %v2303_v50  ;;  %v2334_v60 = vunpack.c.h.bf16 %v5184_v36  ;;  %v2347_v61 = vunpack.c.l.bf16 %v6963_v48  ;;  %5799 = vmatprep.mubr.msk.bf16.mxu1 %vm3358_vm3, %v5917_v42  ;;  %v2314_v0 = vsel %vm26_vm2, %v2308_v56, %v5994_v1  ;;  %v5922_v42 = vld [vmem:[#allocation7 + $0xe8] sm:$0xff]   ;;  %v5924_v49 = vld [vmem:[#allocation7 + $0xf0] sm:$0xff]  }
  0x7c   :  { %1018 = vst [vmem:[#allocation7 + $0x130] sm:$0xf] %v1016_v54  ;;  %v2327_v2 = vsel %vm26_vm2, %v2321_v57, %v5994_v1  ;;  %v1060_v3 = vunpack.c.h.bf16 %v5088_v47  ;;  %v1073_v4 = vunpack.c.l.bf16 %v6977_v53  ;;  %v2316_v6 = vpack.c.bf16 %v5965_v27, %v2314_v0  ;;  %v5096_v47 = vld [vmem:[%s7847_s2 + $0x158] sm:$0xff]   ;;  %v7087_v54 = vld [vmem:[%s7847_s2 + $0x160] sm:$0xff]  }
  0x7d   :  { %1031 = vst [vmem:[#allocation7 + $0x134] sm:$0xf] %v1029_v55  ;;  %v2329_v7 = vpack.c.bf16 %v5965_v27, %v2327_v2  ;;  %v1040_v8 = vsel %vm26_vm2, %v1034_v58, %v5994_v1  ;;  %v1053_v9 = vsel %vm26_vm2, %v1047_v59, %v5994_v1  ;;  %v2340_v14 = vsel %vm26_vm2, %v2334_v60, %v5994_v1  ;;  %v5923_v59 = vld [vmem:[#allocation7 + $0x278] sm:$0xff]   ;;  %v5925_v0 = vld [vmem:[#allocation7 + $0x280] sm:$0xff]  }
  0x7e   :  { %v1042_v10 = vpack.c.bf16 %v5965_v27, %v1040_v8  ;;  %v1055_v12 = vpack.c.bf16 %v5965_v27, %v1053_v9  ;;  %v2353_v15 = vsel %vm26_vm2, %v2347_v61, %v5994_v1  ;;  %2318 = vst [vmem:[#allocation7 + $0x2c0] sm:$0xf] %v2316_v6  ;;  %v2342_v19 = vpack.c.bf16 %v5965_v27, %v2340_v14 }
  0x7f   :  { %2331 = vst [vmem:[#allocation7 + $0x2c4] sm:$0xf] %v2329_v7  ;;  %v2355_v20 = vpack.c.bf16 %v5965_v27, %v2353_v15  ;;  %v1066_v21 = vsel %vm26_vm2, %v1060_v3, %v5994_v1  ;;  %v1079_v22 = vsel %vm26_vm2, %v1073_v4, %v5994_v1  ;;  %v2360_v26 = vunpack.c.h.bf16 %v6963_v48  ;;  %v7074_v48 = vld [vmem:[%s7847_s2 + $0x2e0] sm:$0xff]  }
  0x80   :  { %5700 = vmatmul.mubr.msk.bf16.gmra.mrb[52].mxu0 %vm3358_vm3, %v5918_v63  ;;  %1044 = vst [vmem:[#allocation7 + $0x138] sm:$0xf] %v1042_v10  ;;  %1057 = vst [vmem:[#allocation7 + $0x13c] sm:$0xf] %v1055_v12  ;;  %v1068_v24 = vpack.c.bf16 %v5965_v27, %v1066_v21  ;;  %v1081_v25 = vpack.c.bf16 %v5965_v27, %v1079_v22  ;;  %v2373_v28 = vunpack.c.l.bf16 %v5188_v62  ;;  %v1086_v29 = vunpack.c.h.bf16 %v6977_v53  ;;  %v5196_v10 = vld [vmem:[%s7847_s2 + $0x2e8] sm:$0xff]  }
  0x81   :  { %5703 = vmatprep.mubr.msk.bf16.mxu0 %vm3358_vm3, %v5920_v5  ;;  %2344 = vst [vmem:[#allocation7 + $0x2c8] sm:$0xf] %v2342_v19  ;;  %2357 = vst [vmem:[#allocation7 + $0x2cc] sm:$0xf] %v2355_v20  ;;  %v1099_v30 = vunpack.c.l.bf16 %v5092_v16  ;;  %v2386_v31 = vunpack.c.h.bf16 %v5188_v62  ;;  %v2399_v32 = vunpack.c.l.bf16 %v7018_v17  ;;  %v2366_v33 = vsel %vm26_vm2, %v2360_v26, %v5994_v1  ;;  %v5938_v11 = vld [vmem:[#allocation7 + $0x128] sm:$0xff]  }
  0x82   :  { %1070 = vst [vmem:[#allocation7 + $0x140] sm:$0xf] %v1068_v24  ;;  %1083 = vst [vmem:[#allocation7 + $0x144] sm:$0xf] %v1081_v25  ;;  %v2379_v34 = vsel %vm26_vm2, %v2373_v28, %v5994_v1  ;;  %v1112_v35 = vunpack.c.h.bf16 %v5092_v16  ;;  %v1125_v36 = vunpack.c.l.bf16 %v7031_v23  ;;  %5800 = vmatmul.mubr.msk.bf16.gmra.mrb[52].mxu1 %vm3358_vm3, %v5919_v18  ;;  %v2368_v37 = vpack.c.bf16 %v5965_v27, %v2366_v33  ;;  %v7128_v18 = vld [vmem:[%s7847_s2 + $0x2f0] sm:$0xff]  }
  0x83   :  { %v2381_v38 = vpack.c.bf16 %v5965_v27, %v2379_v34  ;;  %v1092_v39 = vsel %vm26_vm2, %v1086_v29, %v5994_v1  ;;  %v1105_v40 = vsel %vm26_vm2, %v1099_v30, %v5994_v1  ;;  %5803 = vmatprep.mubr.msk.bf16.mxu1 %vm3358_vm3, %v5921_v13  ;;  %v2392_v45 = vsel %vm26_vm2, %v2386_v31, %v5994_v1  ;;  %v5926_v13 = vld [vmem:[#allocation7 + $0xf8] sm:$0xff]   ;;  %v5928_v29 = vld [vmem:[#allocation7 + $0x100] sm:$0xff]  }
  0x84   :  { %v1094_v43 = vpack.c.bf16 %v5965_v27, %v1092_v39  ;;  %v1107_v44 = vpack.c.bf16 %v5965_v27, %v1105_v40  ;;  %v2405_v46 = vsel %vm26_vm2, %v2399_v32, %v5994_v1  ;;  %2370 = vst [vmem:[#allocation7 + $0x2d0] sm:$0xf] %v2368_v37  ;;  %v2394_v50 = vpack.c.bf16 %v5965_v27, %v2392_v45  ;;  %v5927_v39 = vld [vmem:[#allocation7 + $0x288] sm:$0xff]  }
  0x85   :  { %2383 = vst [vmem:[#allocation7 + $0x2d4] sm:$0xf] %v2381_v38  ;;  %v2407_v51 = vpack.c.bf16 %v5965_v27, %v2405_v46  ;;  %v1118_v52 = vsel %vm26_vm2, %v1112_v35, %v5994_v1  ;;  %v1131_v53 = vsel %vm26_vm2, %v1125_v36, %v5994_v1  ;;  %v2412_v57 = vunpack.c.h.bf16 %v7018_v17  ;;  %v5100_v17 = vld [vmem:[%s7847_s2 + $0x168] sm:$0xff]   ;;  %v5200_v38 = vld [vmem:[%s7847_s2 + $0x2f8] sm:$0xff]  }
  0x86   :  { %1096 = vst [vmem:[#allocation7 + $0x148] sm:$0xf] %v1094_v43  ;;  %1109 = vst [vmem:[#allocation7 + $0x14c] sm:$0xf] %v1107_v44  ;;  %v1120_v55 = vpack.c.bf16 %v5965_v27, %v1118_v52  ;;  %v1133_v56 = vpack.c.bf16 %v5965_v27, %v1131_v53  ;;  %v2425_v58 = vunpack.c.l.bf16 %v5192_v41  ;;  %v1138_v60 = vunpack.c.h.bf16 %v7031_v23  ;;  %v7142_v23 = vld [vmem:[%s7847_s2 + $0x170] sm:$0xff]  }
  0x87   :  { %2396 = vst [vmem:[#allocation7 + $0x2d8] sm:$0xf] %v2394_v50  ;;  %2409 = vst [vmem:[#allocation7 + $0x2dc] sm:$0xf] %v2407_v51  ;;  %v1151_v61 = vunpack.c.l.bf16 %v5096_v47  ;;  %v2438_v62 = vunpack.c.h.bf16 %v5192_v41  ;;  %v2451_v63 = vunpack.c.l.bf16 %v7074_v48  ;;  %v2418_v2 = vsel %vm26_vm2, %v2412_v57, %v5994_v1  ;;  %v5929_v44 = vld [vmem:[#allocation7 + $0x290] sm:$0xff]   ;;  %v7183_v50 = vld [vmem:[%s7847_s2 + $0x300] sm:$0xff]  }
  0x88   :  { %5704 = vmatmul.mubr.msk.bf16.gmra.mrb[56].mxu0 %vm3358_vm3, %v5922_v42  ;;  %1122 = vst [vmem:[#allocation7 + $0x150] sm:$0xf] %v1120_v55  ;;  %1135 = vst [vmem:[#allocation7 + $0x154] sm:$0xf] %v1133_v56  ;;  %v2431_v3 = vsel %vm26_vm2, %v2425_v58, %v5994_v1  ;;  %v1164_v4 = vunpack.c.h.bf16 %v5096_v47  ;;  %v1177_v5 = vunpack.c.l.bf16 %v7087_v54  ;;  %v2420_v6 = vpack.c.bf16 %v5965_v27, %v2418_v2  ;;  %v5106_v55 = vld [vmem:[%s7847_s2 + $0x180] sm:$0xff]   ;;  %v5930_v2 = vld [vmem:[#allocation7 + $0x108] sm:$0xff]  }
  0x89   :  { %5707 = vmatprep.mubr.msk.bf16.mxu0 %vm3358_vm3, %v5924_v49  ;;  %v2433_v7 = vpack.c.bf16 %v5965_v27, %v2431_v3  ;;  %v1144_v8 = vsel %vm26_vm2, %v1138_v60, %v5994_v1  ;;  %v1157_v9 = vsel %vm26_vm2, %v1151_v61, %v5994_v1  ;;  %v2444_v15 = vsel %vm26_vm2, %v2438_v62, %v5994_v1  ;;  %v5104_v49 = vld [vmem:[%s7847_s2 + $0x178] sm:$0xff]  }
  0x8a   :  { %v1146_v12 = vpack.c.bf16 %v5965_v27, %v1144_v8  ;;  %v1159_v14 = vpack.c.bf16 %v5965_v27, %v1157_v9  ;;  %v2457_v16 = vsel %vm26_vm2, %v2451_v63, %v5994_v1  ;;  %5804 = vmatmul.mubr.msk.bf16.gmra.mrb[56].mxu1 %vm3358_vm3, %v5923_v59  ;;  %2422 = vst [vmem:[#allocation7 + $0x2e0] sm:$0xf] %v2420_v6  ;;  %v2464_v26 = vunpack.c.h.bf16 %v7074_v48 }
  0x8b   :  { %2435 = vst [vmem:[#allocation7 + $0x2e4] sm:$0xf] %v2433_v7  ;;  %v2446_v19 = vpack.c.bf16 %v5965_v27, %v2444_v15  ;;  %v2459_v20 = vpack.c.bf16 %v5965_v27, %v2457_v16  ;;  %v1170_v21 = vsel %vm26_vm2, %v1164_v4, %v5994_v1  ;;  %v1183_v22 = vsel %vm26_vm2, %v1177_v5, %v5994_v1  ;;  %v5932_v7 = vld [vmem:[#allocation7 + $0x110] sm:$0xff]  }
  0x8c   :  { %5807 = vmatprep.mubr.msk.bf16.mxu1 %vm3358_vm3, %v5925_v0  ;;  %1148 = vst [vmem:[#allocation7 + $0x158] sm:$0xf] %v1146_v12  ;;  %1161 = vst [vmem:[#allocation7 + $0x15c] sm:$0xf] %v1159_v14  ;;  %v1172_v24 = vpack.c.bf16 %v5965_v27, %v1170_v21  ;;  %v1185_v25 = vpack.c.bf16 %v5965_v27, %v1183_v22  ;;  %v2477_v28 = vunpack.c.l.bf16 %v5196_v10  ;;  %v1190_v30 = vunpack.c.h.bf16 %v7087_v54  ;;  %v5204_v0 = vld [vmem:[%s7847_s2 + $0x308] sm:$0xff]  }
  0x8d   :  { %2448 = vst [vmem:[#allocation7 + $0x2e8] sm:$0xf] %v2446_v19  ;;  %2461 = vst [vmem:[#allocation7 + $0x2ec] sm:$0xf] %v2459_v20  ;;  %v1203_v31 = vunpack.c.l.bf16 %v5100_v17  ;;  %v2490_v32 = vunpack.c.h.bf16 %v5196_v10  ;;  %v2503_v33 = vunpack.c.l.bf16 %v7128_v18  ;;  %v2470_v34 = vsel %vm26_vm2, %v2464_v26, %v5994_v1 }
  0x8e   :  { %1174 = vst [vmem:[#allocation7 + $0x160] sm:$0xf] %v1172_v24  ;;  %1187 = vst [vmem:[#allocation7 + $0x164] sm:$0xf] %v1185_v25  ;;  %v2483_v35 = vsel %vm26_vm2, %v2477_v28, %v5994_v1  ;;  %v1216_v36 = vunpack.c.h.bf16 %v5100_v17  ;;  %v1229_v37 = vunpack.c.l.bf16 %v7142_v23  ;;  %v2472_v40 = vpack.c.bf16 %v5965_v27, %v2470_v34 }
  0x8f   :  { %v2485_v41 = vpack.c.bf16 %v5965_v27, %v2483_v35  ;;  %v1196_v42 = vsel %vm26_vm2, %v1190_v30, %v5994_v1  ;;  %v1209_v43 = vsel %vm26_vm2, %v1203_v31, %v5994_v1  ;;  %v2496_v47 = vsel %vm26_vm2, %v2490_v32, %v5994_v1 }
  0x90   :  { %5708 = vmatmul.mubr.msk.bf16.gmra.mrb[60].mxu0 %vm3358_vm3, %v5926_v13  ;;  %v1198_v45 = vpack.c.bf16 %v5965_v27, %v1196_v42  ;;  %v1211_v46 = vpack.c.bf16 %v5965_v27, %v1209_v43  ;;  %v2509_v48 = vsel %vm26_vm2, %v2503_v33, %v5994_v1  ;;  %2474 = vst [vmem:[#allocation7 + $0x2f0] sm:$0xf] %v2472_v40  ;;  %v2516_v58 = vunpack.c.h.bf16 %v7128_v18  ;;  %v5931_v18 = vld [vmem:[#allocation7 + $0x298] sm:$0xff]   ;;  %v5937_v40 = vld [vmem:[#allocation7 + $0x2b0] sm:$0xff]  }
  0x91   :  { %5711 = vmatprep.mubr.msk.bf16.mxu0 %vm3358_vm3, %v5928_v29  ;;  %2487 = vst [vmem:[#allocation7 + $0x2f4] sm:$0xf] %v2485_v41  ;;  %v2498_v51 = vpack.c.bf16 %v5965_v27, %v2496_v47  ;;  %v2511_v52 = vpack.c.bf16 %v5965_v27, %v2509_v48  ;;  %v1222_v53 = vsel %vm26_vm2, %v1216_v36, %v5994_v1  ;;  %v2529_v59 = vunpack.c.l.bf16 %v5200_v38  ;;  %v5934_v36 = vld [vmem:[#allocation7 + $0x118] sm:$0xff]   ;;  %v5940_v41 = vld [vmem:[#allocation7 + $0x130] sm:$0xff]   ;;  %v5946_v47 = vld [vmem:[#allocation7 + $0x148] sm:$0xff]  }
  0x92   :  { %v1235_v54 = vsel %vm26_vm2, %v1229_v37, %v5994_v1  ;;  %1200 = vst [vmem:[#allocation7 + $0x168] sm:$0xf] %v1198_v45  ;;  %1213 = vst [vmem:[#allocation7 + $0x16c] sm:$0xf] %v1211_v46  ;;  %v1224_v56 = vpack.c.bf16 %v5965_v27, %v1222_v53  ;;  %5808 = vmatmul.mubr.msk.bf16.gmra.mrb[60].mxu1 %vm3358_vm3, %v5927_v39  ;;  %v1242_v60 = vunpack.c.h.bf16 %v7142_v23  ;;  %v1255_v61 = vunpack.c.l.bf16 %v5104_v49  ;;  %v5933_v23 = vld [vmem:[#allocation7 + $0x2a0] sm:$0xff]   ;;  %v5939_v42 = vld [vmem:[#allocation7 + $0x2b8] sm:$0xff]  }
  0x93   :  { %v1237_v57 = vpack.c.bf16 %v5965_v27, %v1235_v54  ;;  %2500 = vst [vmem:[#allocation7 + $0x2f8] sm:$0xf] %v2498_v51  ;;  %2513 = vst [vmem:[#allocation7 + $0x2fc] sm:$0xf] %v2511_v52  ;;  %v2542_v62 = vunpack.c.h.bf16 %v5200_v38  ;;  %v2555_v63 = vunpack.c.l.bf16 %v7183_v50  ;;  %5811 = vmatprep.mubr.msk.bf16.mxu1 %vm3358_vm3, %v5929_v44  ;;  %v2522_v3 = vsel %vm26_vm2, %v2516_v58, %v5994_v1  ;;  %v5936_v39 = vld [vmem:[#allocation7 + $0x120] sm:$0xff]   ;;  %v5942_v43 = vld [vmem:[#allocation7 + $0x138] sm:$0xff]  }
  0x94   :  { %1226 = vst [vmem:[#allocation7 + $0x170] sm:$0xf] %v1224_v56  ;;  %v2535_v4 = vsel %vm26_vm2, %v2529_v59, %v5994_v1  ;;  %v1268_v5 = vunpack.c.h.bf16 %v5104_v49  ;;  %v1281_v6 = vunpack.c.l.bf16 %v5106_v55  ;;  %v2524_v8 = vpack.c.bf16 %v5965_v27, %v2522_v3  ;;  %v5944_v44 = vld [vmem:[#allocation7 + $0x140] sm:$0xff]   ;;  %v5943_v45 = vld [vmem:[#allocation7 + $0x2c8] sm:$0xff]   ;;  %v5945_v46 = vld [vmem:[#allocation7 + $0x2d0] sm:$0xff]  }
  0x95   :  { %1239 = vst [vmem:[#allocation7 + $0x174] sm:$0xf] %v1237_v57  ;;  %v2537_v9 = vpack.c.bf16 %v5965_v27, %v2535_v4  ;;  %v1248_v10 = vsel %vm26_vm2, %v1242_v60, %v5994_v1  ;;  %v1261_v12 = vsel %vm26_vm2, %v1255_v61, %v5994_v1  ;;  %v2548_v16 = vsel %vm26_vm2, %v2542_v62, %v5994_v1  ;;  %v5948_v48 = vld [vmem:[#allocation7 + $0x150] sm:$0xff]   ;;  %v5947_v49 = vld [vmem:[#allocation7 + $0x2d8] sm:$0xff]   ;;  %v5952_v52 = vld [vmem:[#allocation7 + $0x160] sm:$0xff]  }
  0x96   :  { %v1250_v14 = vpack.c.bf16 %v5965_v27, %v1248_v10  ;;  %v1263_v15 = vpack.c.bf16 %v5965_v27, %v1261_v12  ;;  %v2561_v17 = vsel %vm26_vm2, %v2555_v63, %v5994_v1  ;;  %2526 = vst [vmem:[#allocation7 + $0x300] sm:$0xf] %v2524_v8  ;;  %v2550_v19 = vpack.c.bf16 %v5965_v27, %v2548_v16  ;;  %v5950_v51 = vld [vmem:[#allocation7 + $0x158] sm:$0xff]   ;;  %v5951_v53 = vld [vmem:[#allocation7 + $0x2e8] sm:$0xff]  }
  0x97   :  { %2539 = vst [vmem:[#allocation7 + $0x304] sm:$0xf] %v2537_v9  ;;  %v2563_v20 = vpack.c.bf16 %v5965_v27, %v2561_v17  ;;  %v1274_v21 = vsel %vm26_vm2, %v1268_v5, %v5994_v1  ;;  %v1287_v22 = vsel %vm26_vm2, %v1281_v6, %v5994_v1  ;;  %v2568_v25 = vunpack.c.h.bf16 %v7183_v50  ;;  %v5949_v50 = vld [vmem:[#allocation7 + $0x2e0] sm:$0xff]  }
  0x98   :  { %5712 = vmatmul.mubr.msk.bf16.gmra.mrb[64].mxu0 %vm3358_vm3, %v5930_v2  ;;  %1252 = vst [vmem:[#allocation7 + $0x178] sm:$0xf] %v1250_v14  ;;  %1265 = vst [vmem:[#allocation7 + $0x17c] sm:$0xf] %v1263_v15  ;;  %v1276_v13 = vpack.c.bf16 %v5965_v27, %v1274_v21  ;;  %v1289_v24 = vpack.c.bf16 %v5965_v27, %v1287_v22  ;;  %v2581_v26 = vunpack.c.l.bf16 %v5204_v0  ;;  %v1303_v28 = vunpack.c.h.bf16 %v5106_v55  ;;  %v5953_v54 = vld [vmem:[#allocation7 + $0x2f0] sm:$0xff]  }
  0x99   :  { %5715 = vmatprep.mubr.msk.bf16.mxu0 %vm3358_vm3, %v5932_v7  ;;  %2552 = vst [vmem:[#allocation7 + $0x308] sm:$0xf] %v2550_v19  ;;  %2565 = vst [vmem:[#allocation7 + $0x30c] sm:$0xf] %v2563_v20  ;;  %v2603_v29 = vunpack.c.h.bf16 %v5204_v0  ;;  %v2574_v30 = vsel %vm26_vm2, %v2568_v25, %v5994_v1  ;;  %v5954_v55 = vld [vmem:[#allocation7 + $0x168] sm:$0xff]  }
  0x9a   :  { %1278 = vst [vmem:[#allocation7 + $0x180] sm:$0xf] %v1276_v13  ;;  %1291 = vst [vmem:[#allocation7 + $0x184] sm:$0xf] %v1289_v24  ;;  %v2587_v31 = vsel %vm26_vm2, %v2581_v26, %v5994_v1  ;;  %5812 = vmatmul.mubr.msk.bf16.gmra.mrb[64].mxu1 %vm3358_vm3, %v5931_v18  ;;  %v2576_v32 = vpack.c.bf16 %v5965_v27, %v2574_v30  ;;  %v1309_v34 = vsel %vm26_vm2, %v1303_v28, %v5994_v1  ;;  %v5955_v57 = vld [vmem:[#allocation7 + $0x2f8] sm:$0xff]  }
  0x9b   :  { %v2589_v33 = vpack.c.bf16 %v5965_v27, %v2587_v31  ;;  %v2609_v35 = vsel %vm26_vm2, %v2603_v29, %v5994_v1  ;;  %5815 = vmatprep.mubr.msk.bf16.mxu1 %vm3358_vm3, %v5933_v23  ;;  %v5520_v37 = vpack.c.bf16 %v5994_v1, %v1309_v34  ;;  %v5935_v27 = vld [vmem:[#allocation7 + $0x2a8] sm:$0xff]  }
  0x9c   :  { %v5530_v38 = vpack.c.bf16 %v5994_v1, %v2609_v35  ;;  %2578 = vst [vmem:[#allocation7 + $0x310] sm:$0xf] %v2576_v32  ;;  %v5941_v1 = vld [vmem:[#allocation7 + $0x2c0] sm:$0xff]   ;;  %v5956_v56 = vld [vmem:[#allocation7 + $0x170] sm:$0xff]  }
  0x9d   :  { %2591 = vst [vmem:[#allocation7 + $0x314] sm:$0xf] %v2589_v33  ;;  %5521 = vst [vmem:[#allocation7 + $0x188] sm:$0xff] %v5520_v37  }
  0x9e   :  { %5531 = vst [vmem:[#allocation7 + $0x318] sm:$0xff] %v5530_v38   ;;  %v5957_v58 = vld [vmem:[#allocation7 + $0x300] sm:$0xff]  }
  0x9f   :  { %v5958_v59 = vld [vmem:[#allocation7 + $0x178] sm:$0xff]  }
  0xa0   :  { %5716 = vmatmul.mubr.msk.bf16.gmra.mrb[68].mxu0 %vm3358_vm3, %v5934_v36  ;;  %v5959_v61 = vld [vmem:[#allocation7 + $0x308] sm:$0xff]  }
  0xa1   :  { %5719 = vmatprep.mubr.msk.bf16.mxu0 %vm3358_vm3, %v5936_v39  ;;  %v5960_v60 = vld [vmem:[#allocation7 + $0x180] sm:$0xff]  }
  0xa2   :  { %5816 = vmatmul.mubr.msk.bf16.gmra.mrb[68].mxu1 %vm3358_vm3, %v5935_v27 }
  0xa3   :  { %5819 = vmatprep.mubr.msk.bf16.mxu1 %vm3358_vm3, %v5937_v40 }
  0xa4   :  { %v5961_v62 = vld [vmem:[#allocation7 + $0x310] sm:$0xff]   ;;  %v5962_v63 = vld [vmem:[#allocation7 + $0x188] sm:$0xff]  }
  0xa5   :  { %v5963_v0 = vld [vmem:[#allocation7 + $0x318] sm:$0xff]  }
  0xa8   :  { %5720 = vmatmul.mubr.msk.bf16.gmra.mrb[72].mxu0 %vm3358_vm3, %v5938_v11 }
  0xa9   :  { %5723 = vmatprep.mubr.msk.bf16.mxu0 %vm3358_vm3, %v5940_v41 }
  0xaa   :  { %5820 = vmatmul.mubr.msk.bf16.gmra.mrb[72].mxu1 %vm3358_vm3, %v5939_v42 }
  0xab   :  { %5823 = vmatprep.mubr.msk.bf16.mxu1 %vm3358_vm3, %v5941_v1 }
  0xb0   :  { %5724 = vmatmul.mubr.msk.bf16.gmra.mrb[76].mxu0 %vm3358_vm3, %v5942_v43 }
  0xb1   :  { %5727 = vmatprep.mubr.msk.bf16.mxu0 %vm3358_vm3, %v5944_v44 }
  0xb2   :  { %5824 = vmatmul.mubr.msk.bf16.gmra.mrb[76].mxu1 %vm3358_vm3, %v5943_v45 }
  0xb3   :  { %5827 = vmatprep.mubr.msk.bf16.mxu1 %vm3358_vm3, %v5945_v46 }
  0xb8   :  { %5728 = vmatmul.mubr.msk.bf16.gmra.mrb[80].mxu0 %vm3358_vm3, %v5946_v47 }
  0xb9   :  { %5731 = vmatprep.mubr.msk.bf16.mxu0 %vm3358_vm3, %v5948_v48 }
  0xba   :  { %5828 = vmatmul.mubr.msk.bf16.gmra.mrb[80].mxu1 %vm3358_vm3, %v5947_v49 }
  0xbb   :  { %5831 = vmatprep.mubr.msk.bf16.mxu1 %vm3358_vm3, %v5949_v50 }
  0xc0   :  { %5732 = vmatmul.mubr.msk.bf16.gmra.mrb[84].mxu0 %vm3358_vm3, %v5950_v51 }
  0xc1   :  { %5735 = vmatprep.mubr.msk.bf16.mxu0 %vm3358_vm3, %v5952_v52 }
  0xc2   :  { %5832 = vmatmul.mubr.msk.bf16.gmra.mrb[84].mxu1 %vm3358_vm3, %v5951_v53 }
  0xc3   :  { %5835 = vmatprep.mubr.msk.bf16.mxu1 %vm3358_vm3, %v5953_v54 }
  0xc8   :  { %5736 = vmatmul.mubr.msk.bf16.gmra.mrb[88].mxu0 %vm3358_vm3, %v5954_v55 }
  0xc9   :  { %5739 = vmatprep.mubr.msk.bf16.mxu0 %vm3358_vm3, %v5956_v56 }
  0xca   :  { %5836 = vmatmul.mubr.msk.bf16.gmra.mrb[88].mxu1 %vm3358_vm3, %v5955_v57 }
  0xcb   :  { %5839 = vmatprep.mubr.msk.bf16.mxu1 %vm3358_vm3, %v5957_v58 }
  0xd0   :  { %5740 = vmatmul.mubr.msk.bf16.gmra.mrb[92].mxu0 %vm3358_vm3, %v5958_v59 }
  0xd1   :  { %5743 = vmatprep.mubr.msk.bf16.mxu0 %vm3358_vm3, %v5960_v60 }
  0xd2   :  { %5840 = vmatmul.mubr.msk.bf16.gmra.mrb[92].mxu1 %vm3358_vm3, %v5959_v61 }
  0xd3   :  { %5843 = vmatprep.mubr.msk.bf16.mxu1 %vm3358_vm3, %v5961_v62 }
  0xd8   :  { %5744 = vmatmul.mubr.msk.bf16.gmra.mrb[96].mxu0 %vm3358_vm3, %v5962_v63 }
  0xda   :  { %5844 = vmatmul.mubr.msk.bf16.gmra.mrb[96].mxu1 %vm3358_vm3, %v5963_v0 }
  0xeb   :  { %v7290_v2 = vpop.f32.mrb[0].mxu0 }
  0xec   :  { %v7292_v3 = vpop.f32.mrb[1].mxu0  ;;  %v7296_v5 = vpop.f32.mrb[0].mxu1 }
  0xed   :  { %v7294_v4 = vpop.f32.mrb[2].mxu0  ;;  %v7300_v7 = vpop.f32.mrb[1].mxu1 }
  0xee   :  { %v7298_v6 = vpop.f32.mrb[3].mxu0  ;;  %v7302_v8 = vpop.f32.mrb[2].mxu1 }
  0xef   :  { %v7304_v9 = vpop.f32.mrb[3].mxu1 }
  0xf3   :  { %v7306_v10 = vpop.f32.mrb[4].mxu0 }
  0xf4   :  { %v7308_v12 = vpop.f32.mrb[5].mxu0  ;;  %v7312_v15 = vpop.f32.mrb[4].mxu1 }
  0xf5   :  { %v7310_v14 = vpop.f32.mrb[6].mxu0  ;;  %v7316_v17 = vpop.f32.mrb[5].mxu1 }
  0xf6   :  { %v7314_v16 = vpop.f32.mrb[7].mxu0  ;;  %v7318_v18 = vpop.f32.mrb[6].mxu1 }
  0xf7   :  { %v7320_v19 = vpop.f32.mrb[7].mxu1 }
  0xfb   :  { %v7322_v20 = vpop.f32.mrb[8].mxu0 }
  0xfc   :  { %v7324_v21 = vpop.f32.mrb[9].mxu0  ;;  %v7328_v23 = vpop.f32.mrb[8].mxu1 }
  0xfd   :  { %v7326_v22 = vpop.f32.mrb[10].mxu0  ;;  %v7332_v24 = vpop.f32.mrb[9].mxu1 }
  0xfe   :  { %v7330_v13 = vpop.f32.mrb[11].mxu0  ;;  %v7334_v25 = vpop.f32.mrb[10].mxu1 }
  0xff   :  { %v7336_v26 = vpop.f32.mrb[11].mxu1 }
 0x103   :  { %v7338_v28 = vpop.f32.mrb[12].mxu0 }
 0x104   :  { %v7340_v29 = vpop.f32.mrb[13].mxu0  ;;  %v7344_v31 = vpop.f32.mrb[12].mxu1 }
 0x105   :  { %v7342_v30 = vpop.f32.mrb[14].mxu0  ;;  %v7348_v33 = vpop.f32.mrb[13].mxu1 }
 0x106   :  { %v7346_v32 = vpop.f32.mrb[15].mxu0  ;;  %v7350_v34 = vpop.f32.mrb[14].mxu1 }
 0x107   :  { %v7352_v35 = vpop.f32.mrb[15].mxu1 }
 0x10b   :  { %v7354_v36 = vpop.f32.mrb[16].mxu0 }
 0x10c   :  { %v7356_v37 = vpop.f32.mrb[17].mxu0  ;;  %v7360_v39 = vpop.f32.mrb[16].mxu1 }
 0x10d   :  { %v7358_v38 = vpop.f32.mrb[18].mxu0  ;;  %v7364_v40 = vpop.f32.mrb[17].mxu1 }
 0x10e   :  { %v7362_v27 = vpop.f32.mrb[19].mxu0  ;;  %v7366_v11 = vpop.f32.mrb[18].mxu1 }
 0x10f   :  { %v7368_v41 = vpop.f32.mrb[19].mxu1 }
 0x113   :  { %v7370_v42 = vpop.f32.mrb[20].mxu0 }
 0x114   :  { %v7372_v1 = vpop.f32.mrb[21].mxu0 }
 0x115   :  { %v7374_v43 = vpop.f32.mrb[22].mxu0  ;;  %v7376_v44 = vpop.f32.mrb[20].mxu1 }
 0x116   :  { %7850 = vst [vmem:[#allocation8_spill] sm:$0xff] %v7376_v44  ;;  %v7378_v45 = vpop.f32.mrb[23].mxu0  ;;  %v7380_v46 = vpop.f32.mrb[21].mxu1 }
 0x117   :  { %v7382_v47 = vpop.f32.mrb[22].mxu1 }
 0x118   :  { %7851 = vst [vmem:[#allocation9_spill] sm:$0xff] %v7382_v47  ;;  %v7384_v48 = vpop.f32.mrb[23].mxu1 }
 0x11b   :  { %v7386_v49 = vpop.f32.mrb[24].mxu0 }
 0x11c   :  { %7852 = vst [vmem:[#allocation10_spill] sm:$0xff] %v7386_v49  ;;  %v7388_v50 = vpop.f32.mrb[25].mxu0 }
 0x11d   :  { %v7390_v51 = vpop.f32.mrb[26].mxu0  ;;  %v7392_v52 = vpop.f32.mrb[24].mxu1 }
 0x11e   :  { %7853 = vst [vmem:[#allocation11_spill] sm:$0xff] %v7390_v51  ;;  %7854 = vst [vmem:[#allocation12_spill] sm:$0xff] %v7392_v52  ;;  %v7394_v53 = vpop.f32.mrb[27].mxu0  ;;  %v7396_v54 = vpop.f32.mrb[25].mxu1 }
 0x11f   :  { %v7398_v55 = vpop.f32.mrb[26].mxu1 }
 0x120   :  { %7855 = vst [vmem:[#allocation13_spill] sm:$0xff] %v7398_v55  ;;  %v7400_v56 = vpop.f32.mrb[27].mxu1 }
 0x121   :  { %7856 = vst [vmem:[#allocation14_spill] sm:$0xff] %v7400_v56 }
 0x123   :  { %v7402_v57 = vpop.f32.mrb[28].mxu0 }
 0x124   :  { %7857 = vst [vmem:[#allocation15_spill] sm:$0xff] %v7402_v57  ;;  %v7404_v58 = vpop.f32.mrb[29].mxu0 }
 0x125   :  { %7858 = vst [vmem:[#allocation16_spill] sm:$0xff] %v7404_v58  ;;  %v7406_v59 = vpop.f32.mrb[30].mxu0  ;;  %v7408_v60 = vpop.f32.mrb[28].mxu1 }
 0x126   :  { %7859 = vst [vmem:[#allocation17_spill] sm:$0xff] %v7406_v59  ;;  %7860 = vst [vmem:[#allocation18_spill] sm:$0xff] %v7408_v60  ;;  %v7410_v61 = vpop.f32.mrb[31].mxu0  ;;  %v7412_v62 = vpop.f32.mrb[29].mxu1 }
 0x127   :  { %7861 = vst [vmem:[#allocation19_spill] sm:$0xff] %v7410_v61  ;;  %7862 = vst [vmem:[#allocation20_spill] sm:$0xff] %v7412_v62  ;;  %v7414_v63 = vpop.f32.mrb[30].mxu1 }
 0x128   :  { %7863 = vst [vmem:[#allocation21_spill] sm:$0xff] %v7414_v63  ;;  %v7416_v0 = vpop.f32.mrb[31].mxu1 }
 0x129   :  { %7864 = vst [vmem:[#allocation22_spill] sm:$0xff] %v7416_v0 }
 0x12b   :  { %v7418_v52 = vpop.f32.mrb[32].mxu0 }
 0x12c   :  { %7865 = vst [vmem:[#allocation23_spill] sm:$0xff] %v7418_v52  ;;  %v7420_v55 = vpop.f32.mrb[33].mxu0 }
 0x12d   :  { %7866 = vst [vmem:[#allocation24_spill] sm:$0xff] %v7420_v55  ;;  %v7422_v51 = vpop.f32.mrb[34].mxu0  ;;  %v7424_v57 = vpop.f32.mrb[32].mxu1 }
 0x12e   :  { %7867 = vst [vmem:[#allocation25_spill] sm:$0xff] %v7422_v51  ;;  %7868 = vst [vmem:[#allocation26_spill] sm:$0xff] %v7424_v57  ;;  %v7426_v49 = vpop.f32.mrb[35].mxu0  ;;  %v7428_v59 = vpop.f32.mrb[33].mxu1 }
 0x12f   :  { %7869 = vst [vmem:[#allocation27_spill] sm:$0xff] %v7426_v49  ;;  %7870 = vst [vmem:[#allocation28_spill] sm:$0xff] %v7428_v59  ;;  %v7430_v60 = vpop.f32.mrb[34].mxu1 }
 0x130   :  { %7871 = vst [vmem:[#allocation29_spill] sm:$0xff] %v7430_v60  ;;  %v7432_v61 = vpop.f32.mrb[35].mxu1 }
 0x131   :  { %7872 = vst [vmem:[#allocation30_spill] sm:$0xff] %v7432_v61 }
 0x133   :  { %v7434_v62 = vpop.f32.mrb[36].mxu0 }
 0x134   :  { %7873 = vst [vmem:[#allocation31_spill] sm:$0xff] %v7434_v62  ;;  %v7436_v63 = vpop.f32.mrb[37].mxu0 }
 0x135   :  { %7874 = vst [vmem:[#allocation32_spill] sm:$0xff] %v7436_v63  ;;  %v7438_v0 = vpop.f32.mrb[38].mxu0  ;;  %v7440_v52 = vpop.f32.mrb[36].mxu1 }
 0x136   :  { %7875 = vst [vmem:[#allocation33_spill] sm:$0xff] %v7438_v0  ;;  %7876 = vst [vmem:[#allocation34_spill] sm:$0xff] %v7440_v52  ;;  %v7442_v55 = vpop.f32.mrb[39].mxu0  ;;  %v7444_v51 = vpop.f32.mrb[37].mxu1 }
 0x137   :  { %7877 = vst [vmem:[#allocation35_spill] sm:$0xff] %v7442_v55  ;;  %7878 = vst [vmem:[#allocation36_spill] sm:$0xff] %v7444_v51  ;;  %v7446_v57 = vpop.f32.mrb[38].mxu1 }
 0x138   :  { %7879 = vst [vmem:[#allocation37_spill] sm:$0xff] %v7446_v57  ;;  %v7448_v49 = vpop.f32.mrb[39].mxu1 }
 0x139   :  { %7880 = vst [vmem:[#allocation38_spill] sm:$0xff] %v7448_v49 }
 0x13b   :  { %v7450_v59 = vpop.f32.mrb[40].mxu0 }
 0x13c   :  { %7881 = vst [vmem:[#allocation39_spill] sm:$0xff] %v7450_v59  ;;  %v7452_v60 = vpop.f32.mrb[41].mxu0 }
 0x13d   :  { %7882 = vst [vmem:[#allocation40_spill] sm:$0xff] %v7452_v60  ;;  %v7454_v61 = vpop.f32.mrb[42].mxu0  ;;  %v7456_v62 = vpop.f32.mrb[40].mxu1 }
 0x13e   :  { %7883 = vst [vmem:[#allocation41_spill] sm:$0xff] %v7454_v61  ;;  %7884 = vst [vmem:[#allocation42_spill] sm:$0xff] %v7456_v62  ;;  %v7458_v63 = vpop.f32.mrb[43].mxu0  ;;  %v7460_v0 = vpop.f32.mrb[41].mxu1 }
 0x13f   :  { %7885 = vst [vmem:[#allocation43_spill] sm:$0xff] %v7458_v63  ;;  %7886 = vst [vmem:[#allocation44_spill] sm:$0xff] %v7460_v0  ;;  %v7462_v52 = vpop.f32.mrb[42].mxu1 }
 0x140   :  { %7887 = vst [vmem:[#allocation45_spill] sm:$0xff] %v7462_v52  ;;  %v7464_v55 = vpop.f32.mrb[43].mxu1 }
 0x141   :  { %7888 = vst [vmem:[#allocation46_spill] sm:$0xff] %v7464_v55 }
 0x143   :  { %v7466_v51 = vpop.f32.mrb[44].mxu0 }
 0x144   :  { %7889 = vst [vmem:[#allocation47_spill] sm:$0xff] %v7466_v51  ;;  %v7468_v57 = vpop.f32.mrb[45].mxu0 }
 0x145   :  { %7890 = vst [vmem:[#allocation48_spill] sm:$0xff] %v7468_v57  ;;  %v7470_v49 = vpop.f32.mrb[46].mxu0  ;;  %v7472_v59 = vpop.f32.mrb[44].mxu1 }
 0x146   :  { %7891 = vst [vmem:[#allocation49_spill] sm:$0xff] %v7470_v49  ;;  %7892 = vst [vmem:[#allocation50_spill] sm:$0xff] %v7472_v59  ;;  %v7474_v60 = vpop.f32.mrb[47].mxu0  ;;  %v7476_v61 = vpop.f32.mrb[45].mxu1 }
 0x147   :  { %7893 = vst [vmem:[#allocation51_spill] sm:$0xff] %v7474_v60  ;;  %7894 = vst [vmem:[#allocation52_spill] sm:$0xff] %v7476_v61  ;;  %v7478_v62 = vpop.f32.mrb[46].mxu1 }
 0x148   :  { %7895 = vst [vmem:[#allocation53_spill] sm:$0xff] %v7478_v62  ;;  %v7480_v63 = vpop.f32.mrb[47].mxu1  ;;  %v7494_v62 = vld [vmem:[%s7846_s1] ss:$0 sm:$0xff] }
 0x149   :  { %7896 = vst [vmem:[#allocation54_spill] sm:$0xff] %v7480_v63 }
 0x14b   :  { %v5697_v0 = vpop.f32.mrb[48].mxu0 }
 0x14c   :  { %v4499_v52 = vmax.f32 %v7292_v3, %v5697_v0  ;;  %v7483_v55 = vpop.f32.mrb[49].mxu0 }
 0x14d   :  { %7897 = vst [vmem:[#allocation55_spill] sm:$0xff] %v7483_v55  ;;  %v5698_v51 = vpop.f32.mrb[50].mxu0  ;;  %v5797_v58 = vpop.f32.mrb[48].mxu1 }
 0x14e   :  { %v4500_v57 = vmax.f32 %v7298_v6, %v5698_v51  ;;  %v7486_v49 = vpop.f32.mrb[51].mxu0  ;;  %v4549_v59 = vmax.f32 %v7300_v7, %v5797_v58  ;;  %v7489_v60 = vpop.f32.mrb[49].mxu1 }
 0x14f   :  { %7898 = vst [vmem:[#allocation56_spill] sm:$0xff] %v7486_v49  ;;  %7899 = vst [vmem:[#allocation57_spill] sm:$0xff] %v7489_v60  ;;  %v5798_v63 = vpop.f32.mrb[50].mxu1 }
 0x150   :  { %v4599_v61 = vmax.f32 %v4499_v52, %v4549_v59  ;;  %v4550_v3 = vmax.f32 %v7304_v9, %v5798_v63  ;;  %v7497_v0 = vpop.f32.mrb[51].mxu1 }
 0x152   :  { %v4656_v55 = vadd.f32 %v7494_v62, %v4599_v61  ;;  %v4600_v6 = vmax.f32 %v4500_v57, %v4550_v3 }
 0x153   :  { %v5701_v51 = vpop.f32.mrb[52].mxu0 }
 0x154   :  { %v4503_v49 = vmax.f32 %v7308_v12, %v5701_v51  ;;  %v3908_v7 = vpop.f32.mrb[53].mxu0  ;;  %v4706_v58 = vmax.f32 %v4656_v55, 0.0  ;;  %v4657_v60 = vadd.f32 %v7494_v62, %v4600_v6 }
 0x155   :  { %v4501_v47 = vmax.f32 %v7290_v2, %v3908_v7  ;;  %v5702_v56 = vpop.f32.mrb[54].mxu0  ;;  %v5801_v44 = vpop.f32.mrb[52].mxu1 }
 0x156   :  { %v4504_v52 = vmax.f32 %v7314_v16, %v5702_v56  ;;  %v3911_v9 = vpop.f32.mrb[55].mxu0  ;;  %v5462_v59 = vpack.c.bf16 %v4706_v58, %v4706_v58  ;;  %v4707_v63 = vmax.f32 %v4657_v60, 0.0  ;;  %v4553_v61 = vmax.f32 %v7316_v17, %v5801_v44  ;;  %v4308_v57 = vpop.f32.mrb[53].mxu1 }
 0x157   :  { %v4502_v3 = vmax.f32 %v7294_v4, %v3911_v9  ;;  %v4551_v12 = vmax.f32 %v7296_v5, %v4308_v57  ;;  %v5802_v55 = vpop.f32.mrb[54].mxu1 }
 0x158   :  { %4957 = vst.msk [vmem:[%s7849_s4] sm:$0xf] %vm4956_vm4, %v5462_v59  ;;  %v5463_v2 = vpack.c.bf16 %v4707_v63, %v4707_v63  ;;  %v4603_v6 = vmax.f32 %v4503_v49, %v4553_v61  ;;  %v4554_v16 = vmax.f32 %v7320_v19, %v5802_v55  ;;  %v4311_v56 = vpop.f32.mrb[55].mxu1 }
 0x159   :  { %v4601_v51 = vmax.f32 %v4501_v47, %v4551_v12  ;;  %v4552_v60 = vmax.f32 %v7302_v8, %v4311_v56 }
 0x15a   :  { %4958 = vst.msk [vmem:[%s7849_s4 + $0x4] sm:$0xf] %vm4956_vm4, %v5463_v2  ;;  %v4660_v4 = vadd.f32 %v7494_v62, %v4603_v6  ;;  %v4604_v5 = vmax.f32 %v4504_v52, %v4554_v16 }
 0x15b   :  { %v5705_v17 = vpop.f32.mrb[56].mxu0  ;;  %v4658_v44 = vadd.f32 %v7494_v62, %v4601_v51  ;;  %v4602_v7 = vmax.f32 %v4502_v3, %v4552_v60 }
 0x15c   :  { %v4507_v49 = vmax.f32 %v7324_v21, %v5705_v17  ;;  %v3924_v58 = vpop.f32.mrb[57].mxu0  ;;  %v4710_v19 = vmax.f32 %v4660_v4, 0.0  ;;  %v4661_v47 = vadd.f32 %v7494_v62, %v4604_v5 }
 0x15d   :  { %v4505_v8 = vmax.f32 %v7306_v10, %v3924_v58  ;;  %v5706_v9 = vpop.f32.mrb[58].mxu0  ;;  %v4708_v59 = vmax.f32 %v4658_v44, 0.0  ;;  %v4659_v63 = vadd.f32 %v7494_v62, %v4602_v7  ;;  %v5805_v61 = vpop.f32.mrb[56].mxu1 }
 0x15e   :  { %v4508_v57 = vmax.f32 %v7330_v13, %v5706_v9  ;;  %v3927_v52 = vpop.f32.mrb[59].mxu0  ;;  %v5466_v12 = vpack.c.bf16 %v4710_v19, %v4710_v19  ;;  %v4711_v55 = vmax.f32 %v4661_v47, 0.0  ;;  %v4557_v3 = vmax.f32 %v7332_v24, %v5805_v61  ;;  %v4324_v2 = vpop.f32.mrb[57].mxu1 }
 0x15f   :  { %v4506_v21 = vmax.f32 %v7310_v14, %v3927_v52  ;;  %v5464_v6 = vpack.c.bf16 %v4708_v59, %v4708_v59  ;;  %v4709_v16 = vmax.f32 %v4659_v63, 0.0  ;;  %v4555_v56 = vmax.f32 %v7312_v15, %v4324_v2  ;;  %v5806_v10 = vpop.f32.mrb[58].mxu1 }
 0x160   :  { %4961 = vst.msk [vmem:[%s7849_s4 + $0x10] sm:$0xf] %vm4956_vm4, %v5466_v12  ;;  %v5467_v51 = vpack.c.bf16 %v4711_v55, %v4711_v55  ;;  %v4607_v13 = vmax.f32 %v4507_v49, %v4557_v3  ;;  %v4558_v60 = vmax.f32 %v7336_v26, %v5806_v10  ;;  %v4327_v4 = vpop.f32.mrb[59].mxu1 }
 0x161   :  { %4959 = vst.msk [vmem:[%s7849_s4 + $0x8] sm:$0xf] %vm4956_vm4, %v5464_v6  ;;  %v5465_v14 = vpack.c.bf16 %v4709_v16, %v4709_v16  ;;  %v4605_v24 = vmax.f32 %v4505_v8, %v4555_v56  ;;  %v4556_v15 = vmax.f32 %v7318_v18, %v4327_v4 }
 0x162   :  { %4962 = vst.msk [vmem:[%s7849_s4 + $0x14] sm:$0xf] %vm4956_vm4, %v5467_v51  ;;  %v4664_v5 = vadd.f32 %v7494_v62, %v4607_v13  ;;  %v4608_v17 = vmax.f32 %v4508_v57, %v4558_v60 }
 0x163   :  { %v5709_v44 = vpop.f32.mrb[60].mxu0  ;;  %4960 = vst.msk [vmem:[%s7849_s4 + $0xc] sm:$0xf] %vm4956_vm4, %v5465_v14  ;;  %v4662_v26 = vadd.f32 %v7494_v62, %v4605_v24  ;;  %v4606_v7 = vmax.f32 %v4506_v21, %v4556_v15 }
 0x164   :  { %v4511_v49 = vmax.f32 %v7340_v29, %v5709_v44  ;;  %v3940_v18 = vpop.f32.mrb[61].mxu0  ;;  %v4714_v58 = vmax.f32 %v4664_v5, 0.0  ;;  %v4665_v19 = vadd.f32 %v7494_v62, %v4608_v17 }
 0x165   :  { %v4509_v47 = vmax.f32 %v7322_v20, %v3940_v18  ;;  %v5710_v8 = vpop.f32.mrb[62].mxu0  ;;  %v4712_v9 = vmax.f32 %v4662_v26, 0.0  ;;  %v4663_v59 = vadd.f32 %v7494_v62, %v4606_v7  ;;  %v5809_v63 = vpop.f32.mrb[60].mxu1 }
 0x166   :  { %v4512_v61 = vmax.f32 %v7346_v32, %v5710_v8  ;;  %v3943_v57 = vpop.f32.mrb[63].mxu0  ;;  %v5470_v52 = vpack.c.bf16 %v4714_v58, %v4714_v58  ;;  %v4715_v12 = vmax.f32 %v4665_v19, 0.0  ;;  %v4561_v55 = vmax.f32 %v7348_v33, %v5809_v63  ;;  %v4340_v3 = vpop.f32.mrb[61].mxu1 }
 0x167   :  { %v4510_v29 = vmax.f32 %v7326_v22, %v3943_v57  ;;  %v5468_v2 = vpack.c.bf16 %v4712_v9, %v4712_v9  ;;  %v4713_v21 = vmax.f32 %v4663_v59, 0.0  ;;  %v4559_v6 = vmax.f32 %v7328_v23, %v4340_v3  ;;  %v5810_v20 = vpop.f32.mrb[62].mxu1 }
 0x168   :  { %4965 = vst.msk [vmem:[%s7849_s4 + $0x20] sm:$0xf] %vm4956_vm4, %v5470_v52  ;;  %v5471_v16 = vpack.c.bf16 %v4715_v12, %v4715_v12  ;;  %v4611_v32 = vmax.f32 %v4511_v49, %v4561_v55  ;;  %v4562_v56 = vmax.f32 %v7352_v35, %v5810_v20  ;;  %v4343_v10 = vpop.f32.mrb[63].mxu1 }
 0x169   :  { %4963 = vst.msk [vmem:[%s7849_s4 + $0x18] sm:$0xf] %vm4956_vm4, %v5468_v2  ;;  %v5469_v22 = vpack.c.bf16 %v4713_v21, %v4713_v21  ;;  %v4609_v33 = vmax.f32 %v4509_v47, %v4559_v6  ;;  %v4560_v23 = vmax.f32 %v7334_v25, %v4343_v10 }
 0x16a   :  { %4966 = vst.msk [vmem:[%s7849_s4 + $0x24] sm:$0xf] %vm4956_vm4, %v5471_v16  ;;  %v4668_v51 = vadd.f32 %v7494_v62, %v4611_v32  ;;  %v4612_v13 = vmax.f32 %v4512_v61, %v4562_v56 }
 0x16b   :  { %v5713_v60 = vpop.f32.mrb[64].mxu0  ;;  %4964 = vst.msk [vmem:[%s7849_s4 + $0x1c] sm:$0xf] %vm4956_vm4, %v5469_v22  ;;  %v4666_v35 = vadd.f32 %v7494_v62, %v4609_v33  ;;  %v4610_v4 = vmax.f32 %v4510_v29, %v4560_v23 }
 0x16c   :  { %v4515_v14 = vmax.f32 %v7356_v37, %v5713_v60  ;;  %v3956_v25 = vpop.f32.mrb[65].mxu0  ;;  %v4718_v24 = vmax.f32 %v4668_v51, 0.0  ;;  %v4669_v15 = vadd.f32 %v7494_v62, %v4612_v13 }
 0x16d   :  { %v4513_v5 = vmax.f32 %v7338_v28, %v3956_v25  ;;  %v5714_v17 = vpop.f32.mrb[66].mxu0  ;;  %v4716_v44 = vmax.f32 %v4666_v35, 0.0  ;;  %v4667_v26 = vadd.f32 %v7494_v62, %v4610_v4  ;;  %v5813_v7 = vpop.f32.mrb[64].mxu1 }
 0x16e   :  { %v4516_v49 = vmax.f32 %v7362_v27, %v5714_v17  ;;  %v3959_v18 = vpop.f32.mrb[67].mxu0  ;;  %v5474_v58 = vpack.c.bf16 %v4718_v24, %v4718_v24  ;;  %v4719_v19 = vmax.f32 %v4669_v15, 0.0  ;;  %v4565_v47 = vmax.f32 %v7364_v40, %v5813_v7  ;;  %v4356_v8 = vpop.f32.mrb[65].mxu1 }
 0x16f   :  { %v4514_v37 = vmax.f32 %v7342_v30, %v3959_v18  ;;  %v5472_v9 = vpack.c.bf16 %v4716_v44, %v4716_v44  ;;  %v4717_v59 = vmax.f32 %v4667_v26, 0.0  ;;  %v4563_v63 = vmax.f32 %v7344_v31, %v4356_v8  ;;  %v5814_v28 = vpop.f32.mrb[66].mxu1 }
 0x170   :  { %4969 = vst.msk [vmem:[%s7849_s4 + $0x30] sm:$0xf] %vm4956_vm4, %v5474_v58  ;;  %v5475_v61 = vpack.c.bf16 %v4719_v19, %v4719_v19  ;;  %v4615_v27 = vmax.f32 %v4515_v14, %v4565_v47  ;;  %v4566_v57 = vmax.f32 %v7368_v41, %v5814_v28  ;;  %v4359_v52 = vpop.f32.mrb[67].mxu1 }
 0x171   :  { %4967 = vst.msk [vmem:[%s7849_s4 + $0x28] sm:$0xf] %vm4956_vm4, %v5472_v9  ;;  %v5473_v30 = vpack.c.bf16 %v4717_v59, %v4717_v59  ;;  %v4613_v40 = vmax.f32 %v4513_v5, %v4563_v63  ;;  %v4564_v31 = vmax.f32 %v7350_v34, %v4359_v52 }
 0x172   :  { %4970 = vst.msk [vmem:[%s7849_s4 + $0x34] sm:$0xf] %vm4956_vm4, %v5475_v61  ;;  %v4672_v12 = vadd.f32 %v7494_v62, %v4615_v27  ;;  %v4616_v55 = vmax.f32 %v4516_v49, %v4566_v57 }
 0x173   :  { %v5717_v3 = vpop.f32.mrb[68].mxu0  ;;  %4968 = vst.msk [vmem:[%s7849_s4 + $0x2c] sm:$0xf] %vm4956_vm4, %v5473_v30  ;;  %v4670_v41 = vadd.f32 %v7494_v62, %v4613_v40  ;;  %v4614_v29 = vmax.f32 %v4514_v37, %v4564_v31  ;;  %v7900_v30 = vld [vmem:[#allocation8_spill] sm:$0xff] }
 0x174   :  { %v4519_v2 = vmax.f32 %v7372_v1, %v5717_v3  ;;  %v3972_v34 = vpop.f32.mrb[69].mxu0  ;;  %v4722_v21 = vmax.f32 %v4672_v12, 0.0  ;;  %v4673_v6 = vadd.f32 %v7494_v62, %v4616_v55  ;;  %v7901_v12 = vld [vmem:[#allocation14_spill] sm:$0xff] }
 0x175   :  { %v4517_v20 = vmax.f32 %v7354_v36, %v3972_v34  ;;  %v5718_v16 = vpop.f32.mrb[70].mxu0  ;;  %v4720_v32 = vmax.f32 %v4670_v41, 0.0  ;;  %v4671_v56 = vadd.f32 %v7494_v62, %v4614_v29  ;;  %v5817_v10 = vpop.f32.mrb[68].mxu1  ;;  %v7902_v41 = vld [vmem:[#allocation9_spill] sm:$0xff] }
 0x176   :  { %v4520_v22 = vmax.f32 %v7378_v45, %v5718_v16  ;;  %v3975_v33 = vpop.f32.mrb[71].mxu0  ;;  %v5478_v23 = vpack.c.bf16 %v4722_v21, %v4722_v21  ;;  %v4723_v51 = vmax.f32 %v4673_v6, 0.0  ;;  %v4569_v13 = vmax.f32 %v7380_v46, %v5817_v10  ;;  %v4372_v60 = vpop.f32.mrb[69].mxu1  ;;  %v7903_v16 = vld [vmem:[#allocation16_spill] sm:$0xff] }
 0x177   :  { %v4518_v1 = vmax.f32 %v7358_v38, %v3975_v33  ;;  %v5476_v35 = vpack.c.bf16 %v4720_v32, %v4720_v32  ;;  %v4721_v4 = vmax.f32 %v4671_v56, 0.0  ;;  %v4567_v14 = vmax.f32 %v7360_v39, %v4372_v60  ;;  %v5818_v36 = vpop.f32.mrb[70].mxu1  ;;  %v7904_v33 = vld [vmem:[#allocation10_spill] sm:$0xff] }
 0x178   :  { %4973 = vst.msk [vmem:[%s7849_s4 + $0x40] sm:$0xf] %vm4956_vm4, %v5478_v23  ;;  %v5479_v25 = vpack.c.bf16 %v4723_v51, %v4723_v51  ;;  %v4619_v45 = vmax.f32 %v4519_v2, %v4569_v13  ;;  %v4570_v24 = vmax.f32 %v7384_v48, %v5818_v36  ;;  %v4375_v15 = vpop.f32.mrb[71].mxu1 }
 0x179   :  { %4971 = vst.msk [vmem:[%s7849_s4 + $0x38] sm:$0xf] %vm4956_vm4, %v5476_v35  ;;  %v5477_v38 = vpack.c.bf16 %v4721_v4, %v4721_v4  ;;  %v4617_v46 = vmax.f32 %v4517_v20, %v4567_v14  ;;  %v4568_v39 = vmax.f32 %v7366_v11, %v4375_v15  ;;  %v7905_v35 = vld [vmem:[#allocation19_spill] sm:$0xff] }
 0x17a   :  { %4974 = vst.msk [vmem:[%s7849_s4 + $0x44] sm:$0xf] %vm4956_vm4, %v5479_v25  ;;  %v4676_v5 = vadd.f32 %v7494_v62, %v4619_v45  ;;  %v4620_v17 = vmax.f32 %v4520_v22, %v4570_v24  ;;  %v7906_v45 = vld [vmem:[#allocation20_spill] sm:$0xff] }
 0x17b   :  { %v5721_v44 = vpop.f32.mrb[72].mxu0  ;;  %4972 = vst.msk [vmem:[%s7849_s4 + $0x3c] sm:$0xf] %vm4956_vm4, %v5477_v38  ;;  %v4674_v48 = vadd.f32 %v7494_v62, %v4617_v46  ;;  %v4618_v26 = vmax.f32 %v4518_v1, %v4568_v39  ;;  %v7907_v38 = vld [vmem:[#allocation11_spill] sm:$0xff] }
 0x17c   :  { %v4523_v7 = vmax.f32 %v7388_v50, %v5721_v44  ;;  %v3988_v11 = vpop.f32.mrb[73].mxu0  ;;  %v4726_v49 = vmax.f32 %v4676_v5, 0.0  ;;  %v4677_v18 = vadd.f32 %v7494_v62, %v4620_v17  ;;  %v7908_v17 = vld [vmem:[#allocation12_spill] sm:$0xff] }
 0x17d   :  { %v4521_v58 = vmax.f32 %v7370_v42, %v3988_v11  ;;  %v5722_v19 = vpop.f32.mrb[74].mxu0  ;;  %v4724_v47 = vmax.f32 %v4674_v48, 0.0  ;;  %v4675_v8 = vadd.f32 %v7494_v62, %v4618_v26  ;;  %v5821_v37 = vpop.f32.mrb[72].mxu1  ;;  %v7909_v11 = vld [vmem:[#allocation22_spill] sm:$0xff] }
 0x17e   :  { %v4524_v9 = vmax.f32 %v7394_v53, %v5722_v19  ;;  %v3991_v59 = vpop.f32.mrb[75].mxu0  ;;  %v5482_v63 = vpack.c.bf16 %v4726_v49, %v4726_v49  ;;  %v4727_v28 = vmax.f32 %v4677_v18, 0.0  ;;  %v4573_v61 = vmax.f32 %v7396_v54, %v5821_v37  ;;  %v4388_v27 = vpop.f32.mrb[73].mxu1 }
 0x17f   :  { %v4522_v50 = vmax.f32 %v7374_v43, %v3991_v59  ;;  %v5480_v57 = vpack.c.bf16 %v4724_v47, %v4724_v47  ;;  %v4725_v52 = vmax.f32 %v4675_v8, 0.0  ;;  %v4571_v40 = vmax.f32 %v7900_v30, %v4388_v27  ;;  %v5822_v42 = vpop.f32.mrb[74].mxu1  ;;  %v7910_v47 = vld [vmem:[#allocation13_spill] sm:$0xff]  ;;  %v7912_v30 = vld [vmem:[#allocation15_spill] sm:$0xff] }
 0x180   :  { %4977 = vst.msk [vmem:[%s7849_s4 + $0x50] sm:$0xf] %vm4956_vm4, %v5482_v63  ;;  %v5483_v31 = vpack.c.bf16 %v4727_v28, %v4727_v28  ;;  %v4623_v53 = vmax.f32 %v4523_v7, %v4573_v61  ;;  %v4574_v55 = vmax.f32 %v7901_v12, %v5822_v42  ;;  %v4391_v3 = vpop.f32.mrb[75].mxu1  ;;  %v7911_v61 = vld [vmem:[#allocation24_spill] sm:$0xff] }
 0x181   :  { %4975 = vst.msk [vmem:[%s7849_s4 + $0x48] sm:$0xf] %vm4956_vm4, %v5480_v57  ;;  %v5481_v43 = vpack.c.bf16 %v4725_v52, %v4725_v52  ;;  %v4621_v54 = vmax.f32 %v4521_v58, %v4571_v40  ;;  %v4572_v29 = vmax.f32 %v7902_v41, %v4391_v3 }
 0x182   :  { %4978 = vst.msk [vmem:[%s7849_s4 + $0x54] sm:$0xf] %vm4956_vm4, %v5483_v31  ;;  %v4680_v2 = vadd.f32 %v7494_v62, %v4623_v53  ;;  %v4624_v34 = vmax.f32 %v4524_v9, %v4574_v55  ;;  %v7913_v55 = vld [vmem:[#allocation27_spill] sm:$0xff] }
 0x183   :  { %v5725_v21 = vpop.f32.mrb[76].mxu0  ;;  %4976 = vst.msk [vmem:[%s7849_s4 + $0x4c] sm:$0xf] %vm4956_vm4, %v5481_v43  ;;  %v4678_v6 = vadd.f32 %v7494_v62, %v4621_v54  ;;  %v4622_v20 = vmax.f32 %v4522_v50, %v4572_v29  ;;  %v7914_v29 = vld [vmem:[#allocation28_spill] sm:$0xff] }
 0x184   :  { %v4527_v32 = vmax.f32 %v7903_v16, %v5725_v21  ;;  %v4004_v56 = vpop.f32.mrb[77].mxu0  ;;  %v4730_v10 = vmax.f32 %v4680_v2, 0.0  ;;  %v4681_v22 = vadd.f32 %v7494_v62, %v4624_v34  ;;  %v7915_v21 = vld [vmem:[#allocation17_spill] sm:$0xff] }
 0x185   :  { %v4525_v23 = vmax.f32 %v7904_v33, %v4004_v56  ;;  %v5726_v51 = vpop.f32.mrb[78].mxu0  ;;  %v4728_v13 = vmax.f32 %v4678_v6, 0.0  ;;  %v4679_v60 = vadd.f32 %v7494_v62, %v4622_v20  ;;  %v5825_v1 = vpop.f32.mrb[76].mxu1 }
 0x186   :  { %v4528_v4 = vmax.f32 %v7905_v35, %v5726_v51  ;;  %v4007_v14 = vpop.f32.mrb[79].mxu0  ;;  %v5486_v36 = vpack.c.bf16 %v4730_v10, %v4730_v10  ;;  %v4731_v25 = vmax.f32 %v4681_v22, 0.0  ;;  %v4577_v24 = vmax.f32 %v7906_v45, %v5825_v1  ;;  %v4404_v15 = vpop.f32.mrb[77].mxu1  ;;  %v7918_v35 = vld [vmem:[#allocation21_spill] sm:$0xff] }
 0x187   :  { %v4526_v46 = vmax.f32 %v7907_v38, %v4007_v14  ;;  %v5484_v39 = vpack.c.bf16 %v4728_v13, %v4728_v13  ;;  %v4729_v5 = vmax.f32 %v4679_v60, 0.0  ;;  %v4575_v44 = vmax.f32 %v7908_v17, %v4404_v15  ;;  %v5826_v48 = vpop.f32.mrb[78].mxu1  ;;  %v7919_v15 = vld [vmem:[#allocation32_spill] sm:$0xff]  ;;  %v7920_v17 = vld [vmem:[#allocation23_spill] sm:$0xff] }
 0x188   :  { %4981 = vst.msk [vmem:[%s7849_s4 + $0x60] sm:$0xf] %vm4956_vm4, %v5486_v36  ;;  %v5487_v26 = vpack.c.bf16 %v4731_v25, %v4731_v25  ;;  %v4627_v7 = vmax.f32 %v4527_v32, %v4577_v24  ;;  %v4578_v49 = vmax.f32 %v7909_v11, %v5826_v48  ;;  %v4407_v18 = vpop.f32.mrb[79].mxu1  ;;  %v7916_v32 = vld [vmem:[#allocation18_spill] sm:$0xff] }
 0x189   :  { %4979 = vst.msk [vmem:[%s7849_s4 + $0x58] sm:$0xf] %vm4956_vm4, %v5484_v39  ;;  %v5485_v58 = vpack.c.bf16 %v4729_v5, %v4729_v5  ;;  %v4625_v19 = vmax.f32 %v4525_v23, %v4575_v44  ;;  %v4576_v8 = vmax.f32 %v7910_v47, %v4407_v18  ;;  %v7917_v23 = vld [vmem:[#allocation30_spill] sm:$0xff] }
 0x18a   :  { %4982 = vst.msk [vmem:[%s7849_s4 + $0x64] sm:$0xf] %vm4956_vm4, %v5487_v26  ;;  %v4684_v37 = vadd.f32 %v7494_v62, %v4627_v7  ;;  %v4628_v9 = vmax.f32 %v4528_v4, %v4578_v49  ;;  %v7921_v49 = vld [vmem:[#allocation35_spill] sm:$0xff] }
 0x18b   :  { %v5729_v59 = vpop.f32.mrb[80].mxu0  ;;  %4980 = vst.msk [vmem:[%s7849_s4 + $0x5c] sm:$0xf] %vm4956_vm4, %v5485_v58  ;;  %v4682_v63 = vadd.f32 %v7494_v62, %v4625_v19  ;;  %v4626_v28 = vmax.f32 %v4526_v46, %v4576_v8  ;;  %v7922_v8 = vld [vmem:[#allocation36_spill] sm:$0xff] }
 0x18c   :  { %v4531_v27 = vmax.f32 %v7911_v61, %v5729_v59  ;;  %v4020_v50 = vpop.f32.mrb[81].mxu0  ;;  %v4734_v57 = vmax.f32 %v4684_v37, 0.0  ;;  %v4685_v52 = vadd.f32 %v7494_v62, %v4628_v9  ;;  %v7923_v59 = vld [vmem:[#allocation25_spill] sm:$0xff] }
 0x18d   :  { %v4529_v40 = vmax.f32 %v7912_v30, %v4020_v50  ;;  %v5730_v42 = vpop.f32.mrb[82].mxu0  ;;  %v4732_v31 = vmax.f32 %v4682_v63, 0.0  ;;  %v4683_v53 = vadd.f32 %v7494_v62, %v4626_v28  ;;  %v5829_v12 = vpop.f32.mrb[80].mxu1 }
 0x18e   :  { %v4532_v3 = vmax.f32 %v7913_v55, %v5730_v42  ;;  %v4023_v43 = vpop.f32.mrb[83].mxu0  ;;  %v5490_v54 = vpack.c.bf16 %v4734_v57, %v4734_v57  ;;  %v4735_v41 = vmax.f32 %v4685_v52, 0.0  ;;  %v4581_v2 = vmax.f32 %v7914_v29, %v5829_v12  ;;  %v4420_v34 = vpop.f32.mrb[81].mxu1  ;;  %v7926_v55 = vld [vmem:[#allocation29_spill] sm:$0xff] }
 0x18f   :  { %v4530_v6 = vmax.f32 %v7915_v21, %v4023_v43  ;;  %v5488_v20 = vpack.c.bf16 %v4732_v31, %v4732_v31  ;;  %v4733_v16 = vmax.f32 %v4683_v53, 0.0  ;;  %v4579_v56 = vmax.f32 %v7916_v32, %v4420_v34  ;;  %v5830_v10 = vpop.f32.mrb[82].mxu1  ;;  %v7927_v34 = vld [vmem:[#allocation40_spill] sm:$0xff]  ;;  %v7928_v32 = vld [vmem:[#allocation31_spill] sm:$0xff] }
 0x190   :  { %4985 = vst.msk [vmem:[%s7849_s4 + $0x70] sm:$0xf] %vm4956_vm4, %v5490_v54  ;;  %v5491_v22 = vpack.c.bf16 %v4735_v41, %v4735_v41  ;;  %v4631_v33 = vmax.f32 %v4531_v27, %v4581_v2  ;;  %v4582_v51 = vmax.f32 %v7917_v23, %v5830_v10  ;;  %v4423_v13 = vpop.f32.mrb[83].mxu1  ;;  %v7924_v27 = vld [vmem:[#allocation26_spill] sm:$0xff] }
 0x191   :  { %4983 = vst.msk [vmem:[%s7849_s4 + $0x68] sm:$0xf] %vm4956_vm4, %v5488_v20  ;;  %v5489_v60 = vpack.c.bf16 %v4733_v16, %v4733_v16  ;;  %v4629_v1 = vmax.f32 %v4529_v40, %v4579_v56  ;;  %v4580_v4 = vmax.f32 %v7918_v35, %v4423_v13  ;;  %v7925_v40 = vld [vmem:[#allocation38_spill] sm:$0xff] }
 0x192   :  { %4986 = vst.msk [vmem:[%s7849_s4 + $0x74] sm:$0xf] %vm4956_vm4, %v5491_v22  ;;  %v4688_v14 = vadd.f32 %v7494_v62, %v4631_v33  ;;  %v4632_v36 = vmax.f32 %v4532_v3, %v4582_v51  ;;  %v7929_v51 = vld [vmem:[#allocation43_spill] sm:$0xff] }
 0x193   :  { %v5733_v25 = vpop.f32.mrb[84].mxu0  ;;  %4984 = vst.msk [vmem:[%s7849_s4 + $0x6c] sm:$0xf] %vm4956_vm4, %v5489_v60  ;;  %v4686_v45 = vadd.f32 %v7494_v62, %v4629_v1  ;;  %v4630_v24 = vmax.f32 %v4530_v6, %v4580_v4  ;;  %v7930_v4 = vld [vmem:[#allocation44_spill] sm:$0xff] }
 0x194   :  { %v4535_v38 = vmax.f32 %v7919_v15, %v5733_v25  ;;  %v4036_v46 = vpop.f32.mrb[85].mxu0  ;;  %v4738_v39 = vmax.f32 %v4688_v14, 0.0  ;;  %v4689_v5 = vadd.f32 %v7494_v62, %v4632_v36  ;;  %v7931_v25 = vld [vmem:[#allocation33_spill] sm:$0xff] }
 0x195   :  { %v4533_v44 = vmax.f32 %v7920_v17, %v4036_v46  ;;  %v5734_v48 = vpop.f32.mrb[86].mxu0  ;;  %v4736_v26 = vmax.f32 %v4686_v45, 0.0  ;;  %v4687_v7 = vadd.f32 %v7494_v62, %v4630_v24  ;;  %v5833_v11 = vpop.f32.mrb[84].mxu1 }
 0x196   :  { %v4536_v18 = vmax.f32 %v7921_v49, %v5734_v48  ;;  %v4039_v58 = vpop.f32.mrb[87].mxu0  ;;  %v5494_v19 = vpack.c.bf16 %v4738_v39, %v4738_v39  ;;  %v4739_v47 = vmax.f32 %v4689_v5, 0.0  ;;  %v4585_v37 = vmax.f32 %v7922_v8, %v5833_v11  ;;  %v4436_v9 = vpop.f32.mrb[85].mxu1  ;;  %v7934_v49 = vld [vmem:[#allocation37_spill] sm:$0xff] }
 0x197   :  { %v4534_v63 = vmax.f32 %v7923_v59, %v4039_v58  ;;  %v5492_v28 = vpack.c.bf16 %v4736_v26, %v4736_v26  ;;  %v4737_v61 = vmax.f32 %v4687_v7, 0.0  ;;  %v4583_v50 = vmax.f32 %v7924_v27, %v4436_v9  ;;  %v5834_v57 = vpop.f32.mrb[86].mxu1  ;;  %v7935_v9 = vld [vmem:[#allocation48_spill] sm:$0xff]  ;;  %v7936_v27 = vld [vmem:[#allocation39_spill] sm:$0xff] }
 0x198   :  { %4989 = vst.msk [vmem:[%s7849_s4 + $0x80] sm:$0xf] %vm4956_vm4, %v5494_v19  ;;  %v5495_v52 = vpack.c.bf16 %v4739_v47, %v4739_v47  ;;  %v4635_v30 = vmax.f32 %v4535_v38, %v4585_v37  ;;  %v4586_v42 = vmax.f32 %v7925_v40, %v5834_v57  ;;  %v4439_v31 = vpop.f32.mrb[87].mxu1  ;;  %v7932_v38 = vld [vmem:[#allocation34_spill] sm:$0xff] }
 0x199   :  { %4987 = vst.msk [vmem:[%s7849_s4 + $0x78] sm:$0xf] %vm4956_vm4, %v5492_v28  ;;  %v5493_v53 = vpack.c.bf16 %v4737_v61, %v4737_v61  ;;  %v4633_v12 = vmax.f32 %v4533_v44, %v4583_v50  ;;  %v4584_v3 = vmax.f32 %v7926_v55, %v4439_v31  ;;  %v7933_v44 = vld [vmem:[#allocation46_spill] sm:$0xff] }
 0x19a   :  { %4990 = vst.msk [vmem:[%s7849_s4 + $0x84] sm:$0xf] %vm4956_vm4, %v5495_v52  ;;  %v4692_v43 = vadd.f32 %v7494_v62, %v4635_v30  ;;  %v4636_v54 = vmax.f32 %v4536_v18, %v4586_v42  ;;  %v7937_v42 = vld [vmem:[#allocation51_spill] sm:$0xff] }
 0x19b   :  { %v5737_v41 = vpop.f32.mrb[88].mxu0  ;;  %4988 = vst.msk [vmem:[%s7849_s4 + $0x7c] sm:$0xf] %vm4956_vm4, %v5493_v53  ;;  %v4690_v29 = vadd.f32 %v7494_v62, %v4633_v12  ;;  %v4634_v2 = vmax.f32 %v4534_v63, %v4584_v3  ;;  %v7938_v3 = vld [vmem:[#allocation52_spill] sm:$0xff] }
 0x19c   :  { %v4539_v21 = vmax.f32 %v7927_v34, %v5737_v41  ;;  %v4052_v6 = vpop.f32.mrb[89].mxu0  ;;  %v4742_v20 = vmax.f32 %v4692_v43, 0.0  ;;  %v4693_v16 = vadd.f32 %v7494_v62, %v4636_v54  ;;  %v7939_v41 = vld [vmem:[#allocation41_spill] sm:$0xff] }
 0x19d   :  { %v4537_v56 = vmax.f32 %v7928_v32, %v4052_v6  ;;  %v5738_v10 = vpop.f32.mrb[90].mxu0  ;;  %v4740_v22 = vmax.f32 %v4690_v29, 0.0  ;;  %v4691_v33 = vadd.f32 %v7494_v62, %v4634_v2  ;;  %v5837_v23 = vpop.f32.mrb[88].mxu1 }
 0x19e   :  { %v4540_v13 = vmax.f32 %v7929_v51, %v5738_v10  ;;  %v4055_v60 = vpop.f32.mrb[91].mxu0  ;;  %v5498_v1 = vpack.c.bf16 %v4742_v20, %v4742_v20  ;;  %v4743_v35 = vmax.f32 %v4693_v16, 0.0  ;;  %v4589_v14 = vmax.f32 %v7930_v4, %v5837_v23  ;;  %v4452_v36 = vpop.f32.mrb[89].mxu1  ;;  %v7942_v51 = vld [vmem:[#allocation45_spill] sm:$0xff] }
 0x19f   :  { %v4538_v45 = vmax.f32 %v7931_v25, %v4055_v60  ;;  %v5496_v24 = vpack.c.bf16 %v4740_v22, %v4740_v22  ;;  %v4741_v15 = vmax.f32 %v4691_v33, 0.0  ;;  %v4587_v46 = vmax.f32 %v7932_v38, %v4452_v36  ;;  %v5838_v39 = vpop.f32.mrb[90].mxu1  ;;  %v7943_v36 = vld [vmem:[#allocation55_spill] sm:$0xff] }
 0x1a0   :  { %4993 = vst.msk [vmem:[%s7849_s4 + $0x90] sm:$0xf] %vm4956_vm4, %v5498_v1  ;;  %v5499_v5 = vpack.c.bf16 %v4743_v35, %v4743_v35  ;;  %v4639_v17 = vmax.f32 %v4539_v21, %v4589_v14  ;;  %v4590_v48 = vmax.f32 %v7933_v44, %v5838_v39  ;;  %v4455_v26 = vpop.f32.mrb[91].mxu1  ;;  %v7940_v21 = vld [vmem:[#allocation42_spill] sm:$0xff]  ;;  %v7944_v38 = vld [vmem:[#allocation47_spill] sm:$0xff] }
 0x1a1   :  { %4991 = vst.msk [vmem:[%s7849_s4 + $0x88] sm:$0xf] %vm4956_vm4, %v5496_v24  ;;  %v5497_v7 = vpack.c.bf16 %v4741_v15, %v4741_v15  ;;  %v4637_v11 = vmax.f32 %v4537_v56, %v4587_v46  ;;  %v4588_v18 = vmax.f32 %v7934_v49, %v4455_v26  ;;  %v7941_v56 = vld [vmem:[#allocation54_spill] sm:$0xff] }
 0x1a2   :  { %4994 = vst.msk [vmem:[%s7849_s4 + $0x94] sm:$0xf] %vm4956_vm4, %v5499_v5  ;;  %v4696_v58 = vadd.f32 %v7494_v62, %v4639_v17  ;;  %v4640_v19 = vmax.f32 %v4540_v13, %v4590_v48  ;;  %v7945_v48 = vld [vmem:[#allocation56_spill] sm:$0xff] }
 0x1a3   :  { %v5741_v47 = vpop.f32.mrb[92].mxu0  ;;  %4992 = vst.msk [vmem:[%s7849_s4 + $0x8c] sm:$0xf] %vm4956_vm4, %v5497_v7  ;;  %v4694_v8 = vadd.f32 %v7494_v62, %v4637_v11  ;;  %v4638_v37 = vmax.f32 %v4538_v45, %v4588_v18  ;;  %v7946_v18 = vld [vmem:[#allocation57_spill] sm:$0xff] }
 0x1a4   :  { %v4543_v59 = vmax.f32 %v7935_v9, %v5741_v47  ;;  %v4068_v63 = vpop.f32.mrb[93].mxu0  ;;  %v4746_v28 = vmax.f32 %v4696_v58, 0.0  ;;  %v4697_v61 = vadd.f32 %v7494_v62, %v4640_v19  ;;  %v7947_v47 = vld [vmem:[#allocation49_spill] sm:$0xff] }
 0x1a5   :  { %v4541_v50 = vmax.f32 %v7936_v27, %v4068_v63  ;;  %v5742_v57 = vpop.f32.mrb[94].mxu0  ;;  %v4744_v52 = vmax.f32 %v4694_v8, 0.0  ;;  %v4695_v30 = vadd.f32 %v7494_v62, %v4638_v37  ;;  %v5841_v40 = vpop.f32.mrb[92].mxu1 }
 0x1a6   :  { %v4544_v31 = vmax.f32 %v7937_v42, %v5742_v57  ;;  %v4071_v53 = vpop.f32.mrb[95].mxu0  ;;  %v5502_v12 = vpack.c.bf16 %v4746_v28, %v4746_v28  ;;  %v4747_v55 = vmax.f32 %v4697_v61, 0.0  ;;  %v4593_v43 = vmax.f32 %v7938_v3, %v5841_v40  ;;  %v4468_v54 = vpop.f32.mrb[93].mxu1  ;;  %v7949_v40 = vld [vmem:[#allocation53_spill] sm:$0xff] }
 0x1a7   :  { %v4542_v29 = vmax.f32 %v7939_v41, %v4071_v53  ;;  %v5500_v2 = vpack.c.bf16 %v4744_v52, %v4744_v52  ;;  %v4745_v34 = vmax.f32 %v4695_v30, 0.0  ;;  %v4591_v6 = vmax.f32 %v7940_v21, %v4468_v54  ;;  %v5842_v20 = vpop.f32.mrb[94].mxu1 }
 0x1a8   :  { %4997 = vst.msk [vmem:[%s7849_s4 + $0xa0] sm:$0xf] %vm4956_vm4, %v5502_v12  ;;  %v5503_v16 = vpack.c.bf16 %v4747_v55, %v4747_v55  ;;  %v4643_v32 = vmax.f32 %v4543_v59, %v4593_v43  ;;  %v4594_v10 = vmax.f32 %v7941_v56, %v5842_v20  ;;  %v4471_v22 = vpop.f32.mrb[95].mxu1  ;;  %v7948_v59 = vld [vmem:[#allocation50_spill] sm:$0xff] }
 0x1a9   :  { %4995 = vst.msk [vmem:[%s7849_s4 + $0x98] sm:$0xf] %vm4956_vm4, %v5500_v2  ;;  %v5501_v33 = vpack.c.bf16 %v4745_v34, %v4745_v34  ;;  %v4641_v23 = vmax.f32 %v4541_v50, %v4591_v6  ;;  %v4592_v13 = vmax.f32 %v7942_v51, %v4471_v22 }
 0x1aa   :  { %4998 = vst.msk [vmem:[%s7849_s4 + $0xa4] sm:$0xf] %vm4956_vm4, %v5503_v16  ;;  %v4700_v60 = vadd.f32 %v7494_v62, %v4643_v32  ;;  %v4644_v1 = vmax.f32 %v4544_v31, %v4594_v10 }
 0x1ab   :  { %v5745_v35 = vpop.f32.mrb[96].mxu0  ;;  %4996 = vst.msk [vmem:[%s7849_s4 + $0x9c] sm:$0xf] %vm4956_vm4, %v5501_v33  ;;  %v4698_v4 = vadd.f32 %v7494_v62, %v4641_v23  ;;  %v4642_v14 = vmax.f32 %v4542_v29, %v4592_v13 }
 0x1ac   :  { %v4547_v25 = vmax.f32 %v7943_v36, %v5745_v35  ;;  %v4084_v45 = vpop.f32.mrb[97].mxu0  ;;  %v4750_v24 = vmax.f32 %v4700_v60, 0.0  ;;  %v4701_v15 = vadd.f32 %v7494_v62, %v4644_v1 }
 0x1ad   :  { %v4545_v46 = vmax.f32 %v7944_v38, %v4084_v45  ;;  %v5746_v39 = vpop.f32.mrb[98].mxu0  ;;  %v4748_v5 = vmax.f32 %v4698_v4, 0.0  ;;  %v4699_v17 = vadd.f32 %v7494_v62, %v4642_v14  ;;  %v5845_v44 = vpop.f32.mrb[96].mxu1 }
 0x1ae   :  { %v4548_v26 = vmax.f32 %v7945_v48, %v5746_v39  ;;  %v4087_v7 = vpop.f32.mrb[99].mxu0  ;;  %v5506_v11 = vpack.c.bf16 %v4750_v24, %v4750_v24  ;;  %v4751_v49 = vmax.f32 %v4701_v15, 0.0  ;;  %v4597_v58 = vmax.f32 %v7946_v18, %v5845_v44  ;;  %v4484_v19 = vpop.f32.mrb[97].mxu1 }
 0x1af   :  { %v4546_v8 = vmax.f32 %v7947_v47, %v4087_v7  ;;  %v5504_v37 = vpack.c.bf16 %v4748_v5, %v4748_v5  ;;  %v4749_v9 = vmax.f32 %v4699_v17, 0.0  ;;  %v4595_v63 = vmax.f32 %v7948_v59, %v4484_v19  ;;  %v5846_v28 = vpop.f32.mrb[98].mxu1 }
 0x1b0   :  { %5001 = vst.msk [vmem:[%s7849_s4 + $0xb0] sm:$0xf] %vm4956_vm4, %v5506_v11  ;;  %v5507_v61 = vpack.c.bf16 %v4751_v49, %v4751_v49  ;;  %v4647_v27 = vmax.f32 %v4547_v25, %v4597_v58  ;;  %v4598_v50 = vmax.f32 %v7497_v0, %v5846_v28  ;;  %v4487_v57 = vpop.f32.mrb[99].mxu1 }
 0x1b1   :  { %4999 = vst.msk [vmem:[%s7849_s4 + $0xa8] sm:$0xf] %vm4956_vm4, %v5504_v37  ;;  %v5505_v52 = vpack.c.bf16 %v4749_v9, %v4749_v9  ;;  %v4645_v30 = vmax.f32 %v4545_v46, %v4595_v63  ;;  %v4596_v42 = vmax.f32 %v7949_v40, %v4487_v57 }
 0x1b2   :  { %5002 = vst.msk [vmem:[%s7849_s4 + $0xb4] sm:$0xf] %vm4956_vm4, %v5507_v61  ;;  %v4704_v31 = vadd.f32 %v7494_v62, %v4647_v27  ;;  %v4648_v53 = vmax.f32 %v4548_v26, %v4598_v50 }
 0x1b3   :  { %5000 = vst.msk [vmem:[%s7849_s4 + $0xac] sm:$0xf] %vm4956_vm4, %v5505_v52  ;;  %v4702_v0 = vadd.f32 %v7494_v62, %v4645_v30  ;;  %v4646_v12 = vmax.f32 %v4546_v8, %v4596_v42 }
 0x1b4   :  { %v4754_v55 = vmax.f32 %v4704_v31, 0.0  ;;  %v4705_v3 = vadd.f32 %v7494_v62, %v4648_v53 }
 0x1b5   :  { %v4752_v43 = vmax.f32 %v4702_v0, 0.0  ;;  %v4703_v54 = vadd.f32 %v7494_v62, %v4646_v12 }
 0x1b6   :  { %v5510_v41 = vpack.c.bf16 %v4754_v55, %v4754_v55  ;;  %v4755_v29 = vmax.f32 %v4705_v3, 0.0 }
 0x1b7   :  { %v5508_v2 = vpack.c.bf16 %v4752_v43, %v4752_v43  ;;  %v4753_v34 = vmax.f32 %v4703_v54, 0.0 }
 0x1b8   :  { %5005 = vst.msk [vmem:[%s7849_s4 + $0xc0] sm:$0xf] %vm4956_vm4, %v5510_v41  ;;  %v5511_v21 = vpack.c.bf16 %v4755_v29, %v4755_v29 }
 0x1b9   :  { %5003 = vst.msk [vmem:[%s7849_s4 + $0xb8] sm:$0xf] %vm4956_vm4, %v5508_v2  ;;  %v5509_v6 = vpack.c.bf16 %v4753_v34, %v4753_v34 }
 0x1ba   :  { %5006 = vst.msk [vmem:[%s7849_s4 + $0xc4] sm:$0xf] %vm4956_vm4, %v5511_v21 }
 0x1bb   :  { %5004 = vst.msk [vmem:[%s7849_s4 + $0xbc] sm:$0xf] %vm4956_vm4, %v5509_v6 }

// kernel: four_class_classifier_forward.5
= control target key start
LH: loop header
LB: loop body
LE: loop exit
PB: predicated region body
PF: predicated region fallthrough
CT: control target
= control target key end

     0   :  { %s3922_s0 = inlined_call_operand.vmem [shape: bf16[150,16], index: 0, kind: input, shape index: {}]   ;;  %s3923_s1 = inlined_call_operand.vmem [shape: f32[1,16], index: 1, kind: input, shape index: {}]   ;;  %s3924_s2 = inlined_call_operand.vmem [shape: bf16[400,120], index: 2, kind: input, shape index: {}]   ;;  %s3925_s3 = inlined_call_operand.vmem [shape: f32[1,120], index: 3, kind: input, shape index: {}]   ;;  %s3926_s4 = inlined_call_operand.vmem [shape: bf16[120,100], index: 4, kind: input, shape index: {}]   ;;  %s3927_s5 = inlined_call_operand.vmem [shape: f32[1,100], index: 5, kind: input, shape index: {}]   ;;  %s3928_s6 = inlined_call_operand.vmem [shape: bf16[100,4], index: 6, kind: input, shape index: {}]   ;;  %s3929_s7 = inlined_call_operand.vmem [shape: f32[1,4], index: 7, kind: input, shape index: {}]   ;;  %s3930_s8 = inlined_call_operand.vmem [shape: bf16[4,50,150], index: 8, kind: input, shape index: {}]   ;;  %s3931_s9 = inlined_call_operand.<no memory space> [shape: bf16[], index: 9, kind: input, shape index: {}]   ;;  %s3932_s10 = inlined_call_operand.hbm [shape: f32[2,4], index: 10, kind: output, shape index: {}]  }
   0x1   :  { %v15_v0 = vstv %s3931_s9 }
   0x2   :  { %v3248_v1 = vunpack.i.l.bf16 %v15_v0 }
   0x3   :  { %v3056_v2 = vld [vmem:[%s3922_s0] sm:$0xff]   ;;  %v64_v3 = vlaneseq  ;;  %v3178_v5 = vmov 0   ;;  %v3057_v6 = vld [vmem:[%s3922_s0 + $0x8] sm:$0xff]   ;;  %v3058_v9 = vld [vmem:[%s3922_s0 + $0x10] sm:$0xff]   ;;  %v3179_v34 = vmov 0.0   ;;  %vm1474_vm2 = vcmask 179200  }
   0x4   :  { %v3255_v4 = vpack.c.bf16 %v3248_v1, %v3248_v1  ;;  %1527 = vmatprep.subr.bf16.mxu0 %v3178_v5  ;;  %v3059_v11 = vld [vmem:[%s3922_s0 + $0x18] sm:$0xff]   ;;  %v2787_v12 = vld [vmem:[%s3930_s8 + $0x2c] sm:$0xff]   ;;  %v39_v13 = vld [vmem:[%s3930_s8] sm:$0xf]  ;;  %vm1523_vm3 = vcmask 1042432  }
   0x5   :  { %1528 = vmatpush1.bf16.msra.mxu0 %v3056_v2  ;;  %v65_v7 = vand.u32 127, %v64_v3  ;;  %v3268_v10 = vshrl.u32 %v64_v3, 7  ;;  %v2777_v14 = vld [vmem:[%s3930_s8 + $0x4] ss:$8 sps:$4 sm:$0xff]   ;;  %v2778_v15 = vld [vmem:[%s3930_s8 + $0x8] sm:$0xf]  ;;  %v255_v16 = vunpack.c.l.bf16 %v2787_v12  ;;  %v282_v29 = vunpack.c.h.bf16 %v2787_v12 }
   0x6   :  { %1529 = vmatprep.subr.bf16.mxu0 %v3178_v5  ;;  %54 = vst [vmem:[#allocation11] sm:$0xf] %v39_v13  ;;  %v57_v17 = vunpack.c.l.bf16 %v2777_v14  ;;  %90 = vst [vmem:[#allocation11 + $0x8] sm:$0xf] %v2778_v15  ;;  %v93_v18 = vunpack.c.h.bf16 %v2777_v14  ;;  %v2780_v19 = vld [vmem:[%s3930_s8 + $0x10] sm:$0xf] }
   0x7   :  { %v3262_v8 = vadd.s32 128, %v65_v7  ;;  %v2781_v20 = vld [vmem:[%s3930_s8 + $0x14] ss:$8 sps:$4 sm:$0xff]   ;;  %v3294_v21 = vadd.s32 48, %v3268_v10  ;;  %v3060_v22 = vld [vmem:[%s3922_s0 + $0x20] sm:$0xff]   ;;  %v3061_v60 = vld [vmem:[%s3922_s0 + $0x28] sm:$0xff]  }
   0x8   :  { %126 = vst [vmem:[#allocation11 + $0x10] sm:$0xf] %v2780_v19  ;;  %v129_v23 = vunpack.c.l.bf16 %v2781_v20  ;;  %v2782_v24 = vld [vmem:[%s3930_s8 + $0x18] sm:$0xf]  ;;  %v165_v25 = vunpack.c.h.bf16 %v2781_v20  ;;  %v2784_v26 = vld [vmem:[%s3930_s8 + $0x20] sm:$0xf] }
   0x9   :  { %1530 = vmatpush1.bf16.msra.mxu0 %v3057_v6  ;;  %vm67_vm0 = vcmp.lt.s32.totalorder %v3262_v8, 150  ;;  %v2785_v27 = vld [vmem:[%s3930_s8 + $0x24] ss:$16 sps:$4 sm:$0xff]   ;;  %162 = vst [vmem:[#allocation11 + $0x18] sm:$0xf] %v2782_v24  ;;  %vm287_vm1 = vcmp.lt.s32.totalorder %v3294_v21, 50 }
   0xa   :  { %1531 = vmatprep.subr.bf16.mxu0 %v3178_v5  ;;  %v266_v28 = vsel %vm67_vm0, %v255_v16, %v3248_v1  ;;  %v68_v30 = vsel %vm67_vm0, %v57_v17, %v3248_v1  ;;  %v104_v31 = vsel %vm67_vm0, %v93_v18, %v3248_v1  ;;  %198 = vst [vmem:[#allocation11 + $0x20] sm:$0xf] %v2784_v26  ;;  %v201_v32 = vunpack.c.l.bf16 %v2785_v27  ;;  %v2786_v33 = vld [vmem:[%s3930_s8 + $0x28] sm:$0xf]  ;;  %v2790_v36 = vld [vmem:[%s3930_s8 + $0x38] sm:$0xf] }
   0xb   :  { %v268_v35 = vpack.c.bf16 %v3179_v34, %v266_v28  ;;  %v2791_v37 = vld [vmem:[%s3930_s8 + $0x3c] ss:$8 sps:$4 sm:$0xff]   ;;  %v70_v38 = vpack.c.bf16 %v3179_v34, %v68_v30  ;;  %v106_v39 = vpack.c.bf16 %v3179_v34, %v104_v31  ;;  %v140_v40 = vsel %vm67_vm0, %v129_v23, %v3248_v1  ;;  %243 = vst [vmem:[#allocation11 + $0x28] sm:$0xf] %v2786_v33  ;;  %v2792_v42 = vld [vmem:[%s3930_s8 + $0x40] sm:$0xf] }
   0xc   :  { %v176_v41 = vsel %vm67_vm0, %v165_v25, %v3248_v1  ;;  %350 = vst [vmem:[#allocation11 + $0x40] sm:$0xf] %v2790_v36  ;;  %v2794_v43 = vld [vmem:[%s3930_s8 + $0x48] sm:$0xf]  ;;  %v3344_v44 = vld [vmem:[%s3930_s8 + $0x4c] ss:$8 sps:$4 sm:$0xff]   ;;  %v142_v45 = vpack.c.bf16 %v3179_v34, %v140_v40  ;;  %v212_v47 = vsel %vm67_vm0, %v201_v32, %v3248_v1  ;;  %v288_v51 = vsel %vm287_vm1, %v282_v29, %v3248_v1 }
   0xd   :  { %1532 = vmatpush1.bf16.msra.mxu0 %v3058_v9  ;;  %v178_v46 = vpack.c.bf16 %v3179_v34, %v176_v41  ;;  %270 = vst [vmem:[#allocation11 + $0x2c] sm:$0xf] %v268_v35  ;;  %386 = vst [vmem:[#allocation11 + $0x48] sm:$0xf] %v2792_v42  ;;  %v2796_v48 = vld [vmem:[%s3930_s8 + $0x50] sm:$0xf]  ;;  %v214_v50 = vpack.c.bf16 %v3179_v34, %v212_v47  ;;  %v309_v52 = vunpack.c.h.bf16 %v2785_v27  ;;  %v353_v56 = vunpack.c.l.bf16 %v2791_v37 }
   0xe   :  { %1533 = vmatprep.subr.bf16.mxu0 %v3178_v5  ;;  %422 = vst [vmem:[#allocation11 + $0x50] sm:$0xf] %v2794_v43  ;;  %v2798_v49 = vld [vmem:[%s3930_s8 + $0x58] sm:$0xf]  ;;  %72 = vst [vmem:[#allocation11 + $0x4] sm:$0xf] %v70_v38  ;;  %v295_v55 = vpack.c.bf16 %v3179_v34, %v288_v51  ;;  %v389_v57 = vunpack.c.h.bf16 %v2791_v37  ;;  %v425_v62 = vunpack.c.l.bf16 %v3344_v44  ;;  %v461_v63 = vunpack.c.h.bf16 %v3344_v44 }
   0xf   :  { %108 = vst [vmem:[#allocation11 + $0xc] sm:$0xf] %v106_v39  ;;  %458 = vst [vmem:[#allocation11 + $0x58] sm:$0xf] %v2796_v48  ;;  %v3366_v53 = vld [vmem:[%s3930_s8 + $0x5c] ss:$16 sps:$4 sm:$0xff]   ;;  %v315_v61 = vsel %vm287_vm1, %v309_v52, %v3248_v1  ;;  %v364_v7 = vsel %vm67_vm0, %v353_v56, %v3248_v1 }
  0x10   :  { %494 = vst [vmem:[#allocation11 + $0x60] sm:$0xf] %v2798_v49  ;;  %v2800_v54 = vld [vmem:[%s3930_s8 + $0x60] sm:$0xf]  ;;  %144 = vst [vmem:[#allocation11 + $0x14] sm:$0xf] %v142_v45  ;;  %v497_v0 = vunpack.c.l.bf16 %v3366_v53  ;;  %v320_v6 = vsel %vm67_vm0, %v315_v61, %v3248_v1  ;;  %v400_v9 = vsel %vm67_vm0, %v389_v57, %v3248_v1  ;;  %v366_v16 = vpack.c.bf16 %v3179_v34, %v364_v7 }
  0x11   :  { %1534 = vmatpush1.bf16.msra.mxu0 %v3059_v11  ;;  %180 = vst [vmem:[#allocation11 + $0x1c] sm:$0xf] %v178_v46  ;;  %539 = vst [vmem:[#allocation11 + $0x68] sm:$0xf] %v2800_v54  ;;  %v2804_v58 = vld [vmem:[%s3930_s8 + $0x70] sm:$0xf]  ;;  %v322_v15 = vpack.c.bf16 %v3179_v34, %v320_v6  ;;  %v402_v17 = vpack.c.bf16 %v3179_v34, %v400_v9  ;;  %v436_v18 = vsel %vm67_vm0, %v425_v62, %v3248_v1 }
  0x12   :  { %1535 = vmatprep.subr.bf16.mxu0 %v3178_v5  ;;  %v2806_v59 = vld [vmem:[%s3930_s8 + $0x78] sm:$0xf]  ;;  %216 = vst [vmem:[#allocation11 + $0x24] sm:$0xf] %v214_v50  ;;  %646 = vst [vmem:[#allocation11 + $0x80] sm:$0xf] %v2804_v58  ;;  %v438_v23 = vpack.c.bf16 %v3179_v34, %v436_v18  ;;  %v472_v24 = vsel %vm67_vm0, %v461_v63, %v3248_v1  ;;  %v508_v25 = vsel %vm67_vm0, %v497_v0, %v3248_v1 }
  0x13   :  { %682 = vst [vmem:[#allocation11 + $0x88] sm:$0xf] %v2806_v59  ;;  %v2808_v2 = vld [vmem:[%s3930_s8 + $0x80] sm:$0xf]  ;;  %v2810_v3 = vld [vmem:[%s3930_s8 + $0x88] sm:$0xf]  ;;  %v474_v29 = vpack.c.bf16 %v3179_v34, %v472_v24  ;;  %v510_v30 = vpack.c.bf16 %v3179_v34, %v508_v25  ;;  %v605_v36 = vunpack.c.h.bf16 %v3366_v53 }
  0x14   :  { %297 = vst [vmem:[#allocation11 + $0x30] sm:$0xf] %v295_v55  ;;  %v2801_v11 = vld [vmem:[%s3930_s8 + $0x64] sm:$0xff]   ;;  %718 = vst [vmem:[#allocation11 + $0x90] sm:$0xf] %v2808_v2  ;;  %v3062_v14 = vld [vmem:[%s3922_s0 + $0x30] sm:$0xff]  }
  0x15   :  { %1536 = vmatpush1.bf16.msra.mxu0 %v3060_v22  ;;  %754 = vst [vmem:[#allocation11 + $0x98] sm:$0xf] %v2810_v3  ;;  %v2812_v12 = vld [vmem:[%s3930_s8 + $0x90] sm:$0xf]  ;;  %v2814_v13 = vld [vmem:[%s3930_s8 + $0x98] sm:$0xf]  ;;  %v551_v31 = vunpack.c.l.bf16 %v2801_v11  ;;  %v578_v32 = vunpack.c.h.bf16 %v2801_v11  ;;  %v611_v48 = vsel %vm287_vm1, %v605_v36, %v3248_v1 }
  0x16   :  { %1537 = vmatprep.subr.bf16.mxu0 %v3178_v5  ;;  %v2805_v19 = vld [vmem:[%s3930_s8 + $0x74] ss:$8 sps:$4 sm:$0xff]   ;;  %v2809_v20 = vld [vmem:[%s3930_s8 + $0x84] ss:$8 sps:$4 sm:$0xff]   ;;  %790 = vst [vmem:[#allocation11 + $0xa0] sm:$0xf] %v2812_v12  ;;  %v616_v51 = vsel %vm67_vm0, %v611_v48, %v3248_v1 }
  0x17   :  { %835 = vst [vmem:[#allocation11 + $0xa8] sm:$0xf] %v2814_v13  ;;  %v2818_v22 = vld [vmem:[%s3930_s8 + $0xa8] sm:$0xf]  ;;  %v3440_v26 = vld [vmem:[%s3930_s8 + $0x94] ss:$16 sps:$4 sm:$0xff]   ;;  %v649_v37 = vunpack.c.l.bf16 %v2805_v19  ;;  %v685_v38 = vunpack.c.h.bf16 %v2805_v19  ;;  %v721_v39 = vunpack.c.l.bf16 %v2809_v20  ;;  %v562_v42 = vsel %vm67_vm0, %v551_v31, %v3248_v1 }
  0x18   :  { %942 = vst [vmem:[#allocation11 + $0xc0] sm:$0xf] %v2818_v22  ;;  %v2820_v27 = vld [vmem:[%s3930_s8 + $0xb0] sm:$0xf]  ;;  %v2822_v28 = vld [vmem:[%s3930_s8 + $0xb8] sm:$0xf]  ;;  %v584_v43 = vsel %vm287_vm1, %v578_v32, %v3248_v1  ;;  %v757_v44 = vunpack.c.h.bf16 %v2809_v20  ;;  %v793_v45 = vunpack.c.l.bf16 %v3440_v26  ;;  %v564_v46 = vpack.c.bf16 %v3179_v34, %v562_v42 }
  0x19   :  { %1538 = vmatpush1.bf16.msra.mxu0 %v3061_v60  ;;  %324 = vst [vmem:[#allocation11 + $0x34] sm:$0xf] %v322_v15  ;;  %368 = vst [vmem:[#allocation11 + $0x44] sm:$0xf] %v366_v16  ;;  %v2824_v33 = vld [vmem:[%s3930_s8 + $0xc0] sm:$0xf]  ;;  %v591_v47 = vpack.c.bf16 %v3179_v34, %v584_v43  ;;  %v660_v49 = vsel %vm67_vm0, %v649_v37, %v3248_v1  ;;  %v696_v53 = vsel %vm67_vm0, %v685_v38, %v3248_v1 }
  0x1a   :  { %404 = vst [vmem:[#allocation11 + $0x4c] sm:$0xf] %v402_v17  ;;  %978 = vst [vmem:[#allocation11 + $0xc8] sm:$0xf] %v2820_v27  ;;  %v2826_v35 = vld [vmem:[%s3930_s8 + $0xc8] sm:$0xf]  ;;  %1539 = vmatprep.subr.bf16.mxu0 %v3178_v5  ;;  %v662_v52 = vpack.c.bf16 %v3179_v34, %v660_v49  ;;  %v618_v56 = vpack.c.bf16 %v3179_v34, %v616_v51  ;;  %v698_v57 = vpack.c.bf16 %v3179_v34, %v696_v53 }
  0x1b   :  { %1014 = vst [vmem:[#allocation11 + $0xd0] sm:$0xf] %v2822_v28  ;;  %440 = vst [vmem:[#allocation11 + $0x54] sm:$0xf] %v438_v23  ;;  %v2815_v40 = vld [vmem:[%s3930_s8 + $0x9c] sm:$0xff]   ;;  %v732_v58 = vsel %vm67_vm0, %v721_v39, %v3248_v1  ;;  %v768_v59 = vsel %vm67_vm0, %v757_v44, %v3248_v1  ;;  %v804_v0 = vsel %vm67_vm0, %v793_v45, %v3248_v1  ;;  %v901_v9 = vunpack.c.h.bf16 %v3440_v26  ;;  %v2829_v20 = vld [vmem:[%s3930_s8 + $0xd4] sm:$0xff]  }
  0x1c   :  { %1050 = vst [vmem:[#allocation11 + $0xd8] sm:$0xf] %v2824_v33  ;;  %1086 = vst [vmem:[#allocation11 + $0xe0] sm:$0xf] %v2826_v35  ;;  %v3068_v41 = vld [vmem:[#allocation11 + $0x4] ss:$8 sps:$4 sm:$0xff]   ;;  %v847_v54 = vunpack.c.l.bf16 %v2815_v40  ;;  %v734_v62 = vpack.c.bf16 %v3179_v34, %v732_v58  ;;  %v770_v63 = vpack.c.bf16 %v3179_v34, %v768_v59  ;;  %v806_v3 = vpack.c.bf16 %v3179_v34, %v804_v0 }
  0x1d   :  { %476 = vst [vmem:[#allocation11 + $0x5c] sm:$0xf] %v474_v29  ;;  %512 = vst [vmem:[#allocation11 + $0x64] sm:$0xf] %v510_v30  ;;  %1540 = vmatpush1.bf16.msra.mxu0 %v3062_v14  ;;  %v3063_v50 = vld [vmem:[%s3922_s0 + $0x38] sm:$0xff]   ;;  %2874 = vmatprep.mubr.msk.bf16.mxu0 %vm1474_vm2, %v3068_v41  ;;  %v874_v7 = vunpack.c.h.bf16 %v2815_v40  ;;  %v3064_v11 = vld [vmem:[%s3922_s0 + $0x40] sm:$0xff]   ;;  %v907_v16 = vsel %vm287_vm1, %v901_v9, %v3248_v1  ;;  %v1143_v33 = vunpack.c.l.bf16 %v2829_v20  ;;  %v1170_v37 = vunpack.c.h.bf16 %v2829_v20 }
  0x1e   :  { %v2819_v55 = vld [vmem:[%s3930_s8 + $0xac] ss:$8 sps:$4 sm:$0xff]   ;;  %1541 = vmatprep.subr.bf16.mxu0 %v3178_v5  ;;  %566 = vst [vmem:[#allocation11 + $0x6c] sm:$0xf] %v564_v46  ;;  %593 = vst [vmem:[#allocation11 + $0x70] sm:$0xf] %v591_v47  ;;  %v858_v2 = vsel %vm67_vm0, %v847_v54, %v3248_v1  ;;  %v912_v23 = vsel %vm67_vm0, %v907_v16, %v3248_v1 }
  0x1f   :  { %v2823_v60 = vld [vmem:[%s3930_s8 + $0xbc] ss:$8 sps:$4 sm:$0xff]   ;;  %v2828_v61 = vld [vmem:[%s3930_s8 + $0xd0] sm:$0xf]  ;;  %664 = vst [vmem:[#allocation11 + $0x84] sm:$0xf] %v662_v52  ;;  %v860_v6 = vpack.c.bf16 %v3179_v34, %v858_v2  ;;  %v945_v13 = vunpack.c.l.bf16 %v2819_v55  ;;  %v981_v14 = vunpack.c.h.bf16 %v2819_v55  ;;  %v880_v15 = vsel %vm287_vm1, %v874_v7, %v3248_v1 }
  0x20   :  { %1131 = vst [vmem:[#allocation11 + $0xe8] sm:$0xf] %v2828_v61  ;;  %620 = vst [vmem:[#allocation11 + $0x74] sm:$0xf] %v618_v56  ;;  %v1017_v17 = vunpack.c.l.bf16 %v2823_v60  ;;  %v1053_v18 = vunpack.c.h.bf16 %v2823_v60  ;;  %v2827_v19 = vld [vmem:[%s3930_s8 + $0xcc] ss:$16 sps:$4 sm:$0xff]   ;;  %v887_v22 = vpack.c.bf16 %v3179_v34, %v880_v15  ;;  %v914_v26 = vpack.c.bf16 %v3179_v34, %v912_v23 }
  0x21   :  { %700 = vst [vmem:[#allocation11 + $0x8c] sm:$0xf] %v698_v57  ;;  %1542 = vmatpush1.bf16.msra.mxu0 %v3063_v50  ;;  %v3065_v12 = vld [vmem:[%s3922_s0 + $0x48] ss:$0 sps:$4 sm:$0x77]   ;;  %v956_v24 = vsel %vm67_vm0, %v945_v13, %v3248_v1  ;;  %v992_v25 = vsel %vm67_vm0, %v981_v14, %v3248_v1  ;;  %v1089_v32 = vunpack.c.l.bf16 %v2827_v19  ;;  %v1197_v38 = vunpack.c.h.bf16 %v2827_v19  ;;  %v1228_v21 = vld [vmem:[#allocation11 + $0x30] sm:$0xff] }
  0x22   :  { %736 = vst [vmem:[#allocation11 + $0x94] sm:$0xf] %v734_v62  ;;  %772 = vst [vmem:[#allocation11 + $0x9c] sm:$0xf] %v770_v63  ;;  %1543 = vmatprep.subr.bf16.mxu0 %v3178_v5  ;;  %v958_v27 = vpack.c.bf16 %v3179_v34, %v956_v24  ;;  %v994_v28 = vpack.c.bf16 %v3179_v34, %v992_v25  ;;  %v1028_v29 = vsel %vm67_vm0, %v1017_v17, %v3248_v1  ;;  %v3066_v41 = vld [vmem:[#allocation11] ss:$8 sps:$4 sm:$0xff]  }
  0x23   :  { %808 = vst [vmem:[#allocation11 + $0xa4] sm:$0xf] %v806_v3  ;;  %862 = vst [vmem:[#allocation11 + $0xac] sm:$0xf] %v860_v6  ;;  %v1030_v30 = vpack.c.bf16 %v3179_v34, %v1028_v29  ;;  %v1064_v31 = vsel %vm67_vm0, %v1053_v18, %v3248_v1  ;;  %v1525_v35 = vsel %vm1523_vm3, %v3065_v12, 0  ;;  %v1100_v39 = vsel %vm67_vm0, %v1089_v32, %v3248_v1 }
  0x24   :  { %889 = vst [vmem:[#allocation11 + $0xb0] sm:$0xf] %v887_v22  ;;  %916 = vst [vmem:[#allocation11 + $0xb4] sm:$0xf] %v914_v26  ;;  %v1066_v36 = vpack.c.bf16 %v3179_v34, %v1064_v31  ;;  %v1154_v40 = vsel %vm67_vm0, %v1143_v33, %v3248_v1  ;;  %v1102_v42 = vpack.c.bf16 %v3179_v34, %v1100_v39  ;;  %v3069_v44 = vld [vmem:[#allocation11 + $0x14] ss:$8 sps:$4 sm:$0xff]  }
  0x25   :  { %1544 = vmatpush1.bf16.msra.mxu0 %v3064_v11  ;;  %960 = vst [vmem:[#allocation11 + $0xc4] sm:$0xf] %v958_v27  ;;  %996 = vst [vmem:[#allocation11 + $0xcc] sm:$0xf] %v994_v28  ;;  %v1156_v43 = vpack.c.bf16 %v3179_v34, %v1154_v40  ;;  %v1176_v45 = vsel %vm287_vm1, %v1170_v37, %v3248_v1  ;;  %v1203_v46 = vsel %vm287_vm1, %v1197_v38, %v3248_v1  ;;  %v3071_v50 = vld [vmem:[#allocation11 + $0x10] ss:$8 sps:$4 sm:$0xff]  }
  0x26   :  { %1545 = vmatprep.subr.bf16.mxu0 %v3178_v5  ;;  %1032 = vst [vmem:[#allocation11 + $0xd4] sm:$0xf] %v1030_v30  ;;  %1068 = vst [vmem:[#allocation11 + $0xdc] sm:$0xf] %v1066_v36  ;;  %v1183_v47 = vpack.c.bf16 %v3179_v34, %v1176_v45  ;;  %v1208_v48 = vsel %vm67_vm0, %v1203_v46, %v3248_v1  ;;  %v3072_v51 = vld [vmem:[#allocation11 + $0x24] ss:$8 sps:$4 sm:$0xff]   ;;  %v2839_v53 = vcombine.high %v1228_v21, %v3255_v4 }
  0x27   :  { %1104 = vst [vmem:[#allocation11 + $0xe4] sm:$0xf] %v1102_v42  ;;  %1158 = vst [vmem:[#allocation11 + $0xec] sm:$0xf] %v1156_v43  ;;  %v1210_v49 = vpack.c.bf16 %v3179_v34, %v1208_v48  ;;  %v3074_v52 = vld [vmem:[#allocation11 + $0x20] ss:$8 sps:$4 sm:$0xff]   ;;  %v2838_v8 = vcombine.low %v1228_v21, %v3255_v4 }
  0x28   :  { %1185 = vst [vmem:[#allocation11 + $0xf0] sm:$0xf] %v1183_v47  ;;  %v3075_v1 = vld [vmem:[#allocation11 + $0x44] ss:$8 sps:$4 sm:$0xff]  }
  0x29   :  { %1546 = vmatpush1.bf16.msra.mxu0 %v1525_v35  ;;  %1212 = vst [vmem:[#allocation11 + $0xf4] sm:$0xf] %v1210_v49 }
  0x2c   :  { %1560 = vmatmul.mubr.bf16.vlgmr.msra.gmra.mrb[0].mxu0 %v3066_v41 }
  0x2d   :  { %2875 = vmatprep.mubr.msk.bf16.mxu0 %vm1474_vm2, %v3069_v44 }
  0x34   :  { %1568 = vmatmul.mubr.bf16.gmra.mrb[4].mxu0 %v3071_v50 }
  0x35   :  { %2876 = vmatprep.mubr.msk.bf16.mxu0 %vm1474_vm2, %v3072_v51 }
  0x3c   :  { %1576 = vmatmul.mubr.bf16.gmra.mrb[8].mxu0 %v3074_v52 }
  0x3d   :  { %2877 = vmatprep.mubr.msk.bf16.mxu0 %vm1474_vm2, %v2839_v53 }
  0x44   :  { %1584 = vmatmul.mubr.bf16.gmra.mrb[12].mxu0 %v2838_v8 }
  0x45   :  { %2878 = vmatprep.mubr.msk.bf16.mxu0 %vm1474_vm2, %v3075_v1 }
  0x46   :  { %20 = vsyncpa [#allocation10], 0  ;;  %v3077_v54 = vld [vmem:[#allocation11 + $0x40] ss:$8 sps:$4 sm:$0xff]   ;;  %v3078_v55 = vld [vmem:[#allocation11 + $0x54] ss:$8 sps:$4 sm:$0xff]  }
  0x47   :  { %v3080_v56 = vld [vmem:[#allocation11 + $0x50] ss:$8 sps:$4 sm:$0xff]   ;;  %v3081_v57 = vld [vmem:[#allocation11 + $0x64] ss:$8 sps:$4 sm:$0xff]   ;;  %v3083_v59 = vld [vmem:[#allocation11 + $0x60] ss:$8 sps:$4 sm:$0xff]  }
  0x48   :  { %v1236_v58 = vld [vmem:[#allocation11 + $0x70] sm:$0xff]  ;;  %v3084_v62 = vld [vmem:[#allocation11 + $0x84] ss:$8 sps:$4 sm:$0xff]   ;;  %v3086_v63 = vld [vmem:[#allocation11 + $0x80] ss:$8 sps:$4 sm:$0xff]   ;;  %vm1739_vm4 = vcmask 130048  }
  0x49   :  { %v2847_v60 = vcombine.high %v1236_v58, %v3255_v4  ;;  %v2846_v61 = vcombine.low %v1236_v58, %v3255_v4  ;;  %v3087_v0 = vld [vmem:[#allocation11 + $0x94] ss:$8 sps:$4 sm:$0xff]   ;;  %v3089_v2 = vld [vmem:[#allocation11 + $0x90] ss:$8 sps:$4 sm:$0xff]   ;;  %v3090_v3 = vld [vmem:[#allocation11 + $0xa4] ss:$8 sps:$4 sm:$0xff]  }
  0x4a   :  { %v1244_v6 = vld [vmem:[#allocation11 + $0xb0] sm:$0xff]  ;;  %v3092_v7 = vld [vmem:[#allocation11 + $0xa0] ss:$8 sps:$4 sm:$0xff]   ;;  %v3093_v12 = vld [vmem:[#allocation11 + $0xc4] ss:$8 sps:$4 sm:$0xff]   ;;  %vm1745_vm5 = vcmask 122880  }
  0x4b   :  { %v2855_v9 = vcombine.high %v1244_v6, %v3255_v4  ;;  %v2854_v11 = vcombine.low %v1244_v6, %v3255_v4  ;;  %v3095_v13 = vld [vmem:[#allocation11 + $0xc0] ss:$8 sps:$4 sm:$0xff]   ;;  %v3096_v14 = vld [vmem:[#allocation11 + $0xd4] ss:$8 sps:$4 sm:$0xff]   ;;  %v3098_v15 = vld [vmem:[#allocation11 + $0xd0] ss:$8 sps:$4 sm:$0xff]  }
  0x4c   :  { %1592 = vmatmul.mubr.bf16.gmra.mrb[16].mxu0 %v3077_v54  ;;  %v3099_v16 = vld [vmem:[#allocation11 + $0xe4] ss:$8 sps:$4 sm:$0xff]   ;;  %v1252_v17 = vld [vmem:[#allocation11 + $0xf0] sm:$0xff]  ;;  %v3101_v18 = vld [vmem:[#allocation11 + $0xe0] ss:$8 sps:$4 sm:$0xff]   ;;  %s3182_s30 = smov 16  }
  0x4d   :  { %2879 = vmatprep.mubr.msk.bf16.mxu0 %vm1474_vm2, %v3078_v55  ;;  %v2863_v19 = vcombine.high %v1252_v17, %v3255_v4  ;;  %v2862_v20 = vcombine.low %v1252_v17, %v3255_v4  ;;  %s3183_s11 = smov 64   ;;  %s3184_s12 = smov 48   ;;  %vm1767_vm6 = vcmask 254080   ;;  %vm1789_vm7 = vcmask 385280  }
  0x4e   :  { %s3185_s13 = smov 96   ;;  %s3186_s14 = smov 80   ;;  %vm1812_vm8 = vcmask 516480   ;;  %vm1834_vm9 = vcmask 647680   ;;  %vm1857_vm10 = vcmask 778880   ;;  %vm1880_vm11 = vcmask 910080  }
  0x4f   :  { %s3187_s9 = smov 112   ;;  %vm1904_vm12 = vcmask 1041280   ;;  %vm2608_vm13 = vcmask 1043456   ;;  %vm3188_vm14 = vmmov 0   ;;  %vm2604_vm15 = vcmask 982016  }
  0x50   :  { %vm2717_vm0 = vcmask 1041408   ;;  %vm2713_vm1 = vcmask 818176  }
  0x54   :  { %1600 = vmatmul.mubr.bf16.gmra.mrb[20].mxu0 %v3080_v56 }
  0x55   :  { %2880 = vmatprep.mubr.msk.bf16.mxu0 %vm1474_vm2, %v3081_v57 }
  0x5c   :  { %1608 = vmatmul.mubr.bf16.gmra.mrb[24].mxu0 %v3083_v59 }
  0x5d   :  { %2881 = vmatprep.mubr.msk.bf16.mxu0 %vm1474_vm2, %v2847_v60 }
  0x64   :  { %1616 = vmatmul.mubr.bf16.gmra.mrb[28].mxu0 %v2846_v61 }
  0x65   :  { %2882 = vmatprep.mubr.msk.bf16.mxu0 %vm1474_vm2, %v3084_v62 }
  0x6c   :  { %1624 = vmatmul.mubr.bf16.gmra.mrb[32].mxu0 %v3086_v63 }
  0x6d   :  { %2883 = vmatprep.mubr.msk.bf16.mxu0 %vm1474_vm2, %v3087_v0 }
  0x74   :  { %1632 = vmatmul.mubr.bf16.gmra.mrb[36].mxu0 %v3089_v2 }
  0x75   :  { %2884 = vmatprep.mubr.msk.bf16.mxu0 %vm1474_vm2, %v3090_v3 }
  0x7c   :  { %1640 = vmatmul.mubr.bf16.gmra.mrb[40].mxu0 %v3092_v7 }
  0x7d   :  { %2885 = vmatprep.mubr.msk.bf16.mxu0 %vm1474_vm2, %v2855_v9 }
  0x84   :  { %1648 = vmatmul.mubr.bf16.gmra.mrb[44].mxu0 %v2854_v11 }
  0x85   :  { %2886 = vmatprep.mubr.msk.bf16.mxu0 %vm1474_vm2, %v3093_v12 }
  0x8c   :  { %1656 = vmatmul.mubr.bf16.gmra.mrb[48].mxu0 %v3095_v13 }
  0x8d   :  { %2887 = vmatprep.mubr.msk.bf16.mxu0 %vm1474_vm2, %v3096_v14 }
  0x94   :  { %1664 = vmatmul.mubr.bf16.gmra.mrb[52].mxu0 %v3098_v15 }
  0x95   :  { %2888 = vmatprep.mubr.msk.bf16.mxu0 %vm1474_vm2, %v3099_v16 }
  0x9c   :  { %1672 = vmatmul.mubr.bf16.gmra.mrb[56].mxu0 %v3101_v18 }
  0x9d   :  { %2889 = vmatprep.mubr.msk.bf16.mxu0 %vm1474_vm2, %v2863_v19  ;;  %v3640_v19 = vld [vmem:[%s3923_s1] ss:$0 sm:$0xff]  ;;  %s3181_s1 = smov 32   ;;  %vm2761_vm2 = vcmask 25600  }
  0xa4   :  { %1680 = vmatmul.mubr.bf16.gmra.mrb[60].mxu0 %v2862_v20 }
  0xff   :  { %v1561_v22 = vpop.f32.mrb[0].mxu0 }
 0x100   :  { %v1563_v23 = vpop.f32.mrb[1].mxu0 }
 0x101   :  { %v3600_v24 = vpop.f32.mrb[2].mxu0 }
 0x102   :  { %v1566_v25 = vpop.f32.mrb[3].mxu0 }
 0x107   :  { %v3602_v26 = vpop.f32.mrb[4].mxu0 }
 0x108   :  { %v1571_v27 = vpop.f32.mrb[5].mxu0 }
 0x109   :  { %v3604_v28 = vpop.f32.mrb[6].mxu0 }
 0x10a   :  { %v1574_v29 = vpop.f32.mrb[7].mxu0 }
 0x10b   :  { %v3180_v29 = vmov 1966171168  }
 0x10f   :  { %v3606_v30 = vpop.f32.mrb[8].mxu0 }
 0x110   :  { %v1579_v31 = vpop.f32.mrb[9].mxu0 }
 0x111   :  { %v3608_v32 = vpop.f32.mrb[10].mxu0  ;;  %v1758_v31 = vunpack.c.l.s4 %v3180_v29 }
 0x112   :  { %v1582_v33 = vpop.f32.mrb[11].mxu0 }
 0x117   :  { %v3610_v35 = vpop.f32.mrb[12].mxu0 }
 0x118   :  { %v1587_v4 = vpop.f32.mrb[13].mxu0 }
 0x119   :  { %v3612_v36 = vpop.f32.mrb[14].mxu0 }
 0x11a   :  { %v1590_v37 = vpop.f32.mrb[15].mxu0 }
 0x11f   :  { %v1593_v38 = vpop.f32.mrb[16].mxu0 }
 0x120   :  { %v1688_v39 = vmax.f32 %v1561_v22, %v1593_v38  ;;  %v1595_v40 = vpop.f32.mrb[17].mxu0 }
 0x121   :  { %v1596_v41 = vpop.f32.mrb[18].mxu0 }
 0x122   :  { %v1689_v42 = vmax.f32 %v3600_v24, %v1596_v41  ;;  %v1598_v43 = vpop.f32.mrb[19].mxu0 }
 0x127   :  { %v1601_v44 = vpop.f32.mrb[20].mxu0 }
 0x128   :  { %v1690_v45 = vmax.f32 %v3602_v26, %v1601_v44  ;;  %v1603_v46 = vpop.f32.mrb[21].mxu0 }
 0x129   :  { %v1604_v47 = vpop.f32.mrb[22].mxu0  ;;  %v1759_v46 = vunpack.c.0.s8 %v1758_v31 }
 0x12a   :  { %v1691_v48 = vmax.f32 %v3604_v28, %v1604_v47  ;;  %v1606_v49 = vpop.f32.mrb[23].mxu0 }
 0x12f   :  { %v3617_v50 = vpop.f32.mrb[24].mxu0 }
 0x130   :  { %v1692_v51 = vmax.f32 %v3606_v30, %v3617_v50  ;;  %v1611_v21 = vpop.f32.mrb[25].mxu0 }
 0x131   :  { %v3621_v52 = vpop.f32.mrb[26].mxu0 }
 0x132   :  { %v1693_v53 = vmax.f32 %v3608_v32, %v3621_v52  ;;  %v1614_v1 = vpop.f32.mrb[27].mxu0 }
 0x133   :  { %v3648_v1 = vsub.s32 %v1759_v46, %v3268_v10 }
 0x137   :  { %v3625_v8 = vpop.f32.mrb[28].mxu0 }
 0x138   :  { %v1694_v54 = vmax.f32 %v3610_v35, %v3625_v8  ;;  %v1619_v55 = vpop.f32.mrb[29].mxu0 }
 0x139   :  { %v3629_v56 = vpop.f32.mrb[30].mxu0 }
 0x13a   :  { %v1695_v57 = vmax.f32 %v3612_v36, %v3629_v56  ;;  %v1622_v58 = vpop.f32.mrb[31].mxu0 }
 0x13f   :  { %v1625_v59 = vpop.f32.mrb[32].mxu0 }
 0x140   :  { %v1627_v60 = vpop.f32.mrb[33].mxu0 }
 0x141   :  { %v1628_v61 = vpop.f32.mrb[34].mxu0 }
 0x142   :  { %v1630_v62 = vpop.f32.mrb[35].mxu0 }
 0x147   :  { %v1633_v63 = vpop.f32.mrb[36].mxu0 }
 0x148   :  { %v1635_v0 = vpop.f32.mrb[37].mxu0 }
 0x149   :  { %v1636_v2 = vpop.f32.mrb[38].mxu0 }
 0x14a   :  { %v1638_v3 = vpop.f32.mrb[39].mxu0 }
 0x14f   :  { %v1641_v6 = vpop.f32.mrb[40].mxu0 }
 0x150   :  { %v1643_v7 = vpop.f32.mrb[41].mxu0 }
 0x151   :  { %v1644_v9 = vpop.f32.mrb[42].mxu0 }
 0x152   :  { %v1646_v11 = vpop.f32.mrb[43].mxu0 }
 0x157   :  { %v3633_v12 = vpop.f32.mrb[44].mxu0 }
 0x158   :  { %v1651_v13 = vpop.f32.mrb[45].mxu0 }
 0x159   :  { %v3635_v14 = vpop.f32.mrb[46].mxu0 }
 0x15a   :  { %v1654_v15 = vpop.f32.mrb[47].mxu0 }
 0x15f   :  { %v1657_v16 = vpop.f32.mrb[48].mxu0 }
 0x160   :  { %v1696_v17 = vmax.f32 %v1625_v59, %v1657_v16  ;;  %v1659_v18 = vpop.f32.mrb[49].mxu0 }
 0x161   :  { %v1660_v20 = vpop.f32.mrb[50].mxu0 }
 0x162   :  { %v1704_v22 = vmax.f32 %v1688_v39, %v1696_v17  ;;  %v1697_v23 = vmax.f32 %v1628_v61, %v1660_v20  ;;  %v1662_v24 = vpop.f32.mrb[51].mxu0 }
 0x164   :  { %v1719_v25 = vadd.f32 %v3640_v19, %v1704_v22  ;;  %v1705_v26 = vmax.f32 %v1689_v42, %v1697_v23 }
 0x166   :  { %v1720_v27 = vadd.f32 %v3640_v19, %v1705_v26  ;;  %v1727_v33 = vmax.f32 %v1719_v25, 0.0 }
 0x167   :  { %v1665_v28 = vpop.f32.mrb[52].mxu0 }
 0x168   :  { %v1728_v4 = vmax.f32 %v1720_v27, 0.0  ;;  %v1698_v37 = vmax.f32 %v1633_v63, %v1665_v28  ;;  %v1667_v38 = vpop.f32.mrb[53].mxu0 }
 0x169   :  { %v1668_v40 = vpop.f32.mrb[54].mxu0 }
 0x16a   :  { %v1735_v41 = vpack.c.bf16 %v1728_v4, %v1727_v33  ;;  %v1706_v43 = vmax.f32 %v1690_v45, %v1698_v37  ;;  %v1699_v44 = vmax.f32 %v1636_v2, %v1668_v40  ;;  %v1670_v39 = vpop.f32.mrb[55].mxu0 }
 0x16c   :  { %1740 = vst.msk [vmem:[#allocation2] sm:$0xff] %vm1739_vm4, %v1735_v41  ;;  %v1721_v42 = vadd.f32 %v3640_v19, %v1706_v43  ;;  %v1707_v47 = vmax.f32 %v1691_v48, %v1699_v44 }
 0x16e   :  { %v1722_v49 = vadd.f32 %v3640_v19, %v1707_v47  ;;  %v1729_v55 = vmax.f32 %v1721_v42, 0.0 }
 0x16f   :  { %v1673_v21 = vpop.f32.mrb[56].mxu0 }
 0x170   :  { %v1730_v58 = vmax.f32 %v1722_v49, 0.0  ;;  %v1700_v59 = vmax.f32 %v1641_v6, %v1673_v21  ;;  %v1675_v60 = vpop.f32.mrb[57].mxu0 }
 0x171   :  { %v1676_v61 = vpop.f32.mrb[58].mxu0 }
 0x172   :  { %v1736_v45 = vpack.c.bf16 %v1730_v58, %v1729_v55  ;;  %v1708_v62 = vmax.f32 %v1692_v51, %v1700_v59  ;;  %v1701_v63 = vmax.f32 %v1644_v9, %v1676_v61  ;;  %v1678_v0 = vpop.f32.mrb[59].mxu0  ;;  %v3115_v55 = vld [vmem:[%s3924_s2] sm:$0xff]  }
 0x173   :  { %v2892_v2 = vld.sshfl [vmem:[#allocation2] sm:$0x2 pattern:$0x75316420]  ;;  %v1744_v23 = vld [vmem:[#allocation2] sm:$0x1] }
 0x174   :  { %1741 = vst.msk [vmem:[#allocation2 + $0x8] sm:$0xff] %vm1739_vm4, %v1736_v45  ;;  %v1723_v48 = vadd.f32 %v3640_v19, %v1708_v62  ;;  %v1709_v10 = vmax.f32 %v1693_v53, %v1701_v63  ;;  %v1784_v3 = vrot.slane %v2892_v2, %v3648_v1  ;;  %v2891_v6 = vld.sshfl [vmem:[#allocation2] sm:$0x10 pattern:$0x75316420] }
 0x175   :  { %v1756_v7 = vcombine.high %v2891_v6, %v2891_v6  ;;  %v3102_v11 = vld [vmem:[#allocation2 + $0x4] ss:$0 sps:$4 sm:$0x11]   ;;  %1746 = vst.msk [vmem:[#allocation3] sm:$0x1] %vm1745_vm5, %v1744_v23  ;;  %v3120_v23 = vld [vmem:[%s3924_s2 + $0x58] sm:$0xff]  }
 0x176   :  { %v3103_v13 = vld [vmem:[#allocation2 + $0x4] ss:$0 sps:$4 sm:$0x44]   ;;  %v1731_v15 = vmax.f32 %v1723_v48, 0.0  ;;  %v1724_v30 = vadd.f32 %v3640_v19, %v1709_v10  ;;  %v1785_v50 = vcombine.high %v1784_v3, %v1784_v3  ;;  %v1823_v17 = vrot.slane %v3102_v11, %v3648_v1  ;;  %v3116_v11 = vld [vmem:[%s3924_s2 + $0x48] sm:$0xff]  }
 0x177   :  { %v2893_v51 = vld.sshfl [vmem:[#allocation2] sm:$0x20 pattern:$0x75316420]  ;;  %v1681_v9 = vpop.f32.mrb[60].mxu0  ;;  %v1763_v16 = vrot.slane %v1756_v7, %v3648_v1  ;;  %v1868_v32 = vrot.slane %v3103_v13, %v3648_v1 }
 0x178   :  { %v1800_v18 = vcombine.high %v2893_v51, %v2893_v51  ;;  %v3104_v52 = vld [vmem:[#allocation2 + $0x4] ss:$0 sps:$4 sm:$0x22]   ;;  %v1732_v53 = vmax.f32 %v1724_v30, 0.0  ;;  %v1702_v20 = vmax.f32 %v3633_v12, %v1681_v9  ;;  %1786 = vrot.lane.b32.xlu1 %v1785_v50, %s3181_s1  ;;  %v1683_v22 = vpop.f32.mrb[61].mxu0  ;;  %v1830_v25 = vrot.slane %v1823_v17, %v3648_v1  ;;  %v3118_v50 = vld [vmem:[%s3924_s2 + $0x50] sm:$0xff]  }
 0x179   :  { %1764 = vrot.lane.b32.xlu0 %v1763_v16, %s3182_s30  ;;  %v1684_v24 = vpop.f32.mrb[62].mxu0  ;;  %v1845_v27 = vrot.slane %v3104_v52, %v3648_v1  ;;  %v3105_v28 = vld [vmem:[#allocation2 + $0x4] ss:$0 sps:$4 sm:$0x88]   ;;  %v1875_v33 = vrot.slane %v1868_v32, %v3648_v1 }
 0x17a   :  { %v1807_v26 = vrot.slane %v1800_v18, %v3648_v1  ;;  %v1737_v29 = vpack.c.bf16 %v1732_v53, %v1731_v15  ;;  %v1710_v12 = vmax.f32 %v1694_v54, %v1702_v20  ;;  %v1703_v31 = vmax.f32 %v3635_v14, %v1684_v24  ;;  %v1686_v4 = vpop.f32.mrb[63].mxu0  ;;  %v3117_v15 = vld [vmem:[%s3924_s2 + $0x8] sm:$0xff]   ;;  %v3119_v20 = vld [vmem:[%s3924_s2 + $0x10] sm:$0xff]  }
 0x17b   :  { %v1846_v38 = vcombine.high %v1845_v27, %v1845_v27  ;;  %v1891_v40 = vrot.slane %v3105_v28, %v3648_v1  ;;  %v2896_v41 = vld.sshfl [vmem:[#allocation2 + $0x8] sm:$0x20 pattern:$0x75316420]  ;;  %v1876_v39 = vcombine.high %v1875_v33, %v1875_v33  ;;  %v1906_v21 = vld [vmem:[#allocation2 + $0x8] sm:$0x1] }
 0x17c   :  { %v1808_v37 = vcombine.high %v1807_v26, %v1807_v26  ;;  %1742 = vst.msk [vmem:[#allocation2 + $0x10] sm:$0xff] %vm1739_vm4, %v1737_v29  ;;  %v1725_v43 = vadd.f32 %v3640_v19, %v1710_v12  ;;  %v1711_v44 = vmax.f32 %v1695_v57, %v1703_v31  ;;  %1831 = vrot.lane.b32.xlu1 %v1830_v25, %s3183_s11  ;;  %v3106_v8 = vld [vmem:[#allocation2 + $0xc] ss:$0 sps:$4 sm:$0x22]   ;;  %v3121_v4 = vld [vmem:[%s3924_s2 + $0x18] sm:$0xff]  }
 0x17d   :  { %v1959_v35 = vcombine.high %v2896_v41, %v2896_v41  ;;  %v1892_v54 = vcombine.high %v1891_v40, %v1891_v40  ;;  %v2002_v42 = vrot.slane %v3106_v8, %v3648_v1  ;;  %v1853_v47 = vrot.slane %v1846_v38, %v3648_v1  ;;  %v2894_v56 = vld.sshfl [vmem:[#allocation2 + $0x8] sm:$0x10 pattern:$0x75316420]  ;;  %1907 = vst.msk [vmem:[#allocation3 + $0x1] sm:$0x1] %vm1745_vm5, %v1906_v21 }
 0x17e   :  { %1809 = vrot.lane.b32.xlu0 %v1808_v37, %s3184_s12  ;;  %v1726_v14 = vadd.f32 %v3640_v19, %v1711_v44  ;;  %v1733_v57 = vmax.f32 %v1725_v43, 0.0  ;;  %v3114_v19 = vld [vmem:[%s3924_s2 + $0x40] sm:$0xff]   ;;  %v1917_v45 = vcombine.high %v2894_v56, %v2894_v56  ;;  %v2895_v63 = vld.sshfl [vmem:[#allocation2 + $0x8] sm:$0x2 pattern:$0x75316420] }
 0x17f   :  { %v1966_v46 = vrot.slane %v1959_v35, %v3648_v1  ;;  %v1899_v36 = vrot.slane %v1892_v54, %v3648_v1  ;;  %v2003_v60 = vcombine.high %v2002_v42, %v2002_v42  ;;  %2967 = vmatprep.subr.bf16.mxu1 %v3114_v19  ;;  %v3107_v0 = vld [vmem:[#allocation2 + $0xc] ss:$0 sps:$4 sm:$0x11]   ;;  %v1944_v6 = vrot.slane %v2895_v63, %v3648_v1  ;;  %v3122_v37 = vld [vmem:[%s3924_s2 + $0x60] sm:$0xff]  }
 0x180   :  { %v1734_v49 = vmax.f32 %v1726_v14, 0.0  ;;  %1877 = vrot.lane.b32.xlu1 %v1876_v39, %s3185_s13  ;;  %2968 = vmatpush3.bf16.msra.mxu1 %v3115_v55  ;;  %v1924_v3 = vrot.slane %v1917_v45, %v3648_v1  ;;  %v3108_v7 = vld [vmem:[#allocation2 + $0xc] ss:$0 sps:$4 sm:$0x44]   ;;  %v1981_v32 = vrot.slane %v3107_v0, %v3648_v1  ;;  %v3123_v54 = vld [vmem:[%s3924_s2 + $0x20] sm:$0xff]   ;;  %v3127_v55 = vld [vmem:[%s3924_s2 + $0x30] sm:$0xff]  }
 0x181   :  { %v1967_v59 = vcombine.high %v1966_v46, %v1966_v46  ;;  %v1900_v61 = vcombine.high %v1899_v36, %v1899_v36  ;;  %v2010_v2 = vrot.slane %v2003_v60, %v3648_v1  ;;  %v3112_v30 = vld [vmem:[#allocation2 + $0xc] ss:$0 sps:$4 sm:$0x88]   ;;  %2969 = vmatprep.subr.bf16.mxu1 %v3116_v11  ;;  %v1945_v18 = vcombine.high %v1944_v6, %v1944_v6  ;;  %v3129_v60 = vld [vmem:[%s3924_s2 + $0x38] sm:$0xff]  }
 0x182   :  { %1854 = vrot.lane.b32.xlu0 %v1853_v47, %s3186_s14  ;;  %v1738_v58 = vpack.c.bf16 %v1734_v49, %v1733_v57  ;;  %v2024_v52 = vrot.slane %v3108_v7, %v3648_v1  ;;  %v2046_v28 = vrot.slane %v3112_v30, %v3648_v1  ;;  %v1988_v29 = vrot.slane %v1981_v32, %v3648_v1  ;;  %v3124_v14 = vld [vmem:[%s3924_s2 + $0x68] sm:$0xff]   ;;  %v3126_v57 = vld [vmem:[%s3924_s2 + $0x70] sm:$0xff]  }
 0x183   :  { %v2897_v62 = vld.sshfl [vmem:[#allocation2 + $0x10] sm:$0x10 pattern:$0x75316420]  ;;  %v2060_v13 = vld [vmem:[#allocation2 + $0x10] sm:$0x1] }
 0x184   :  { %1743 = vst.msk [vmem:[#allocation2 + $0x18] sm:$0xff] %vm1739_vm4, %v1738_v58  ;;  %1968 = vrot.lane.b32.xlu1 %v1967_v59, %s3184_s12  ;;  %v2071_v48 = vcombine.high %v2897_v62, %v2897_v62  ;;  %v2898_v10 = vld.sshfl [vmem:[#allocation2 + $0x10] sm:$0x2 pattern:$0x75316420]  ;;  %2970 = vmatpush3.bf16.msra.mxu1 %v3117_v15  ;;  %v2031_v12 = vrot.slane %v2024_v52, %v3648_v1  ;;  %v3125_v56 = vld [vmem:[%s3924_s2 + $0x28] sm:$0xff]  }
 0x185   :  { %2061 = vst.msk [vmem:[#allocation3 + $0x2] sm:$0x1] %vm1745_vm5, %v2060_v13  ;;  %v2098_v9 = vrot.slane %v2898_v10, %v3648_v1  ;;  %v3109_v16 = vld [vmem:[#allocation2 + $0x14] ss:$0 sps:$4 sm:$0x11]   ;;  %2971 = vmatprep.subr.bf16.mxu1 %v3118_v50  ;;  %v2047_v41 = vcombine.high %v2046_v28, %v2046_v28  ;;  %v3128_v58 = vld [vmem:[%s3924_s2 + $0x78] sm:$0xff]  }
 0x186   :  { %1901 = vrot.lane.b32.xlu0 %v1900_v61, %s3187_s9  ;;  %v2078_v51 = vrot.slane %v2071_v48, %v3648_v1  ;;  %v3110_v17 = vld [vmem:[#allocation2 + $0x14] ss:$0 sps:$4 sm:$0x44]   ;;  %v2135_v25 = vrot.slane %v3109_v16, %v3648_v1  ;;  %v2032_v43 = vcombine.high %v2031_v12, %v2031_v12  ;;  %v3138_v12 = vld [vmem:[%s3924_s2 + $0xc0] sm:$0xff]  }
 0x187   :  { %v2899_v22 = vld.sshfl [vmem:[#allocation2 + $0x10] sm:$0x20 pattern:$0x75316420]  ;;  %v2099_v24 = vcombine.high %v2098_v9, %v2098_v9  ;;  %v2178_v26 = vrot.slane %v3110_v17, %v3648_v1  ;;  %v2054_v46 = vrot.slane %v2047_v41, %v3648_v1 }
 0x188   :  { %2011 = vrot.lane.b32.xlu1 %v2010_v2, %s3186_s14  ;;  %v3111_v27 = vld [vmem:[#allocation2 + $0x14] ss:$0 sps:$4 sm:$0x22]   ;;  %v2113_v31 = vcombine.high %v2899_v22, %v2899_v22  ;;  %2972 = vmatpush3.bf16.msra.mxu1 %v3119_v20  ;;  %v2142_v38 = vrot.slane %v2135_v25, %v3648_v1  ;;  %v3130_v20 = vld [vmem:[%s3924_s2 + $0x80] sm:$0xff]  }
 0x189   :  { %v3113_v33 = vld [vmem:[#allocation2 + $0x14] ss:$0 sps:$4 sm:$0x88]   ;;  %2973 = vmatprep.subr.bf16.mxu1 %v3120_v23  ;;  %v2185_v40 = vrot.slane %v2178_v26, %v3648_v1  ;;  %v2156_v35 = vrot.slane %v3111_v27, %v3648_v1  ;;  %v2055_v49 = vcombine.high %v2054_v46, %v2054_v46  ;;  %v3134_v26 = vld [vmem:[%s3924_s2 + $0xa0] sm:$0xff]   ;;  %v3135_v27 = vld [vmem:[%s3924_s2 + $0xa8] sm:$0xff]  }
 0x18a   :  { %1925 = vrot.lane.b32.xlu0 %v1924_v3, %s3182_s30  ;;  %v2120_v44 = vrot.slane %v2113_v31, %v3648_v1  ;;  %v2200_v8 = vrot.slane %v3113_v33, %v3648_v1  ;;  %v3132_v25 = vld [vmem:[%s3924_s2 + $0x90] sm:$0xff]   ;;  %v3139_v33 = vld [vmem:[%s3926_s4] sm:$0xff]  }
 0x18b   :  { %v2214_v53 = vld [vmem:[#allocation2 + $0x18] sm:$0x1]  ;;  %v2186_v39 = vcombine.high %v2185_v40, %v2185_v40  ;;  %v2157_v47 = vcombine.high %v2156_v35, %v2156_v35  ;;  %v3136_v28 = vld [vmem:[%s3924_s2 + $0xb0] sm:$0xff]   ;;  %v3144_v40 = vld [vmem:[%s3926_s4 + $0x28] sm:$0xff]  }
 0x18c   :  { %2079 = vrot.lane.b32.xlu1 %v2078_v51, %s3182_s30  ;;  %2215 = vst.msk [vmem:[#allocation3 + $0x3] sm:$0x1] %vm1745_vm5, %v2214_v53  ;;  %2974 = vmatpush3.bf16.msra.mxu1 %v3121_v4  ;;  %v2121_v42 = vcombine.high %v2120_v44, %v2120_v44  ;;  %v2201_v36 = vcombine.high %v2200_v8, %v2200_v8  ;;  %v3140_v4 = vld [vmem:[%s3926_s4 + $0x8] sm:$0xff]   ;;  %v3145_v41 = vld [vmem:[%s3926_s4 + $0x30] sm:$0xff]   ;;  %v2900_v46 = vld [vmem:[%s3925_s3] ss:$0 sm:$0xff] }
 0x18d   :  { %2975 = vmatprep.subr.bf16.mxu1 %v3122_v37  ;;  %v2164_v21 = vrot.slane %v2157_v47, %v3648_v1  ;;  %v3142_v37 = vld [vmem:[%s3926_s4 + $0x18] sm:$0xff]  }
 0x18e   :  { %1946 = vrot.lane.b32.xlu0 %v1945_v18, %s3181_s1  ;;  %v2208_v19 = vrot.slane %v2201_v36, %v3648_v1 }
 0x190   :  { %2100 = vrot.lane.b32.xlu1 %v2099_v24, %s3181_s1  ;;  %2976 = vmatpush3.bf16.msra.mxu1 %v3123_v54  ;;  %v2209_v59 = vcombine.high %v2208_v19, %v2208_v19  ;;  %v3131_v24 = vld [vmem:[%s3924_s2 + $0x88] sm:$0xff]   ;;  %v3147_v19 = vld [vmem:[%s3928_s6] sm:$0xff]  }
 0x191   :  { %2977 = vmatprep.subr.bf16.mxu1 %v3124_v14 }
 0x192   :  { %1989 = vrot.lane.b32.xlu0 %v1988_v29, %s3183_s11  ;;  %v3137_v29 = vld [vmem:[%s3924_s2 + $0xb8] sm:$0xff]  }
 0x194   :  { %2143 = vrot.lane.b32.xlu1 %v2142_v38, %s3183_s11  ;;  %2978 = vmatpush3.bf16.msra.mxu1 %v3125_v56  ;;  %v3143_v38 = vld [vmem:[%s3926_s4 + $0x20] sm:$0xff]  }
 0x195   :  { %2979 = vmatprep.subr.bf16.mxu1 %v3126_v57 }
 0x196   :  { %2033 = vrot.lane.b32.xlu0 %v2032_v43, %s3185_s13  ;;  %v3146_v43 = vld [vmem:[%s3926_s4 + $0x38] ss:$0 sps:$4 sm:$0xff]  }
 0x197   :  { %v2610_v44 = vsel %vm2608_vm13, %v3146_v43, 0 }
 0x198   :  { %2187 = vrot.lane.b32.xlu1 %v2186_v39, %s3185_s13  ;;  %2980 = vmatpush3.bf16.msra.mxu1 %v3127_v55 }
 0x199   :  { %2981 = vmatprep.subr.bf16.mxu1 %v3128_v58  ;;  %v3148_v58 = vld [vmem:[%s3928_s6 + $0x8] sm:$0xff]  }
 0x19a   :  { %2122 = vrot.lane.b32.xlu0 %v2121_v42, %s3184_s12 }
 0x19c   :  { %2056 = vrot.lane.b32.xlu1 %v2055_v49, %s3187_s9  ;;  %2982 = vmatpush3.bf16.msra.mxu1 %v3129_v60  ;;  %v3150_v60 = vld [vmem:[%s3928_s6 + $0x18] sm:$0xff]  }
 0x19d   :  { %2495 = vmatprep.subr.bf16.mxu1 %v3178_v5 }
 0x19e   :  { %2165 = vrot.lane.b32.xlu0 %v2164_v21, %s3186_s14 }
 0x1a2   :  { %2210 = vrot.lane.b32.xlu0 %v2209_v59, %s3187_s9  ;;  %v3149_v59 = vld [vmem:[%s3928_s6 + $0x10] sm:$0xff]  }
 0x1ea   :  { %v1787_v61 = vpop.permute.xlu1 %1786 }
 0x1eb   :  { %v1765_v45 = vpop.permute.xlu0 %1764 }
 0x1ec   :  { %1768 = vst.msk [vmem:[#allocation3] sm:$0x1] %vm1767_vm6, %v1765_v45  ;;  %v3152_v45 = vld [vmem:[%s3928_s6 + $0x28] sm:$0xff]  }
 0x1ed   :  { %1790 = vst.msk [vmem:[#allocation3] sm:$0x1] %vm1789_vm7, %v1787_v61  ;;  %v3151_v61 = vld [vmem:[%s3928_s6 + $0x20] sm:$0xff]  }
 0x1ee   :  { %v1832_v62 = vpop.permute.xlu1 %1831 }
 0x1f0   :  { %v1810_v63 = vpop.permute.xlu0 %1809 }
 0x1f1   :  { %1813 = vst.msk [vmem:[#allocation3] sm:$0x1] %vm1812_vm8, %v1810_v63 }
 0x1f2   :  { %1835 = vst.msk [vmem:[#allocation3] sm:$0x1] %vm1834_vm9, %v1832_v62  ;;  %v1878_v0 = vpop.permute.xlu1 %1877  ;;  %v3153_v62 = vld [vmem:[%s3928_s6 + $0x30] ss:$0 sps:$4 sm:$0x33]   ;;  %s3189_s6 = smov [#allocation9]  }
 0x1f3   :  { %v2719_v63 = vsel %vm2717_vm0, %v3153_v62, 0  ;;  %s2769_s25 = sshll.u32 %s3189_s6, 4  ;;  %s2770_s25 = int_to_ptr.vmem [resolvable:$true] %s2769_s25 }
 0x1f4   :  { %v1855_v2 = vpop.permute.xlu0 %1854  ;;  %p3159_p1 = scmp.lt.s32.totalorder %s2770_s25, %s2770_s25 }
 0x1f5   :  { %1858 = vst.msk [vmem:[#allocation3] sm:$0x1] %vm1857_vm10, %v1855_v2 }
 0x1f6   :  { %1881 = vst.msk [vmem:[#allocation3] sm:$0x1] %vm1880_vm11, %v1878_v0  ;;  %v1969_v48 = vpop.permute.xlu1 %1968  ;;  %v2928_v0 = vld [vmem:[%s3927_s5] ss:$0 sm:$0xff]  ;;  %s3154_s5 = scalar_lea.vmem %s2770_s25, 32 }
 0x1f7   :  { %p3155_p0 = scmp.ne.s32.totalorder %s2770_s25, %s3154_s5  ;;  %p3160_p2 = scmp.lt.s32.totalorder %s3154_s5, %s3154_s5 }
 0x1f8   :  { %v1902_v10 = vpop.permute.xlu0 %1901 }
 0x1f9   :  { %1905 = vst.msk [vmem:[#allocation3] sm:$0x1] %vm1904_vm12, %v1902_v10  ;;  %p3161_p3 = por %p3160_p2, %p3159_p1 }
 0x1fa   :  { %v2012_v3 = vpop.permute.xlu1 %2011 }
 0x1fb   :  { %p3162_p4 = pnand %p3161_p3, %p3155_p0 }
 0x1fc   :  { %v1926_v6 = vpop.permute.xlu0 %1925 }
 0x1fd   :  { %1928 = vst.msk [vmem:[#allocation3 + $0x1] sm:$0x1] %vm1767_vm6, %v1926_v6 }
 0x1fe   :  { %v2080_v7 = vpop.permute.xlu1 %2079 }
 0x1ff   :  { %2082 = vst.msk [vmem:[#allocation3 + $0x2] sm:$0x1] %vm1767_vm6, %v2080_v7 }
 0x200   :  { %v1947_v11 = vpop.permute.xlu0 %1946 }
 0x201   :  { %1949 = vst.msk [vmem:[#allocation3 + $0x1] sm:$0x1] %vm1789_vm7, %v1947_v11 }
 0x202   :  { %1971 = vst.msk [vmem:[#allocation3 + $0x1] sm:$0x1] %vm1812_vm8, %v1969_v48  ;;  %v2101_v13 = vpop.permute.xlu1 %2100 }
 0x203   :  { %2103 = vst.msk [vmem:[#allocation3 + $0x2] sm:$0x1] %vm1789_vm7, %v2101_v13 }
 0x204   :  { %v1990_v15 = vpop.permute.xlu0 %1989 }
 0x205   :  { %1992 = vst.msk [vmem:[#allocation3 + $0x1] sm:$0x1] %vm1834_vm9, %v1990_v15 }
 0x206   :  { %2014 = vst.msk [vmem:[#allocation3 + $0x1] sm:$0x1] %vm1857_vm10, %v2012_v3  ;;  %v2144_v30 = vpop.permute.xlu1 %2143 }
 0x208   :  { %v2034_v50 = vpop.permute.xlu0 %2033 }
 0x209   :  { %2036 = vst.msk [vmem:[#allocation3 + $0x1] sm:$0x1] %vm1880_vm11, %v2034_v50 }
 0x20a   :  { %v2188_v51 = vpop.permute.xlu1 %2187 }
 0x20c   :  { %v2123_v9 = vpop.permute.xlu0 %2122 }
 0x20d   :  { %2125 = vst.msk [vmem:[#allocation3 + $0x2] sm:$0x1] %vm1812_vm8, %v2123_v9 }
 0x20e   :  { %2146 = vst.msk [vmem:[#allocation3 + $0x2] sm:$0x1] %vm1834_vm9, %v2144_v30  ;;  %v2057_v16 = vpop.permute.xlu1 %2056 }
 0x20f   :  { %2059 = vst.msk [vmem:[#allocation3 + $0x1] sm:$0x1] %vm1904_vm12, %v2057_v16 }
 0x210   :  { %v2166_v17 = vpop.permute.xlu0 %2165 }
 0x211   :  { %2168 = vst.msk [vmem:[#allocation3 + $0x2] sm:$0x1] %vm1857_vm10, %v2166_v17 }
 0x212   :  { %2190 = vst.msk [vmem:[#allocation3 + $0x2] sm:$0x1] %vm1880_vm11, %v2188_v51 }
 0x214   :  { %v2211_v18 = vpop.permute.xlu0 %2210 }
 0x215   :  { %2213 = vst.msk [vmem:[#allocation3 + $0x2] sm:$0x1] %vm1904_vm12, %v2211_v18 }
 0x21c   :  { %v2901_v32 = vld.sshfl [vmem:[#allocation3] sm:$0x33 pattern:$0x75316420] }
 0x21d   :  { %v2282_v52 = vcombine.high %v2901_v32, %v2901_v32  ;;  %v2289_v22 = vrot.slane %v2901_v32, %v3648_v1 }
 0x21f   :  { %v2296_v53 = vrot.slane %v2282_v52, %v3648_v1  ;;  %v3133_v1 = vld [vmem:[%s3924_s2 + $0x98] sm:$0xff]   ;;  %v2297_v31 = vcombine.high %v2289_v22, %v2289_v22 }
 0x221   :  { %v2298_v23 = vcombine.high %v2296_v53, %v2296_v53  ;;  %2487 = vmatprep.mubr.bf16.mxu1 %v2296_v53 }
 0x222   :  { %2488 = vmatmul.mubr.bf16.vlgmr.msra.gmra.mrb[0].mxu1 %v2289_v22 }
 0x223   :  { %2496 = vmatpush1.bf16.msra.mxu1 %v3130_v20  ;;  %2927 = vmatprep.mubr.msk.bf16.mxu1 %vm1739_vm4, %v2298_v23 }
 0x224   :  { %2497 = vmatprep.subr.bf16.mxu1 %v3178_v5 }
 0x227   :  { %2498 = vmatpush1.bf16.msra.mxu1 %v3131_v24 }
 0x228   :  { %2499 = vmatprep.subr.bf16.mxu1 %v3178_v5 }
 0x22b   :  { %2500 = vmatpush1.bf16.msra.mxu1 %v3132_v25 }
 0x22c   :  { %2501 = vmatprep.subr.bf16.mxu1 %v3178_v5 }
 0x22f   :  { %2502 = vmatpush1.bf16.msra.mxu1 %v3133_v1 }
 0x230   :  { %2503 = vmatprep.subr.bf16.mxu1 %v3178_v5 }
 0x233   :  { %2504 = vmatpush1.bf16.msra.mxu1 %v3134_v26 }
 0x234   :  { %2505 = vmatprep.subr.bf16.mxu1 %v3178_v5 }
 0x237   :  { %2506 = vmatpush1.bf16.msra.mxu1 %v3135_v27 }
 0x238   :  { %2507 = vmatprep.subr.bf16.mxu1 %v3178_v5 }
 0x23b   :  { %2508 = vmatpush1.bf16.msra.mxu1 %v3136_v28 }
 0x23c   :  { %2509 = vmatprep.subr.bf16.mxu1 %v3178_v5 }
 0x23f   :  { %2510 = vmatpush1.bf16.msra.mxu1 %v3137_v29 }
 0x240   :  { %2511 = vmatprep.subr.bf16.mxu1 %v3178_v5  ;;  %v3141_v5 = vld [vmem:[%s3926_s4 + $0x10] sm:$0xff]  }
 0x243   :  { %2512 = vmatpush1.bf16.msra.mxu1 %v3138_v12 }
 0x244   :  { %3006 = vmatprep.subr.bf16.mxu1 %v3179_v34 }
 0x246   :  { %2528 = vmatmul.mubr.bf16.vlgmr.msra.gmra.mrb[4].mxu1 %v2297_v31 }
 0x247   :  { %3007 = vmatpush3.bf16.msra.mxu1 %v3139_v33  ;;  %3022 = vmatprep.mubr.msk.bf16.mxu1 %vm3188_vm14, %v3179_v34 }
 0x248   :  { %3008 = vmatprep.subr.bf16.mxu1 %v3179_v34 }
 0x24b   :  { %3009 = vmatpush3.bf16.msra.mxu1 %v3140_v4 }
 0x24c   :  { %3010 = vmatprep.subr.bf16.mxu1 %v3179_v34 }
 0x24f   :  { %3011 = vmatpush3.bf16.msra.mxu1 %v3141_v5 }
 0x250   :  { %3012 = vmatprep.subr.bf16.mxu1 %v3179_v34 }
 0x253   :  { %3013 = vmatpush3.bf16.msra.mxu1 %v3142_v37 }
 0x254   :  { %3014 = vmatprep.subr.bf16.mxu1 %v3179_v34 }
 0x257   :  { %3015 = vmatpush3.bf16.msra.mxu1 %v3143_v38 }
 0x258   :  { %3016 = vmatprep.subr.bf16.mxu1 %v3179_v34 }
 0x25b   :  { %3017 = vmatpush3.bf16.msra.mxu1 %v3144_v40 }
 0x25c   :  { %3018 = vmatprep.subr.bf16.mxu1 %v3179_v34 }
 0x25f   :  { %3019 = vmatpush3.bf16.msra.mxu1 %v3145_v41 }
 0x260   :  { %3020 = vmatprep.subr.bf16.mxu1 %v3179_v34 }
 0x263   :  { %3021 = vmatpush3.bf16.msra.mxu1 %v2610_v44 }
 0x264   :  { %3026 = vmatprep.subr.bf16.mxu1 %v3179_v34 }
 0x2f5   :  { %v2983_v35 = vpop.f32.mrb[0].mxu1 }
 0x2f6   :  { %v2984_v8 = vpop.f32.mrb[1].mxu1 }
 0x2f7   :  { %v2985_v54 = vadd.f32 %v2984_v8, %v2983_v35  ;;  %v2986_v14 = vpop.f32.mrb[2].mxu1 }
 0x2f8   :  { %v2987_v39 = vpop.f32.mrb[3].mxu1 }
 0x2f9   :  { %v2490_v42 = vadd.f32 %v2985_v54, %v2900_v46 }
 0x319   :  { %v2529_v47 = vpop.f32.mrb[4].mxu1 }
 0x31a   :  { %v2530_v36 = vadd.f32 %v2529_v47, %v2490_v42  ;;  %v2531_v56 = vpop.f32.mrb[5].mxu1 }
 0x31b   :  { %v2532_v57 = vpop.f32.mrb[6].mxu1 }
 0x31c   :  { %v2535_v49 = vmax.f32 %v2530_v36, 0.0  ;;  %v2533_v21 = vpop.f32.mrb[7].mxu1 }
 0x31e   :  { %v2536_v55 = vpack.c.bf16 %v2535_v49, %v2535_v49 }
 0x320   :  { %3023 = vmatmul.mubr.msk.bf16.vlgmr.msra.gmra.mrb[8].mxu1 %vm2604_vm15, %v2536_v55 }
 0x321   :  { %3027 = vmatpush3.bf16.msra.mxu1 %v3147_v19  ;;  %3040 = vmatprep.mubr.msk.bf16.mxu1 %vm3188_vm14, %v3179_v34 }
 0x322   :  { %3028 = vmatprep.subr.bf16.mxu1 %v3179_v34 }
 0x325   :  { %3029 = vmatpush3.bf16.msra.mxu1 %v3148_v58 }
 0x326   :  { %3030 = vmatprep.subr.bf16.mxu1 %v3179_v34 }
 0x329   :  { %3031 = vmatpush3.bf16.msra.mxu1 %v3149_v59 }
 0x32a   :  { %3032 = vmatprep.subr.bf16.mxu1 %v3179_v34 }
 0x32d   :  { %3033 = vmatpush3.bf16.msra.mxu1 %v3150_v60 }
 0x32e   :  { %3034 = vmatprep.subr.bf16.mxu1 %v3179_v34 }
 0x331   :  { %3035 = vmatpush3.bf16.msra.mxu1 %v3151_v61 }
 0x332   :  { %3036 = vmatprep.subr.bf16.mxu1 %v3179_v34 }
 0x335   :  { %3037 = vmatpush3.bf16.msra.mxu1 %v3152_v45 }
 0x336   :  { %3038 = vmatprep.subr.bf16.mxu1 %v3179_v34  ;;  %v2938_v34 = vld [vmem:[%s3929_s7] ss:$0 sm:$0xff] }
 0x339   :  { %3039 = vmatpush3.bf16.msra.mxu1 %v2719_v63 }
 0x3f3   :  { %v2646_v2 = vpop.f32.mrb[8].mxu1 }
 0x3f4   :  { %v2647_v48 = vadd.f32 %v2928_v0, %v2646_v2  ;;  %v3024_v10 = vpop.f32.mrb[9].mxu1 }
 0x3f5   :  { %v2649_v3 = vpop.f32.mrb[10].mxu1 }
 0x3f6   :  { %v2652_v6 = vmax.f32 %v2647_v48, 0.0  ;;  %v3025_v7 = vpop.f32.mrb[11].mxu1 }
 0x3f8   :  { %v2653_v11 = vpack.c.bf16 %v2652_v6, %v2652_v6 }
 0x3fa   :  { %3041 = vmatmul.mubr.msk.bf16.vlgmr.msra.gmra.mrb[12].mxu1 %vm2713_vm1, %v2653_v11 }
 0x4cd   :  { %v2755_v13 = vpop.f32.mrb[12].mxu1 }
 0x4ce   :  { %v2756_v15 = vadd.f32 %v2938_v34, %v2755_v13  ;;  %v3042_v30 = vpop.f32.mrb[13].mxu1 }
 0x4cf   :  { %v2758_v50 = vpop.f32.mrb[14].mxu1 }
 0x4d0   :  { %v3043_v51 = vpop.f32.mrb[15].mxu1  ;;  %2762 = vst.msk [vmem:[#allocation9] sm:$0x3] %vm2761_vm2, %v2756_v15 }
 0x4d1   :  { %3165 = shalt.err (!%p3162_p4)
}
 0x4d2   :  { %s3166_s7 = scalar_lea.hbm %s3932_s10, 32 }
 0x4d3   :  { %p3167_p5 = scmp.ne.s32.totalorder %s3932_s10, %s3166_s7  ;;  %p3170_p6 = scmp.lt.u32.totalorder %s3166_s7, %s3932_s10 }
 0x4d5   :  { %p3172_p7 = pnand %p3170_p6, %p3167_p5 }
 0x4d7   :  { %3175 = shalt.err (!%p3172_p7)
}
 0x4d8   :  { %2772 = dma.vmem_to_hbm [thread:$0]  %s2770_s25, 32, %s3932_s10, [#allocation10]  }
 0x4d9   :  { %3176 = dma.done.wait [#allocation10], 32  }
 0x4da   :  { %3177 = vsyncadd [#allocation10], 4294967264 }
 0x4db   :  { %2776 = vsyncpa [#allocation10], 1 }

</bundles_post_ra>
